<compile_context>
chip_gen: v7x
topology: tpu7x:2x2x1
jax: 0.10.0
libtpu: 0.0.40
codegen_flags: <defaults>
</compile_context>

<pallas_src>
import jax
import jax.numpy as jnp
from jax.experimental import pallas as pl
from jax.experimental.pallas import tpu as pltpu

BN_EPS = 1e-5


def _linear_bn_relu(h, w, gb):
    """h: (B, K) f32, w: (K, N) bf16, gb: (2, N) f32 = [gamma; beta]. Returns (B, N) f32."""
    # Linear (bias omitted: exactly cancelled by the BN batch-mean subtraction below).
    z = jnp.dot(h.astype(jnp.bfloat16), w, preferred_element_type=jnp.float32)

    # BatchNorm1d, training mode: batch mean + biased variance (two-pass form),
    # folded into a per-feature scale on the centered activations + beta.
    inv_b = 1.0 / z.shape[0]
    mean = jnp.sum(z, axis=0, keepdims=True) * inv_b            # (1, N)
    zc = z - mean
    var = jnp.sum(zc * zc, axis=0, keepdims=True) * inv_b       # biased variance
    scale = gb[0:1, :] * jax.lax.rsqrt(var + BN_EPS)            # gamma * rsqrt(var+eps)

    # ReLU
    return jnp.maximum(zc * scale + gb[1:2, :], 0.0)


def _s2f_fused_kernel(x_ref, w1_ref, gb1_ref, gb2_ref, gb3_ref, w2_hbm, w3_hbm,
                      o_ref, w2_buf, w3_buf, sem):
    # Kick off the layer-2/3 weight streams (HBM -> VMEM) before any compute so they
    # overlap with the layer-1/2 matmuls + BN epilogues.
    w2_cp = pltpu.make_async_copy(w2_hbm, w2_buf, sem.at[0])
    w3_cp = pltpu.make_async_copy(w3_hbm, w3_buf, sem.at[1])
    w2_cp.start()
    w3_cp.start()

    h = _linear_bn_relu(x_ref[...], w1_ref[...], gb1_ref[...])

    w2_cp.wait()
    h = _linear_bn_relu(h, w2_buf[...], gb2_ref[...])

    w3_cp.wait()
    o_ref[...] = _linear_bn_relu(h, w3_buf[...], gb3_ref[...])


def prepare_s2f_params(params, k_pad=384):
    """One-time host-side prep: bf16 weights, packed (2,N) gamma/beta, K=300->384 pad."""
    (w1, _b1, g1, be1), (w2, _b2, g2, be2), (w3, _b3, g3, be3) = params
    k_in = w1.shape[0]
    w1p = jnp.zeros((k_pad, w1.shape[1]), w1.dtype).at[:k_in, :].set(w1)
    return {
        "w1": w1p.astype(jnp.bfloat16),
        "w2": w2.astype(jnp.bfloat16),
        "w3": w3.astype(jnp.bfloat16),
        "gb1": jnp.stack([g1, be1], axis=0).astype(jnp.float32),
        "gb2": jnp.stack([g2, be2], axis=0).astype(jnp.float32),
        "gb3": jnp.stack([g3, be3], axis=0).astype(jnp.float32),
    }


@jax.jit
def s2f_forward(x, prepared):
    """x: (B, 300) f32, B >= 2 (training-mode BatchNorm1d). Returns (B, feature_dim) f32."""
    w1, w2, w3 = prepared["w1"], prepared["w2"], prepared["w3"]
    gb1, gb2, gb3 = prepared["gb1"], prepared["gb2"], prepared["gb3"]

    B, k_in = x.shape
    assert B >= 2, "training-mode BatchNorm1d needs batch >= 2"
    k_pad = w1.shape[0]
    if k_in < k_pad:  # zero-pad K; exact because the corresponding W1 rows are zero
        x = jnp.pad(x, ((0, 0), (0, k_pad - k_in)))
    n3 = w3.shape[1]

    vmem = lambda: pl.BlockSpec(memory_space=pltpu.MemorySpace.VMEM)
    hbm = lambda: pl.BlockSpec(memory_space=pl.ANY)

    flops = 2 * B * (w1.shape[0] * w1.shape[1]
                     + w2.shape[0] * w2.shape[1]
                     + w3.shape[0] * w3.shape[1])
    bytes_accessed = (x.size * 4
                      + 2 * (w1.size + w2.size + w3.size)          # bf16 weights
                      + 4 * (gb1.size + gb2.size + gb3.size)
                      + B * n3 * 4)
    n_rsqrt = w1.shape[1] + w2.shape[1] + w3.shape[1]

    return pl.pallas_call(
        _s2f_fused_kernel,
        out_shape=jax.ShapeDtypeStruct((B, n3), jnp.float32),
        in_specs=[vmem(), vmem(), vmem(), vmem(), vmem(), hbm(), hbm()],
        out_specs=vmem(),
        scratch_shapes=[
            pltpu.VMEM(w2.shape, jnp.bfloat16),
            pltpu.VMEM(w3.shape, jnp.bfloat16),
            pltpu.SemaphoreType.DMA((2,)),
        ],
        cost_estimate=pl.CostEstimate(flops=flops, transcendentals=n_rsqrt,
                                      bytes_accessed=bytes_accessed),
    )(x, w1, gb1, gb2, gb3, w2, w3)


def init_s2f_params(key, feature_dim=1024):
    """Deterministic PyTorch-Linear-style init; weights stored pre-transposed (in, out)."""
    dims = [(300, 512), (512, 768), (768, feature_dim)]
    params = []
    for i, (fan_in, fan_out) in enumerate(dims):
        kw, kb = jax.random.split(jax.random.fold_in(key, i))
        bound = 1.0 / jnp.sqrt(fan_in)
        w_t = jax.random.uniform(kw, (fan_in, fan_out), jnp.float32, -bound, bound)
        b = jax.random.uniform(kb, (fan_out,), jnp.float32, -bound, bound)
        gamma = jnp.ones((fan_out,), jnp.float32)
        beta = jnp.zeros((fan_out,), jnp.float32)
        params.append((w_t, b, gamma, beta))
    return params


def s2f_reference(x, params, weight_dtype=jnp.float32):
    """Pure-JAX reference of the PyTorch forward (training-mode BatchNorm1d, with bias).

    weight_dtype=jnp.bfloat16 reproduces the kernel's precision strategy (bf16
    weights / bf16 LHS, f32 accumulation + f32 BN/ReLU epilogue).
    """
    h = x
    for (w_t, b, gamma, beta) in params:
        z = jnp.dot(h.astype(weight_dtype), w_t.astype(weight_dtype),
                    preferred_element_type=jnp.float32) + b
        mean = jnp.mean(z, axis=0, keepdims=True)
        var = jnp.mean((z - mean) ** 2, axis=0, keepdims=True)
        h = jnp.maximum(gamma * (z - mean) / jnp.sqrt(var + BN_EPS) + beta, 0.0)
    return h


if __name__ == "__main__":
    key = jax.random.PRNGKey(0)
    k_params, k_x = jax.random.split(key)

    feature_dim = 1024   # module default
    batch = 8            # small batch; training-mode BN needs B >= 2
    params = init_s2f_params(k_params, feature_dim=feature_dim)
    prepared = prepare_s2f_params(params)   # one-time host-side prep (outside jit path)
    x = jax.random.normal(k_x, (batch, 300), jnp.float32)

    out = jax.block_until_ready(s2f_forward(x, prepared))
    assert out.shape == (batch, feature_dim), out.shape

    # Correctness check against a pure-JAX reference using the SAME precision strategy
    # (bf16 weights / bf16 LHS, f32 accumulate + f32 BN).  Deviation from the full-f32
    # reference is the accepted bf16-weight-streaming tradeoff (~1e-2 relative).
    ref = s2f_reference(x, params, weight_dtype=jnp.bfloat16)
    max_err = float(jnp.max(jnp.abs(out - ref)))
    assert jnp.allclose(out, ref, atol=2e-2, rtol=2e-2), max_err

    print("KERNEL_OK")
</pallas_src>

<mosaic_0001>
module attributes {stable_mosaic.version = 11 : i64} {
  func.func @_s2f_fused_kernel(%arg0: memref<8x384xf32, #tpu.memory_space<vmem>>, %arg1: memref<384x512xbf16, #tpu.memory_space<vmem>>, %arg2: memref<2x512xf32, #tpu.memory_space<vmem>>, %arg3: memref<2x768xf32, #tpu.memory_space<vmem>>, %arg4: memref<2x1024xf32, #tpu.memory_space<vmem>>, %arg5: memref<512x768xbf16, #tpu.memory_space<any>>, %arg6: memref<768x1024xbf16, #tpu.memory_space<any>>, %arg7: memref<8x1024xf32, #tpu.memory_space<vmem>>, %arg8: memref<512x768xbf16, #tpu.memory_space<vmem>>, %arg9: memref<768x1024xbf16, #tpu.memory_space<vmem>>, %arg10: memref<2x!tpu.dma_semaphore, #tpu.memory_space<semaphore_mem>>) attributes {dimension_semantics = [], scalar_prefetch = 0 : i64, scratch_operands = 3 : i64, tpu.core_type = #tpu.core_type<tc>} {
    %c0_i32 = arith.constant 0 : i32
    %0 = tpu.memref_slice %arg10[%c0_i32] : memref<2x!tpu.dma_semaphore, #tpu.memory_space<semaphore_mem>> -> memref<1x!tpu.dma_semaphore, #tpu.memory_space<semaphore_mem>>
    %1 = tpu.memref_squeeze %0 : memref<1x!tpu.dma_semaphore, #tpu.memory_space<semaphore_mem>> -> memref<!tpu.dma_semaphore, #tpu.memory_space<semaphore_mem>>
    tpu.enqueue_dma source(%arg5 : memref<512x768xbf16, #tpu.memory_space<any>>) target(%arg8 : memref<512x768xbf16, #tpu.memory_space<vmem>>) target_semaphore(%1 : memref<!tpu.dma_semaphore, #tpu.memory_space<semaphore_mem>>)
    %c1_i32 = arith.constant 1 : i32
    %2 = tpu.memref_slice %arg10[%c1_i32] : memref<2x!tpu.dma_semaphore, #tpu.memory_space<semaphore_mem>> -> memref<1x!tpu.dma_semaphore, #tpu.memory_space<semaphore_mem>>
    %3 = tpu.memref_squeeze %2 : memref<1x!tpu.dma_semaphore, #tpu.memory_space<semaphore_mem>> -> memref<!tpu.dma_semaphore, #tpu.memory_space<semaphore_mem>>
    tpu.enqueue_dma source(%arg6 : memref<768x1024xbf16, #tpu.memory_space<any>>) target(%arg9 : memref<768x1024xbf16, #tpu.memory_space<vmem>>) target_semaphore(%3 : memref<!tpu.dma_semaphore, #tpu.memory_space<semaphore_mem>>)
    %c0 = arith.constant 0 : index
    %c0_0 = arith.constant 0 : index
    %4 = vector.load %arg0[%c0, %c0_0] : memref<8x384xf32, #tpu.memory_space<vmem>>, vector<8x384xf32>
    %c0_1 = arith.constant 0 : index
    %c0_2 = arith.constant 0 : index
    %5 = vector.load %arg1[%c0_1, %c0_2] : memref<384x512xbf16, #tpu.memory_space<vmem>>, vector<384x512xbf16>
    %c0_3 = arith.constant 0 : index
    %c0_4 = arith.constant 0 : index
    %6 = vector.load %arg2[%c0_3, %c0_4] : memref<2x512xf32, #tpu.memory_space<vmem>>, vector<2x512xf32>
    %7 = arith.truncf %4 : vector<8x384xf32> to vector<8x384xbf16>
    %cst = arith.constant dense<0.000000e+00> : vector<8x512xf32>
    %8 = tpu.matmul %7, %5, %cst {dimension_numbers = #tpu.dot_dimension_numbers<[1], [0], [0], [1], [0, 0, 1, 1], [], []>} : vector<8x384xbf16>, vector<384x512xbf16>, vector<8x512xf32> -> vector<8x512xf32>
    %cst_5 = arith.constant dense<0.000000e+00> : vector<512xf32>
    %9 = vector.multi_reduction <add>, %8, %cst_5 [0] : vector<8x512xf32> to vector<512xf32>
    %10 = vector.shape_cast %9 : vector<512xf32> to vector<1x512xf32>
    %cst_6 = arith.constant 1.250000e-01 : f32
    %11 = vector.broadcast %cst_6 : f32 to vector<1x512xf32>
    %12 = arith.mulf %10, %11 : vector<1x512xf32>
    %13 = vector.broadcast %12 : vector<1x512xf32> to vector<8x512xf32>
    %14 = arith.subf %8, %13 : vector<8x512xf32>
    %15 = arith.mulf %14, %14 : vector<8x512xf32>
    %cst_7 = arith.constant dense<0.000000e+00> : vector<512xf32>
    %16 = vector.multi_reduction <add>, %15, %cst_7 [0] : vector<8x512xf32> to vector<512xf32>
    %17 = vector.shape_cast %16 : vector<512xf32> to vector<1x512xf32>
    %cst_8 = arith.constant 1.250000e-01 : f32
    %18 = vector.broadcast %cst_8 : f32 to vector<1x512xf32>
    %19 = arith.mulf %17, %18 : vector<1x512xf32>
    %20 = vector.extract_strided_slice %6 {offsets = [0, 0], sizes = [1, 512], strides = [1, 1]} : vector<2x512xf32> to vector<1x512xf32>
    %cst_9 = arith.constant 9.99999974E-6 : f32
    %21 = vector.broadcast %cst_9 : f32 to vector<1x512xf32>
    %22 = arith.addf %19, %21 : vector<1x512xf32>
    %23 = math.rsqrt %22 : vector<1x512xf32>
    %24 = arith.mulf %20, %23 : vector<1x512xf32>
    %25 = vector.broadcast %24 : vector<1x512xf32> to vector<8x512xf32>
    %26 = arith.mulf %14, %25 : vector<8x512xf32>
    %27 = vector.extract_strided_slice %6 {offsets = [1, 0], sizes = [1, 512], strides = [1, 1]} : vector<2x512xf32> to vector<1x512xf32>
    %28 = vector.broadcast %27 : vector<1x512xf32> to vector<8x512xf32>
    %29 = arith.addf %26, %28 : vector<8x512xf32>
    %cst_10 = arith.constant 0.000000e+00 : f32
    %30 = vector.broadcast %cst_10 : f32 to vector<8x512xf32>
    %31 = arith.maximumf %29, %30 : vector<8x512xf32>
    %c0_i32_11 = arith.constant 0 : i32
    %32 = tpu.memref_slice %arg10[%c0_i32_11] : memref<2x!tpu.dma_semaphore, #tpu.memory_space<semaphore_mem>> -> memref<1x!tpu.dma_semaphore, #tpu.memory_space<semaphore_mem>>
    %33 = tpu.memref_squeeze %32 : memref<1x!tpu.dma_semaphore, #tpu.memory_space<semaphore_mem>> -> memref<!tpu.dma_semaphore, #tpu.memory_space<semaphore_mem>>
    tpu.wait_dma2 semaphore(%33 : memref<!tpu.dma_semaphore, #tpu.memory_space<semaphore_mem>>) src(%arg5 : memref<512x768xbf16, #tpu.memory_space<any>>) dst(%arg8 : memref<512x768xbf16, #tpu.memory_space<vmem>>)
    %c0_12 = arith.constant 0 : index
    %c0_13 = arith.constant 0 : index
    %34 = vector.load %arg8[%c0_12, %c0_13] : memref<512x768xbf16, #tpu.memory_space<vmem>>, vector<512x768xbf16>
    %c0_14 = arith.constant 0 : index
    %c0_15 = arith.constant 0 : index
    %35 = vector.load %arg3[%c0_14, %c0_15] : memref<2x768xf32, #tpu.memory_space<vmem>>, vector<2x768xf32>
    %36 = arith.truncf %31 : vector<8x512xf32> to vector<8x512xbf16>
    %cst_16 = arith.constant dense<0.000000e+00> : vector<8x768xf32>
    %37 = tpu.matmul %36, %34, %cst_16 {dimension_numbers = #tpu.dot_dimension_numbers<[1], [0], [0], [1], [0, 0, 1, 1], [], []>} : vector<8x512xbf16>, vector<512x768xbf16>, vector<8x768xf32> -> vector<8x768xf32>
    %cst_17 = arith.constant dense<0.000000e+00> : vector<768xf32>
    %38 = vector.multi_reduction <add>, %37, %cst_17 [0] : vector<8x768xf32> to vector<768xf32>
    %39 = vector.shape_cast %38 : vector<768xf32> to vector<1x768xf32>
    %cst_18 = arith.constant 1.250000e-01 : f32
    %40 = vector.broadcast %cst_18 : f32 to vector<1x768xf32>
    %41 = arith.mulf %39, %40 : vector<1x768xf32>
    %42 = vector.broadcast %41 : vector<1x768xf32> to vector<8x768xf32>
    %43 = arith.subf %37, %42 : vector<8x768xf32>
    %44 = arith.mulf %43, %43 : vector<8x768xf32>
    %cst_19 = arith.constant dense<0.000000e+00> : vector<768xf32>
    %45 = vector.multi_reduction <add>, %44, %cst_19 [0] : vector<8x768xf32> to vector<768xf32>
    %46 = vector.shape_cast %45 : vector<768xf32> to vector<1x768xf32>
    %cst_20 = arith.constant 1.250000e-01 : f32
    %47 = vector.broadcast %cst_20 : f32 to vector<1x768xf32>
    %48 = arith.mulf %46, %47 : vector<1x768xf32>
    %49 = vector.extract_strided_slice %35 {offsets = [0, 0], sizes = [1, 768], strides = [1, 1]} : vector<2x768xf32> to vector<1x768xf32>
    %cst_21 = arith.constant 9.99999974E-6 : f32
    %50 = vector.broadcast %cst_21 : f32 to vector<1x768xf32>
    %51 = arith.addf %48, %50 : vector<1x768xf32>
    %52 = math.rsqrt %51 : vector<1x768xf32>
    %53 = arith.mulf %49, %52 : vector<1x768xf32>
    %54 = vector.broadcast %53 : vector<1x768xf32> to vector<8x768xf32>
    %55 = arith.mulf %43, %54 : vector<8x768xf32>
    %56 = vector.extract_strided_slice %35 {offsets = [1, 0], sizes = [1, 768], strides = [1, 1]} : vector<2x768xf32> to vector<1x768xf32>
    %57 = vector.broadcast %56 : vector<1x768xf32> to vector<8x768xf32>
    %58 = arith.addf %55, %57 : vector<8x768xf32>
    %cst_22 = arith.constant 0.000000e+00 : f32
    %59 = vector.broadcast %cst_22 : f32 to vector<8x768xf32>
    %60 = arith.maximumf %58, %59 : vector<8x768xf32>
    %c1_i32_23 = arith.constant 1 : i32
    %61 = tpu.memref_slice %arg10[%c1_i32_23] : memref<2x!tpu.dma_semaphore, #tpu.memory_space<semaphore_mem>> -> memref<1x!tpu.dma_semaphore, #tpu.memory_space<semaphore_mem>>
    %62 = tpu.memref_squeeze %61 : memref<1x!tpu.dma_semaphore, #tpu.memory_space<semaphore_mem>> -> memref<!tpu.dma_semaphore, #tpu.memory_space<semaphore_mem>>
    tpu.wait_dma2 semaphore(%62 : memref<!tpu.dma_semaphore, #tpu.memory_space<semaphore_mem>>) src(%arg6 : memref<768x1024xbf16, #tpu.memory_space<any>>) dst(%arg9 : memref<768x1024xbf16, #tpu.memory_space<vmem>>)
    %c0_24 = arith.constant 0 : index
    %c0_25 = arith.constant 0 : index
    %63 = vector.load %arg9[%c0_24, %c0_25] : memref<768x1024xbf16, #tpu.memory_space<vmem>>, vector<768x1024xbf16>
    %c0_26 = arith.constant 0 : index
    %c0_27 = arith.constant 0 : index
    %64 = vector.load %arg4[%c0_26, %c0_27] : memref<2x1024xf32, #tpu.memory_space<vmem>>, vector<2x1024xf32>
    %65 = arith.truncf %60 : vector<8x768xf32> to vector<8x768xbf16>
    %cst_28 = arith.constant dense<0.000000e+00> : vector<8x1024xf32>
    %66 = tpu.matmul %65, %63, %cst_28 {dimension_numbers = #tpu.dot_dimension_numbers<[1], [0], [0], [1], [0, 0, 1, 1], [], []>} : vector<8x768xbf16>, vector<768x1024xbf16>, vector<8x1024xf32> -> vector<8x1024xf32>
    %cst_29 = arith.constant dense<0.000000e+00> : vector<1024xf32>
    %67 = vector.multi_reduction <add>, %66, %cst_29 [0] : vector<8x1024xf32> to vector<1024xf32>
    %68 = vector.shape_cast %67 : vector<1024xf32> to vector<1x1024xf32>
    %cst_30 = arith.constant 1.250000e-01 : f32
    %69 = vector.broadcast %cst_30 : f32 to vector<1x1024xf32>
    %70 = arith.mulf %68, %69 : vector<1x1024xf32>
    %71 = vector.broadcast %70 : vector<1x1024xf32> to vector<8x1024xf32>
    %72 = arith.subf %66, %71 : vector<8x1024xf32>
    %73 = arith.mulf %72, %72 : vector<8x1024xf32>
    %cst_31 = arith.constant dense<0.000000e+00> : vector<1024xf32>
    %74 = vector.multi_reduction <add>, %73, %cst_31 [0] : vector<8x1024xf32> to vector<1024xf32>
    %75 = vector.shape_cast %74 : vector<1024xf32> to vector<1x1024xf32>
    %cst_32 = arith.constant 1.250000e-01 : f32
    %76 = vector.broadcast %cst_32 : f32 to vector<1x1024xf32>
    %77 = arith.mulf %75, %76 : vector<1x1024xf32>
    %78 = vector.extract_strided_slice %64 {offsets = [0, 0], sizes = [1, 1024], strides = [1, 1]} : vector<2x1024xf32> to vector<1x1024xf32>
    %cst_33 = arith.constant 9.99999974E-6 : f32
    %79 = vector.broadcast %cst_33 : f32 to vector<1x1024xf32>
    %80 = arith.addf %77, %79 : vector<1x1024xf32>
    %81 = math.rsqrt %80 : vector<1x1024xf32>
    %82 = arith.mulf %78, %81 : vector<1x1024xf32>
    %83 = vector.broadcast %82 : vector<1x1024xf32> to vector<8x1024xf32>
    %84 = arith.mulf %72, %83 : vector<8x1024xf32>
    %85 = vector.extract_strided_slice %64 {offsets = [1, 0], sizes = [1, 1024], strides = [1, 1]} : vector<2x1024xf32> to vector<1x1024xf32>
    %86 = vector.broadcast %85 : vector<1x1024xf32> to vector<8x1024xf32>
    %87 = arith.addf %84, %86 : vector<8x1024xf32>
    %cst_34 = arith.constant 0.000000e+00 : f32
    %88 = vector.broadcast %cst_34 : f32 to vector<8x1024xf32>
    %89 = arith.maximumf %87, %88 : vector<8x1024xf32>
    %c0_35 = arith.constant 0 : index
    %c0_36 = arith.constant 0 : index
    %90 = vector.load %arg7[%c0_35, %c0_36] : memref<8x1024xf32, #tpu.memory_space<vmem>>, vector<8x1024xf32>
    tpu.vector_store %arg7[%c0_35, %c0_36], %89 {strides = array<i32>} : memref<8x1024xf32, #tpu.memory_space<vmem>>, vector<8x1024xf32>,
    return
  }
}

</mosaic_0001>

<bundles_post_ra>
// kernel: s2f_forward.1
= control target key start
LH: loop header
LB: loop body
LE: loop exit
PB: predicated region body
PF: predicated region fallthrough
CT: control target
= control target key end

     0   :  { %12 = vsyncpa [#allocation6], 0  ;;  %s3999_s0 = inlined_call_operand.vmem [shape: f32[8,384], index: 0, kind: input, shape index: {}]   ;;  %s4000_s1 = inlined_call_operand.hbm [shape: bf16[384,512], index: 1, kind: input, shape index: {}]   ;;  %s4001_s2 = inlined_call_operand.hbm [shape: f32[2,512], index: 2, kind: input, shape index: {}]   ;;  %s4002_s3 = inlined_call_operand.hbm [shape: f32[2,768], index: 3, kind: input, shape index: {}]   ;;  %s4003_s4 = inlined_call_operand.hbm [shape: f32[2,1024], index: 4, kind: input, shape index: {}]   ;;  %s4004_s5 = inlined_call_operand.hbm [shape: bf16[512,768], index: 5, kind: input, shape index: {}]   ;;  %s4005_s6 = inlined_call_operand.hbm [shape: bf16[768,1024], index: 6, kind: input, shape index: {}]   ;;  %s4006_s7 = inlined_call_operand.hbm [shape: f32[8,1024], index: 7, kind: output, shape index: {}]  }
   0x1   :  { %13 = vsyncpa [#allocation9], 0 }
   0x2   :  { %14 = vsyncpa [#allocation12], 0 }
   0x3   :  { %15 = vsyncpa [#allocation7], 0  ;;  %s3559_s24 = smov [#allocation8]   ;;  %s3560_s26 = smov [#allocation5]  }
   0x4   :  { %s36_s25 = sshll.u32 %s3559_s24, 4  ;;  %s23_s27 = sshll.u32 %s3560_s26, 4  ;;  %s37_s25 = int_to_ptr.vmem [resolvable:$true] %s36_s25  ;;  %s3624_s27 = int_to_ptr.vmem [resolvable:$true] %s23_s27 }
   0x5   :  { %s3437_s30 = scalar_lea.hbm %s4001_s2, 128 }
   0x6   :  { %p3438_p0 = scmp.ne.s32.totalorder %s4001_s2, %s3437_s30  ;;  %p3441_p1 = scmp.lt.u32.totalorder %s3437_s30, %s4001_s2 }
   0x8   :  { %p3443_p2 = pnand %p3441_p1, %p3438_p0 }
   0xa   :  { %3446 = shalt.err (!%p3443_p2)
}
   0xb   :  { %s3447_s12 = scalar_lea.vmem %s37_s25, 128  ;;  %p3452_p4 = scmp.lt.s32.totalorder %s37_s25, %s37_s25 }
   0xc   :  { %p3448_p3 = scmp.ne.s32.totalorder %s37_s25, %s3447_s12  ;;  %p3453_p5 = scmp.lt.s32.totalorder %s3447_s12, %s3447_s12 }
   0xe   :  { %p3454_p6 = por %p3453_p5, %p3452_p4 }
  0x10   :  { %p3455_p7 = pnand %p3454_p6, %p3448_p3 }
  0x12   :  { %3458 = shalt.err (!%p3455_p7)
}
  0x13   :  { %39 = dma.hbm_to_vmem [thread:$0]  %s4001_s2, 128, %s37_s25, [#allocation9]  }
  0x14   :  { %s3459_s17 = scalar_lea.hbm %s4000_s1, 12288 }
  0x15   :  { %p3460_p8 = scmp.ne.s32.totalorder %s4000_s1, %s3459_s17  ;;  %p3463_p9 = scmp.lt.u32.totalorder %s3459_s17, %s4000_s1 }
  0x17   :  { %p3465_p10 = pnand %p3463_p9, %p3460_p8 }
  0x19   :  { %3468 = shalt.err (!%p3465_p10)
}
  0x1a   :  { %s3469_s22 = scalar_lea.vmem %s3624_s27, 12288  ;;  %p3474_p12 = scmp.lt.s32.totalorder %s3624_s27, %s3624_s27 }
  0x1b   :  { %p3470_p11 = scmp.ne.s32.totalorder %s3624_s27, %s3469_s22  ;;  %p3475_p13 = scmp.lt.s32.totalorder %s3469_s22, %s3469_s22 }
  0x1d   :  { %p3476_p0 = por %p3475_p13, %p3474_p12 }
  0x1f   :  { %p3477_p1 = pnand %p3476_p0, %p3470_p11 }
  0x21   :  { %3480 = shalt.err (!%p3477_p1)
}
  0x22   :  { %s3561_s2 = smov 256   ;;  %s3562_s23 = smov 16  }
  0x23   :  { %29 = dma.hbm_to_vmem [thread:$0]  %s4000_s1, 12288, %s3624_s27, [#allocation6], %s3561_s2, %s3561_s2, %s3562_s23  }
  0x24   :  { %s3563_s26 = smov [#allocation10]   ;;  %s3564_s29 = smov [#allocation11]  }
  0x25   :  { %s46_s28 = sshll.u32 %s3563_s26, 4  ;;  %s56_s30 = sshll.u32 %s3564_s29, 4  ;;  %s47_s28 = int_to_ptr.vmem [resolvable:$true] %s46_s28  ;;  %s57_s30 = int_to_ptr.vmem [resolvable:$true] %s56_s30 }
  0x26   :  { %s3481_s10 = scalar_lea.hbm %s4002_s3, 192 }
  0x27   :  { %p3482_p2 = scmp.ne.s32.totalorder %s4002_s3, %s3481_s10  ;;  %p3485_p3 = scmp.lt.u32.totalorder %s3481_s10, %s4002_s3 }
  0x29   :  { %p3487_p4 = pnand %p3485_p3, %p3482_p2 }
  0x2b   :  { %3490 = shalt.err (!%p3487_p4)
}
  0x2c   :  { %s3491_s1 = scalar_lea.vmem %s47_s28, 192  ;;  %p3496_p6 = scmp.lt.s32.totalorder %s47_s28, %s47_s28 }
  0x2d   :  { %p3492_p5 = scmp.ne.s32.totalorder %s47_s28, %s3491_s1  ;;  %p3497_p7 = scmp.lt.s32.totalorder %s3491_s1, %s3491_s1 }
  0x2f   :  { %p3498_p8 = por %p3497_p7, %p3496_p6 }
  0x31   :  { %p3499_p9 = pnand %p3498_p8, %p3492_p5 }
  0x33   :  { %3502 = shalt.err (!%p3499_p9)
}
  0x34   :  { %49 = dma.hbm_to_vmem [thread:$0]  %s4002_s3, 192, %s47_s28, [#allocation9]  }
  0x35   :  { %s3503_s18 = scalar_lea.hbm %s4003_s4, 256 }
  0x36   :  { %p3504_p10 = scmp.ne.s32.totalorder %s4003_s4, %s3503_s18  ;;  %p3507_p11 = scmp.lt.u32.totalorder %s3503_s18, %s4003_s4 }
  0x38   :  { %p3509_p12 = pnand %p3507_p11, %p3504_p10 }
  0x3a   :  { %3512 = shalt.err (!%p3509_p12)
}
  0x3b   :  { %s3513_s2 = scalar_lea.vmem %s57_s30, 256  ;;  %p3518_p0 = scmp.lt.s32.totalorder %s57_s30, %s57_s30 }
  0x3c   :  { %p3514_p13 = scmp.ne.s32.totalorder %s57_s30, %s3513_s2  ;;  %p3519_p1 = scmp.lt.s32.totalorder %s3513_s2, %s3513_s2 }
  0x3e   :  { %p3520_p2 = por %p3519_p1, %p3518_p0 }
  0x40   :  { %p3521_p3 = pnand %p3520_p2, %p3514_p13 }
  0x42   :  { %3524 = shalt.err (!%p3521_p3)
}
  0x43   :  { %59 = dma.hbm_to_vmem [thread:$0]  %s4003_s4, 256, %s57_s30, [#allocation12]  }
  0x44   :  { %3547 = dma.done.wait [#allocation6], 12288  }
  0x45   :  { %3548 = vsyncadd [#allocation6], 4294955008 }
  0x46   :  { %3549 = dma.done.wait [#allocation9], 320  }
  0x47   :  { %3550 = vsyncadd [#allocation9], 4294966976 }
  0x48   :  { %3551 = dma.done.wait [#allocation12], 256  }
  0x49   :  { %3552 = vsyncadd [#allocation12], 4294967040  ;;  %s77_s24 = sld [smem:[#allocation0]]   ;;  %s3565_s25 = smov 768   ;;  %v3566_v0 = vmov 0  }
  0x4a   :  { %89 = sst [smem:[#allocation15]] %s3565_s25  ;;  %799 = vmatprep.mubr.bf16.mxu0 %v3566_v0  ;;  %s3567_s26 = smov 6  }
  0x4b   :  { %91 = sst [smem:[#allocation15 + $0x1]] %s3565_s25  ;;  %s3568_s28 = smov 384  }
  0x4c   :  { %93 = sst [smem:[#allocation15 + $0x2]] %s3567_s26  ;;  %s3569_s29 = smov [#allocation2]  }
  0x4d   :  { %101 = sst [smem:[#allocation15 + $0x6]] %s3568_s28  ;;  %s85_s8 = sshll.u32 %s3569_s29, 4  ;;  %s86_s8 = int_to_ptr.vmem [resolvable:$true] %s85_s8 }
  0x4e   :  { %s3570_s4 = smov 64   ;;  %s3571_s9 = smov 128  }
  0x4f   :  { %95 = sst [smem:[#allocation15 + $0x3]] %s3570_s4  ;;  %s3080_s30 = sshll.u32 %s77_s24, 26 }
  0x50   :  { %97 = sst [smem:[#allocation15 + $0x4]] %s3571_s9  ;;  %s3680_s10 = sadd.s32 134217728, %s3080_s30 }
  0x51   :  { %s3572_s11 = smov 2   ;;  %103 = sst [smem:[#allocation15 + $0x7]] %s3570_s4 }
  0x52   :  { %99 = sst [smem:[#allocation15 + $0x5]] %s3572_s11  ;;  %s3573_s12 = smov 4  }
  0x53   :  { %105 = sst [smem:[#allocation15 + $0x8]] %s3573_s12  ;;  %s3574_s13 = smov [#allocation4]  }
  0x54   :  { %s3575_s14 = smov [#allocation14]   ;;  %s3576_s15 = smov 1024  }
  0x55   :  { %107 = dma.general %s4004_s5, 24576, %s86_s8, %s3574_s13, %s3575_s14, [#allocation15], %s3680_s10, 0  }
  0x56   :  { %124 = sst [smem:[#allocation17]] %s3576_s15  ;;  %s3577_s16 = smov 8  }
  0x57   :  { %126 = sst [smem:[#allocation17 + $0x1]] %s3576_s15  ;;  %s3578_s17 = smov [#allocation3]  }
  0x58   :  { %128 = sst [smem:[#allocation17 + $0x2]] %s3577_s16  ;;  %s120_s18 = sshll.u32 %s3578_s17, 4  ;;  %s121_s18 = int_to_ptr.vmem [resolvable:$true] %s120_s18 }
  0x59   :  { %130 = sst [smem:[#allocation17 + $0x3]] %s3570_s4  ;;  %s3579_s19 = smov 512  }
  0x5a   :  { %132 = sst [smem:[#allocation17 + $0x4]] %s3571_s9  ;;  %s3580_s20 = smov [#allocation4 + $0x1]  }
  0x5b   :  { %134 = sst [smem:[#allocation17 + $0x5]] %s3572_s11  ;;  %s3581_s21 = smov [#allocation16]  }
  0x5c   :  { %136 = sst [smem:[#allocation17 + $0x6]] %s3579_s19 }
  0x5d   :  { %138 = sst [smem:[#allocation17 + $0x7]] %s3570_s4 }
  0x5e   :  { %140 = sst [smem:[#allocation17 + $0x8]] %s3573_s12 }
  0x5f   :  { %142 = dma.general %s4005_s6, 49152, %s121_s18, %s3580_s20, %s3581_s21, [#allocation17], %s3680_s10, 0  }
  0x60   :  { %v3257_v1 = vld [vmem:[#allocation5 + $0x4] ss:$16 sps:$4 sm:$0xff]   ;;  %v3259_v2 = vld [vmem:[#allocation5] ss:$16 sps:$4 sm:$0xff]   ;;  %v144_v33 = vld [vmem:[%s3999_s0 + $0x8] sm:$0xff] }
  0x61   :  { %726 = vmatprep.subr.bf16.mxu1 %v3257_v1  ;;  %v3260_v3 = vld [vmem:[#allocation5 + $0x24] ss:$16 sps:$4 sm:$0xff]   ;;  %v3262_v4 = vld [vmem:[#allocation5 + $0x20] ss:$16 sps:$4 sm:$0xff]   ;;  %v244_v34 = vpack.c.bf16 %v144_v33, %v144_v33  ;;  %v3331_v54 = vld [vmem:[#allocation5 + $0xc] ss:$16 sps:$4 sm:$0xff]  }
  0x62   :  { %727 = vmatpush1.bf16.msra.mxu1 %v3259_v2  ;;  %v3263_v5 = vld [vmem:[#allocation5 + $0x44] ss:$16 sps:$4 sm:$0xff]   ;;  %v3265_v6 = vld [vmem:[#allocation5 + $0x40] ss:$16 sps:$4 sm:$0xff]   ;;  %v3329_v56 = vld [vmem:[#allocation5 + $0x8] ss:$16 sps:$4 sm:$0xff]  }
  0x63   :  { %728 = vmatprep.subr.bf16.mxu1 %v3260_v3  ;;  %v3266_v7 = vld [vmem:[#allocation5 + $0x64] ss:$16 sps:$4 sm:$0xff]   ;;  %v3268_v8 = vld [vmem:[#allocation5 + $0x60] ss:$16 sps:$4 sm:$0xff]   ;;  %758 = vmatprep.mubr.bf16.mxu1 %v244_v34  ;;  %v3334_v57 = vld [vmem:[#allocation5 + $0x2c] ss:$16 sps:$4 sm:$0xff]  }
  0x64   :  { %v3269_v9 = vld [vmem:[#allocation5 + $0x84] ss:$16 sps:$4 sm:$0xff]   ;;  %v3286_v11 = vld [vmem:[#allocation5 + $0x200] ss:$16 sps:$4 sm:$0xff]   ;;  %v3332_v58 = vld [vmem:[#allocation5 + $0x28] ss:$16 sps:$4 sm:$0xff]  }
  0x65   :  { %v3283_v10 = vld [vmem:[#allocation5 + $0x204] ss:$16 sps:$4 sm:$0xff]   ;;  %v3271_v12 = vld [vmem:[#allocation5 + $0x80] ss:$16 sps:$4 sm:$0xff]   ;;  %v3337_v59 = vld [vmem:[#allocation5 + $0x4c] ss:$16 sps:$4 sm:$0xff]  }
  0x66   :  { %729 = vmatpush1.bf16.msra.mxu1 %v3262_v4  ;;  %767 = vmatprep.subr.bf16.mxu0 %v3283_v10  ;;  %v3289_v13 = vld [vmem:[#allocation5 + $0x224] ss:$16 sps:$4 sm:$0xff]   ;;  %v3292_v14 = vld [vmem:[#allocation5 + $0x220] ss:$16 sps:$4 sm:$0xff]   ;;  %v3335_v60 = vld [vmem:[#allocation5 + $0x48] ss:$16 sps:$4 sm:$0xff]  }
  0x67   :  { %730 = vmatprep.subr.bf16.mxu1 %v3263_v5  ;;  %768 = vmatpush1.bf16.msra.mxu0 %v3286_v11  ;;  %v3272_v15 = vld [vmem:[#allocation5 + $0xa4] ss:$16 sps:$4 sm:$0xff]   ;;  %v3274_v17 = vld [vmem:[#allocation5 + $0xa0] ss:$16 sps:$4 sm:$0xff]   ;;  %v3340_v61 = vld [vmem:[#allocation5 + $0x6c] ss:$16 sps:$4 sm:$0xff]  }
  0x68   :  { %769 = vmatprep.subr.bf16.mxu0 %v3289_v13  ;;  %v3295_v16 = vld [vmem:[#allocation5 + $0x244] ss:$16 sps:$4 sm:$0xff]   ;;  %v3298_v18 = vld [vmem:[#allocation5 + $0x240] ss:$16 sps:$4 sm:$0xff]   ;;  %v3338_v62 = vld [vmem:[#allocation5 + $0x68] ss:$16 sps:$4 sm:$0xff]  }
  0x69   :  { %v3275_v19 = vld [vmem:[#allocation5 + $0xc4] ss:$16 sps:$4 sm:$0xff]   ;;  %v3277_v21 = vld [vmem:[#allocation5 + $0xc0] ss:$16 sps:$4 sm:$0xff]   ;;  %v3343_v63 = vld [vmem:[#allocation5 + $0x8c] ss:$16 sps:$4 sm:$0xff]  }
  0x6a   :  { %731 = vmatpush1.bf16.msra.mxu1 %v3265_v6  ;;  %v3301_v20 = vld [vmem:[#allocation5 + $0x264] ss:$16 sps:$4 sm:$0xff]   ;;  %v3304_v23 = vld [vmem:[#allocation5 + $0x260] ss:$16 sps:$4 sm:$0xff]   ;;  %v3341_v1 = vld [vmem:[#allocation5 + $0x88] ss:$16 sps:$4 sm:$0xff]  }
  0x6b   :  { %732 = vmatprep.subr.bf16.mxu1 %v3266_v7  ;;  %770 = vmatpush1.bf16.msra.mxu0 %v3292_v14  ;;  %v3278_v22 = vld [vmem:[#allocation5 + $0xe4] ss:$16 sps:$4 sm:$0xff]   ;;  %v3280_v25 = vld [vmem:[#allocation5 + $0xe0] ss:$16 sps:$4 sm:$0xff]   ;;  %v3346_v2 = vld [vmem:[#allocation5 + $0xac] ss:$16 sps:$4 sm:$0xff]  }
  0x6c   :  { %771 = vmatprep.subr.bf16.mxu0 %v3295_v16  ;;  %v3307_v24 = vld [vmem:[#allocation5 + $0x284] ss:$16 sps:$4 sm:$0xff]   ;;  %v3310_v26 = vld [vmem:[#allocation5 + $0x280] ss:$16 sps:$4 sm:$0xff]   ;;  %v3344_v3 = vld [vmem:[#allocation5 + $0xa8] ss:$16 sps:$4 sm:$0xff]  }
  0x6d   :  { %v3281_v27 = vld [vmem:[#allocation5 + $0x104] ss:$16 sps:$4 sm:$0xff]   ;;  %v3285_v29 = vld [vmem:[#allocation5 + $0x100] ss:$16 sps:$4 sm:$0xff]   ;;  %v3349_v4 = vld [vmem:[#allocation5 + $0xcc] ss:$16 sps:$4 sm:$0xff]  }
  0x6e   :  { %733 = vmatpush1.bf16.msra.mxu1 %v3268_v8  ;;  %v3313_v28 = vld [vmem:[#allocation5 + $0x2a4] ss:$16 sps:$4 sm:$0xff]   ;;  %v3316_v30 = vld [vmem:[#allocation5 + $0x2a0] ss:$16 sps:$4 sm:$0xff]   ;;  %v3347_v5 = vld [vmem:[#allocation5 + $0xc8] ss:$16 sps:$4 sm:$0xff]  }
  0x6f   :  { %734 = vmatprep.subr.bf16.mxu1 %v3269_v9  ;;  %772 = vmatpush1.bf16.msra.mxu0 %v3298_v18  ;;  %v3287_v31 = vld [vmem:[#allocation5 + $0x124] ss:$16 sps:$4 sm:$0xff]   ;;  %v3291_v35 = vld [vmem:[#allocation5 + $0x120] ss:$16 sps:$4 sm:$0xff]   ;;  %v3352_v6 = vld [vmem:[#allocation5 + $0xec] ss:$16 sps:$4 sm:$0xff]  }
  0x70   :  { %773 = vmatprep.subr.bf16.mxu0 %v3301_v20  ;;  %v3319_v32 = vld [vmem:[#allocation5 + $0x2c4] ss:$16 sps:$4 sm:$0xff]   ;;  %v3322_v36 = vld [vmem:[#allocation5 + $0x2c0] ss:$16 sps:$4 sm:$0xff]   ;;  %v3350_v7 = vld [vmem:[#allocation5 + $0xe8] ss:$16 sps:$4 sm:$0xff]  }
  0x71   :  { %v3293_v37 = vld [vmem:[#allocation5 + $0x144] ss:$16 sps:$4 sm:$0xff]   ;;  %v3297_v39 = vld [vmem:[#allocation5 + $0x140] ss:$16 sps:$4 sm:$0xff]   ;;  %v3355_v8 = vld [vmem:[#allocation5 + $0x10c] ss:$16 sps:$4 sm:$0xff]  }
  0x72   :  { %735 = vmatpush1.bf16.msra.mxu1 %v3271_v12  ;;  %v3325_v38 = vld [vmem:[#allocation5 + $0x2e4] ss:$16 sps:$4 sm:$0xff]   ;;  %v3328_v40 = vld [vmem:[#allocation5 + $0x2e0] ss:$16 sps:$4 sm:$0xff]   ;;  %v3353_v9 = vld [vmem:[#allocation5 + $0x108] ss:$16 sps:$4 sm:$0xff]  }
  0x73   :  { %736 = vmatprep.subr.bf16.mxu1 %v3272_v15  ;;  %774 = vmatpush1.bf16.msra.mxu0 %v3304_v23  ;;  %v145_v41 = vld [vmem:[%s3999_s0 + $0x10] sm:$0xff]  ;;  %v143_v53 = vld [vmem:[%s3999_s0] sm:$0xff]  ;;  %v3358_v10 = vld [vmem:[#allocation5 + $0x12c] ss:$16 sps:$4 sm:$0xff]  }
  0x74   :  { %775 = vmatprep.subr.bf16.mxu0 %v3307_v24  ;;  %v3299_v42 = vld [vmem:[#allocation5 + $0x164] ss:$16 sps:$4 sm:$0xff]   ;;  %v3696_v43 = vpack.c.bf16 %v145_v41, %v145_v41  ;;  %v3303_v44 = vld [vmem:[#allocation5 + $0x160] ss:$16 sps:$4 sm:$0xff]   ;;  %v3702_v55 = vpack.c.bf16 %v143_v53, %v143_v53  ;;  %v3356_v11 = vld [vmem:[#allocation5 + $0x128] ss:$16 sps:$4 sm:$0xff]  }
  0x75   :  { %v3305_v45 = vld [vmem:[#allocation5 + $0x184] ss:$16 sps:$4 sm:$0xff]   ;;  %v3309_v46 = vld [vmem:[#allocation5 + $0x180] ss:$16 sps:$4 sm:$0xff]   ;;  %v3361_v12 = vld [vmem:[#allocation5 + $0x14c] ss:$16 sps:$4 sm:$0xff]  }
  0x76   :  { %737 = vmatpush1.bf16.msra.mxu1 %v3274_v17  ;;  %v3311_v47 = vld [vmem:[#allocation5 + $0x1a4] ss:$16 sps:$4 sm:$0xff]   ;;  %v3315_v48 = vld [vmem:[#allocation5 + $0x1a0] ss:$16 sps:$4 sm:$0xff]   ;;  %v3359_v13 = vld [vmem:[#allocation5 + $0x148] ss:$16 sps:$4 sm:$0xff]  }
  0x77   :  { %738 = vmatprep.subr.bf16.mxu1 %v3275_v19  ;;  %776 = vmatpush1.bf16.msra.mxu0 %v3310_v26  ;;  %v3317_v49 = vld [vmem:[#allocation5 + $0x1c4] ss:$16 sps:$4 sm:$0xff]   ;;  %v3321_v50 = vld [vmem:[#allocation5 + $0x1c0] ss:$16 sps:$4 sm:$0xff]   ;;  %v3364_v14 = vld [vmem:[#allocation5 + $0x16c] ss:$16 sps:$4 sm:$0xff]  }
  0x78   :  { %777 = vmatprep.subr.bf16.mxu0 %v3313_v28  ;;  %v3323_v51 = vld [vmem:[#allocation5 + $0x1e4] ss:$16 sps:$4 sm:$0xff]   ;;  %v3327_v52 = vld [vmem:[#allocation5 + $0x1e0] ss:$16 sps:$4 sm:$0xff]   ;;  %v3362_v15 = vld [vmem:[#allocation5 + $0x168] ss:$16 sps:$4 sm:$0xff]  }
  0x79   :  { %v3367_v16 = vld [vmem:[#allocation5 + $0x18c] ss:$16 sps:$4 sm:$0xff]   ;;  %v3365_v17 = vld [vmem:[#allocation5 + $0x188] ss:$16 sps:$4 sm:$0xff]  }
  0x7a   :  { %739 = vmatpush1.bf16.msra.mxu1 %v3277_v21  ;;  %v3370_v18 = vld [vmem:[#allocation5 + $0x1ac] ss:$16 sps:$4 sm:$0xff]   ;;  %v3368_v19 = vld [vmem:[#allocation5 + $0x1a8] ss:$16 sps:$4 sm:$0xff]  }
  0x7b   :  { %740 = vmatprep.subr.bf16.mxu1 %v3278_v22  ;;  %778 = vmatpush1.bf16.msra.mxu0 %v3316_v30  ;;  %v3373_v20 = vld [vmem:[#allocation5 + $0x1cc] ss:$16 sps:$4 sm:$0xff]   ;;  %v3371_v21 = vld [vmem:[#allocation5 + $0x1c8] ss:$16 sps:$4 sm:$0xff]  }
  0x7c   :  { %779 = vmatprep.subr.bf16.mxu0 %v3319_v32  ;;  %v3376_v22 = vld [vmem:[#allocation5 + $0x1ec] ss:$16 sps:$4 sm:$0xff]   ;;  %v3374_v23 = vld [vmem:[#allocation5 + $0x1e8] ss:$16 sps:$4 sm:$0xff]  }
  0x7d   :  { %v3379_v24 = vld [vmem:[#allocation5 + $0x20c] ss:$16 sps:$4 sm:$0xff]   ;;  %v3389_v33 = vld [vmem:[#allocation5 + $0x288] ss:$16 sps:$4 sm:$0xff]  }
  0x7e   :  { %741 = vmatpush1.bf16.msra.mxu1 %v3280_v25  ;;  %v3377_v25 = vld [vmem:[#allocation5 + $0x208] ss:$16 sps:$4 sm:$0xff]   ;;  %v3382_v26 = vld [vmem:[#allocation5 + $0x22c] ss:$16 sps:$4 sm:$0xff]  }
  0x7f   :  { %742 = vmatprep.subr.bf16.mxu1 %v3281_v27  ;;  %780 = vmatpush1.bf16.msra.mxu0 %v3322_v36  ;;  %v3380_v27 = vld [vmem:[#allocation5 + $0x228] ss:$16 sps:$4 sm:$0xff]   ;;  %v3385_v28 = vld [vmem:[#allocation5 + $0x24c] ss:$16 sps:$4 sm:$0xff]  }
  0x80   :  { %781 = vmatprep.subr.bf16.mxu0 %v3325_v38  ;;  %v3388_v30 = vld [vmem:[#allocation5 + $0x26c] ss:$16 sps:$4 sm:$0xff]   ;;  %v3398_v38 = vld [vmem:[#allocation5 + $0x2e8] ss:$16 sps:$4 sm:$0xff]  }
  0x81   :  { %v3391_v32 = vld [vmem:[#allocation5 + $0x28c] ss:$16 sps:$4 sm:$0xff]  }
  0x82   :  { %743 = vmatpush1.bf16.msra.mxu1 %v3285_v29  ;;  %v3383_v29 = vld [vmem:[#allocation5 + $0x248] ss:$16 sps:$4 sm:$0xff]   ;;  %v3397_v36 = vld [vmem:[#allocation5 + $0x2cc] ss:$16 sps:$4 sm:$0xff]  }
  0x83   :  { %744 = vmatprep.subr.bf16.mxu1 %v3287_v31  ;;  %782 = vmatpush1.bf16.msra.mxu0 %v3328_v40  ;;  %v3386_v31 = vld [vmem:[#allocation5 + $0x268] ss:$16 sps:$4 sm:$0xff]  }
  0x86   :  { %745 = vmatpush1.bf16.msra.mxu1 %v3291_v35  ;;  %800 = vmatmul.mubr.bf16.vlgmr.msra.gmra.mrb[0].mxu0 %v3696_v43  ;;  %v3392_v35 = vld [vmem:[#allocation5 + $0x2a8] ss:$16 sps:$4 sm:$0xff]  }
  0x87   :  { %746 = vmatprep.subr.bf16.mxu1 %v3293_v37  ;;  %v3400_v37 = vld [vmem:[#allocation5 + $0x2ec] ss:$16 sps:$4 sm:$0xff]  }
  0x8a   :  { %747 = vmatpush1.bf16.msra.mxu1 %v3297_v39 }
  0x8b   :  { %748 = vmatprep.subr.bf16.mxu1 %v3299_v42 }
  0x8e   :  { %749 = vmatpush1.bf16.msra.mxu1 %v3303_v44 }
  0x8f   :  { %750 = vmatprep.subr.bf16.mxu1 %v3305_v45 }
  0x92   :  { %751 = vmatpush1.bf16.msra.mxu1 %v3309_v46 }
  0x93   :  { %752 = vmatprep.subr.bf16.mxu1 %v3311_v47 }
  0x96   :  { %753 = vmatpush1.bf16.msra.mxu1 %v3315_v48 }
  0x97   :  { %754 = vmatprep.subr.bf16.mxu1 %v3317_v49 }
  0x9a   :  { %755 = vmatpush1.bf16.msra.mxu1 %v3321_v50 }
  0x9b   :  { %756 = vmatprep.subr.bf16.mxu1 %v3323_v51 }
  0x9e   :  { %757 = vmatpush1.bf16.msra.mxu1 %v3327_v52 }
  0x9f   :  { %808 = vmatprep.subr.bf16.mxu1 %v3331_v54 }
  0xa1   :  { %759 = vmatmul.mubr.bf16.vlgmr.msra.gmra.mrb[0].mxu1 %v3702_v55 }
  0xa2   :  { %809 = vmatpush1.bf16.msra.mxu1 %v3329_v56  ;;  %840 = vmatprep.mubr.bf16.mxu1 %v244_v34  ;;  %v3394_v34 = vld [vmem:[#allocation5 + $0x2ac] ss:$16 sps:$4 sm:$0xff]  }
  0xa3   :  { %810 = vmatprep.subr.bf16.mxu1 %v3334_v57 }
  0xa6   :  { %811 = vmatpush1.bf16.msra.mxu1 %v3332_v58 }
  0xa7   :  { %812 = vmatprep.subr.bf16.mxu1 %v3337_v59 }
  0xaa   :  { %813 = vmatpush1.bf16.msra.mxu1 %v3335_v60 }
  0xab   :  { %814 = vmatprep.subr.bf16.mxu1 %v3340_v61 }
  0xae   :  { %815 = vmatpush1.bf16.msra.mxu1 %v3338_v62 }
  0xaf   :  { %816 = vmatprep.subr.bf16.mxu1 %v3343_v63 }
  0xb2   :  { %817 = vmatpush1.bf16.msra.mxu1 %v3341_v1 }
  0xb3   :  { %818 = vmatprep.subr.bf16.mxu1 %v3346_v2 }
  0xb6   :  { %819 = vmatpush1.bf16.msra.mxu1 %v3344_v3 }
  0xb7   :  { %820 = vmatprep.subr.bf16.mxu1 %v3349_v4 }
  0xba   :  { %821 = vmatpush1.bf16.msra.mxu1 %v3347_v5 }
  0xbb   :  { %822 = vmatprep.subr.bf16.mxu1 %v3352_v6 }
  0xbe   :  { %823 = vmatpush1.bf16.msra.mxu1 %v3350_v7 }
  0xbf   :  { %824 = vmatprep.subr.bf16.mxu1 %v3355_v8 }
  0xc2   :  { %825 = vmatpush1.bf16.msra.mxu1 %v3353_v9 }
  0xc3   :  { %826 = vmatprep.subr.bf16.mxu1 %v3358_v10 }
  0xc6   :  { %827 = vmatpush1.bf16.msra.mxu1 %v3356_v11 }
  0xc7   :  { %828 = vmatprep.subr.bf16.mxu1 %v3361_v12 }
  0xca   :  { %829 = vmatpush1.bf16.msra.mxu1 %v3359_v13 }
  0xcb   :  { %830 = vmatprep.subr.bf16.mxu1 %v3364_v14 }
  0xce   :  { %831 = vmatpush1.bf16.msra.mxu1 %v3362_v15 }
  0xcf   :  { %832 = vmatprep.subr.bf16.mxu1 %v3367_v16 }
  0xd2   :  { %833 = vmatpush1.bf16.msra.mxu1 %v3365_v17 }
  0xd3   :  { %834 = vmatprep.subr.bf16.mxu1 %v3370_v18 }
  0xd6   :  { %835 = vmatpush1.bf16.msra.mxu1 %v3368_v19 }
  0xd7   :  { %836 = vmatprep.subr.bf16.mxu1 %v3373_v20 }
  0xda   :  { %837 = vmatpush1.bf16.msra.mxu1 %v3371_v21 }
  0xdb   :  { %838 = vmatprep.subr.bf16.mxu1 %v3376_v22 }
  0xde   :  { %839 = vmatpush1.bf16.msra.mxu1 %v3374_v23 }
  0xdf   :  { %849 = vmatprep.subr.bf16.mxu1 %v3379_v24 }
  0xe1   :  { %841 = vmatmul.mubr.bf16.vlgmr.msra.gmra.mrb[4].mxu1 %v3702_v55 }
  0xe2   :  { %850 = vmatpush1.bf16.msra.mxu1 %v3377_v25  ;;  %881 = vmatprep.mubr.bf16.mxu1 %v3566_v0  ;;  %v3395_v0 = vld [vmem:[#allocation5 + $0x2c8] ss:$16 sps:$4 sm:$0xff]  }
  0xe3   :  { %851 = vmatprep.subr.bf16.mxu1 %v3382_v26 }
  0xe6   :  { %852 = vmatpush1.bf16.msra.mxu1 %v3380_v27 }
  0xe7   :  { %853 = vmatprep.subr.bf16.mxu1 %v3385_v28 }
  0xea   :  { %854 = vmatpush1.bf16.msra.mxu1 %v3383_v29 }
  0xeb   :  { %855 = vmatprep.subr.bf16.mxu1 %v3388_v30 }
  0xee   :  { %856 = vmatpush1.bf16.msra.mxu1 %v3386_v31 }
  0xef   :  { %857 = vmatprep.subr.bf16.mxu1 %v3391_v32 }
  0xf2   :  { %858 = vmatpush1.bf16.msra.mxu1 %v3389_v33 }
  0xf3   :  { %859 = vmatprep.subr.bf16.mxu1 %v3394_v34 }
  0xf6   :  { %860 = vmatpush1.bf16.msra.mxu1 %v3392_v35 }
  0xf7   :  { %861 = vmatprep.subr.bf16.mxu1 %v3397_v36 }
  0xfa   :  { %862 = vmatpush1.bf16.msra.mxu1 %v3395_v0 }
  0xfb   :  { %863 = vmatprep.subr.bf16.mxu1 %v3400_v37 }
  0xfe   :  { %864 = vmatpush1.bf16.msra.mxu1 %v3398_v38 }
 0x101   :  { %882 = vmatmul.mubr.bf16.vlgmr.msra.gmra.mrb[4].mxu1 %v3696_v43 }
 0x159   :  { %v801_v39 = vpop.f32.mrb[0].mxu0 }
 0x15a   :  { %v803_v40 = vpop.f32.mrb[1].mxu0 }
 0x15b   :  { %v805_v41 = vpop.f32.mrb[2].mxu0 }
 0x15c   :  { %v806_v42 = vpop.f32.mrb[3].mxu0 }
 0x174   :  { %v760_v44 = vpop.f32.mrb[0].mxu1 }
 0x175   :  { %v802_v45 = vadd.f32 %v801_v39, %v760_v44  ;;  %v762_v46 = vpop.f32.mrb[1].mxu1 }
 0x176   :  { %v804_v47 = vadd.f32 %v803_v40, %v762_v46  ;;  %v764_v48 = vpop.f32.mrb[2].mxu1 }
 0x177   :  { %v890_v49 = vrot.slane %v802_v45, 4  ;;  %v765_v50 = vpop.f32.mrb[3].mxu1 }
 0x178   :  { %v896_v51 = vrot.slane %v804_v47, 4 }
 0x179   :  { %v891_v52 = vadd.f32 %v890_v49, %v802_v45 }
 0x17a   :  { %v897_v53 = vadd.f32 %v896_v51, %v804_v47 }
 0x17b   :  { %v892_v54 = vrot.slane %v891_v52, 2 }
 0x17c   :  { %v898_v55 = vrot.slane %v897_v53, 2 }
 0x17d   :  { %v893_v56 = vadd.f32 %v892_v54, %v891_v52 }
 0x17e   :  { %v899_v57 = vadd.f32 %v898_v55, %v897_v53 }
 0x17f   :  { %v894_v58 = vrot.slane %v893_v56, 1 }
 0x180   :  { %v900_v43 = vrot.slane %v899_v57, 1 }
 0x181   :  { %v895_v59 = vadd.f32 %v894_v58, %v893_v56 }
 0x182   :  { %v901_v60 = vadd.f32 %v900_v43, %v899_v57 }
 0x183   :  { %v914_v61 = vmul.f32 0.125, %v895_v59 }
 0x184   :  { %v915_v62 = vmul.f32 0.125, %v901_v60  ;;  %v3582_v60 = vmov 1983009808  }
 0x185   :  { %v3708_v63 = vsub.f32 %v802_v45, %v914_v61  ;;  %v969_v61 = vunpack.c.l.s4 %v3582_v60 }
 0x186   :  { %v3710_v1 = vsub.f32 %v804_v47, %v915_v62  ;;  %v971_v62 = vlaneseq }
 0x187   :  { %v922_v2 = vmul.f32 %v3708_v63, %v3708_v63 }
 0x188   :  { %v923_v3 = vmul.f32 %v3710_v1, %v3710_v1 }
 0x189   :  { %v926_v4 = vrot.slane %v922_v2, 4 }
 0x18a   :  { %v932_v5 = vrot.slane %v923_v3, 4 }
 0x18b   :  { %v927_v6 = vadd.f32 %v926_v4, %v922_v2  ;;  %v970_v2 = vunpack.c.0.s8 %v969_v61 }
 0x18c   :  { %v933_v7 = vadd.f32 %v932_v5, %v923_v3  ;;  %v972_v3 = vshrl.u32 %v971_v62, 7 }
 0x18d   :  { %v928_v8 = vrot.slane %v927_v6, 2 }
 0x18e   :  { %v934_v9 = vrot.slane %v933_v7, 2  ;;  %v3716_v5 = vsub.s32 %v970_v2, %v972_v3 }
 0x18f   :  { %v929_v10 = vadd.f32 %v928_v8, %v927_v6  ;;  %v3718_v8 = vsub.s32 1, %v972_v3 }
 0x190   :  { %v935_v11 = vadd.f32 %v934_v9, %v933_v7  ;;  %v3720_v9 = vsub.s32 3, %v972_v3 }
 0x191   :  { %v930_v12 = vrot.slane %v929_v10, 1 }
 0x192   :  { %v936_v13 = vrot.slane %v935_v11, 1 }
 0x193   :  { %v931_v14 = vadd.f32 %v930_v12, %v929_v10  ;;  %v3722_v10 = vsub.s32 5, %v972_v3 }
 0x194   :  { %v937_v15 = vadd.f32 %v936_v13, %v935_v11  ;;  %v3724_v11 = vsub.s32 7, %v972_v3 }
 0x195   :  { %v950_v16 = vmul.f32 0.125, %v931_v14  ;;  %v242_v14 = vld [vmem:[#allocation8] sm:$0xff] }
 0x196   :  { %v951_v17 = vmul.f32 0.125, %v937_v15  ;;  %v3728_v15 = vsub.s32 0, %v972_v3 }
 0x197   :  { %v954_v18 = vadd.f32 1e-05, %v950_v16 }
 0x198   :  { %v955_v19 = vadd.f32 1e-05, %v951_v17  ;;  %v3730_v17 = vsub.s32 2, %v972_v3 }
 0x199   :  { %3401 = vrsqrt.f32 %v954_v18  ;;  %v3732_v18 = vsub.s32 4, %v972_v3 }
 0x19a   :  { %3403 = vrsqrt.f32 %v955_v19  ;;  %v3734_v19 = vsub.s32 6, %v972_v3 }
 0x1a3   :  { %v3402_v20 = vpop.eup %3401 }
 0x1a4   :  { %v3404_v21 = vpop.eup %3403 }
 0x1a5   :  { %v966_v22 = vcombine.low %v3402_v20, %v3404_v21  ;;  %v1030_v20 = vrot.slane %v242_v14, %v3718_v8  ;;  %v1034_v21 = vrot.slane %v242_v14, %v3720_v9 }
 0x1a7   :  { %v974_v12 = vrot.slane %v966_v22, %v3716_v5  ;;  %v1042_v22 = vrot.slane %v242_v14, %v3724_v11 }
 0x1d4   :  { %v883_v23 = vpop.f32.mrb[4].mxu1 }
 0x1d5   :  { %v902_v24 = vrot.slane %v883_v23, 4  ;;  %v885_v25 = vpop.f32.mrb[5].mxu1 }
 0x1d6   :  { %v908_v26 = vrot.slane %v885_v25, 4  ;;  %v887_v27 = vpop.f32.mrb[6].mxu1 }
 0x1d7   :  { %v903_v28 = vadd.f32 %v902_v24, %v883_v23  ;;  %v888_v29 = vpop.f32.mrb[7].mxu1 }
 0x1d8   :  { %v909_v30 = vadd.f32 %v908_v26, %v885_v25  ;;  %v1050_v29 = vrot.slane %v1030_v20, %v3718_v8 }
 0x1d9   :  { %v904_v31 = vrot.slane %v903_v28, 2 }
 0x1da   :  { %v910_v32 = vrot.slane %v909_v30, 2 }
 0x1db   :  { %v905_v33 = vadd.f32 %v904_v31, %v903_v28 }
 0x1dc   :  { %v911_v34 = vadd.f32 %v910_v32, %v909_v30  ;;  %v1054_v30 = vrot.slane %v1034_v21, %v3718_v8  ;;  %v1062_v32 = vrot.slane %v1042_v22, %v3718_v8 }
 0x1dd   :  { %v906_v35 = vrot.slane %v905_v33, 1 }
 0x1de   :  { %v912_v36 = vrot.slane %v911_v34, 1 }
 0x1df   :  { %v907_v0 = vadd.f32 %v906_v35, %v905_v33 }
 0x1e0   :  { %v913_v37 = vadd.f32 %v912_v36, %v911_v34 }
 0x1e1   :  { %v916_v38 = vmul.f32 0.125, %v907_v0 }
 0x1e2   :  { %v917_v39 = vmul.f32 0.125, %v913_v37 }
 0x1e3   :  { %v920_v40 = vsub.f32 %v883_v23, %v916_v38  ;;  %v1038_v23 = vrot.slane %v242_v14, %v3722_v10 }
 0x1e4   :  { %v921_v41 = vsub.f32 %v885_v25, %v917_v39 }
 0x1e5   :  { %v924_v42 = vmul.f32 %v920_v40, %v920_v40  ;;  %v1058_v31 = vrot.slane %v1038_v23, %v3718_v8 }
 0x1e6   :  { %v925_v44 = vmul.f32 %v921_v41, %v921_v41 }
 0x1e7   :  { %v938_v45 = vrot.slane %v924_v42, 4 }
 0x1e8   :  { %v944_v46 = vrot.slane %v925_v44, 4 }
 0x1e9   :  { %v939_v47 = vadd.f32 %v938_v45, %v924_v42 }
 0x1ea   :  { %v945_v48 = vadd.f32 %v944_v46, %v925_v44 }
 0x1eb   :  { %v940_v49 = vrot.slane %v939_v47, 2 }
 0x1ec   :  { %v946_v50 = vrot.slane %v945_v48, 2 }
 0x1ed   :  { %v941_v51 = vadd.f32 %v940_v49, %v939_v47 }
 0x1ee   :  { %v947_v52 = vadd.f32 %v946_v50, %v945_v48 }
 0x1ef   :  { %v942_v53 = vrot.slane %v941_v51, 1 }
 0x1f0   :  { %v948_v54 = vrot.slane %v947_v52, 1 }
 0x1f1   :  { %v943_v55 = vadd.f32 %v942_v53, %v941_v51 }
 0x1f2   :  { %v949_v56 = vadd.f32 %v948_v54, %v947_v52 }
 0x1f3   :  { %v952_v57 = vmul.f32 0.125, %v943_v55 }
 0x1f4   :  { %v953_v58 = vmul.f32 0.125, %v949_v56 }
 0x1f5   :  { %v956_v43 = vadd.f32 1e-05, %v952_v57 }
 0x1f6   :  { %v957_v59 = vadd.f32 1e-05, %v953_v58 }
 0x1f7   :  { %3405 = vrsqrt.f32 %v956_v43 }
 0x1f8   :  { %3407 = vrsqrt.f32 %v957_v59 }
 0x201   :  { %v3406_v4 = vpop.eup %3405 }
 0x202   :  { %v3408_v6 = vpop.eup %3407 }
 0x203   :  { %v967_v7 = vcombine.low %v3406_v4, %v3408_v6 }
 0x205   :  { %v981_v13 = vrot.slane %v967_v7, %v3716_v5 }
 0x207   :  { %v982_v16 = vcombine.low %v974_v12, %v981_v13 }
 0x209   :  { %v984_v24 = vmul.f32 %v982_v16, %v242_v14 }
 0x20b   :  { %v989_v25 = vrot.slane %v984_v24, %v3728_v15  ;;  %v993_v26 = vrot.slane %v984_v24, %v3730_v17  ;;  %v997_v27 = vrot.slane %v984_v24, %v3732_v18  ;;  %v1001_v28 = vrot.slane %v984_v24, %v3734_v19 }
 0x20d   :  { %v1009_v33 = vrot.slane %v989_v25, %v3728_v15  ;;  %v1013_v34 = vrot.slane %v993_v26, %v3728_v15  ;;  %v1017_v35 = vrot.slane %v997_v27, %v3728_v15  ;;  %v1021_v36 = vrot.slane %v1001_v28, %v3728_v15 }
 0x20f   :  { %v1022_v0 = vmul.f32 %v1009_v33, %v3708_v63  ;;  %v1023_v37 = vmul.f32 %v1013_v34, %v3710_v1  ;;  %v1024_v38 = vmul.f32 %v1017_v35, %v920_v40  ;;  %v1025_v39 = vmul.f32 %v1021_v36, %v921_v41 }
 0x211   :  { %v3754_v42 = vadd.f32 %v1050_v29, %v1022_v0  ;;  %v1064_v44 = vadd.f32 %v1054_v30, %v1023_v37  ;;  %v3756_v45 = vadd.f32 %v1058_v31, %v1024_v38  ;;  %v3758_v46 = vadd.f32 %v1062_v32, %v1025_v39 }
 0x213   :  { %v1067_v47 = vmax.f32 %v3754_v42, 0.0  ;;  %v1068_v48 = vmax.f32 %v1064_v44, 0.0  ;;  %v1069_v49 = vmax.f32 %v3756_v45, 0.0  ;;  %v1070_v50 = vmax.f32 %v3758_v46, 0.0 }
 0x214   :  { %3553 = dma.done.wait [#allocation4], 24576 }
 0x215   :  { %3554 = vsyncadd [#allocation4], 4294942720  ;;  %v3763_v63 = vpack.c.bf16 %v1068_v48, %v1068_v48  ;;  %v1076_v1 = vld [vmem:[#allocation2 + $0x8] sm:$0xff]  ;;  %v1078_v40 = vld [vmem:[#allocation2 + $0x18] sm:$0xff] }
 0x216   :  { %v1075_v41 = vld [vmem:[#allocation2] sm:$0xff]  ;;  %1273 = vmatprep.subr.bf16.mxu0 %v1076_v1  ;;  %1355 = vmatprep.subr.bf16.mxu1 %v1078_v40  ;;  %v1077_v51 = vld [vmem:[#allocation2 + $0x10] sm:$0xff]  ;;  %v1082_v52 = vld [vmem:[#allocation2 + $0x38] sm:$0xff] }
 0x217   :  { %1305 = vmatprep.mubr.bf16.mxu0 %v3763_v63  ;;  %1387 = vmatprep.mubr.bf16.mxu1 %v3763_v63  ;;  %v1084_v53 = vld [vmem:[#allocation2 + $0x48] sm:$0xff]  ;;  %v1081_v54 = vld [vmem:[#allocation2 + $0x30] sm:$0xff]  ;;  %v1083_v55 = vld [vmem:[#allocation2 + $0x40] sm:$0xff] }
 0x218   :  { %1274 = vmatpush1.bf16.msra.mxu0 %v1075_v41  ;;  %1356 = vmatpush1.bf16.msra.mxu1 %v1077_v51  ;;  %v1088_v56 = vld [vmem:[#allocation2 + $0x68] sm:$0xff]  ;;  %v1090_v57 = vld [vmem:[#allocation2 + $0x78] sm:$0xff]  ;;  %v1087_v58 = vld [vmem:[#allocation2 + $0x60] sm:$0xff] }
 0x219   :  { %1275 = vmatprep.subr.bf16.mxu0 %v1082_v52  ;;  %1357 = vmatprep.subr.bf16.mxu1 %v1084_v53  ;;  %v1089_v43 = vld [vmem:[#allocation2 + $0x70] sm:$0xff]  ;;  %v1094_v59 = vld [vmem:[#allocation2 + $0x98] sm:$0xff]  ;;  %v1096_v60 = vld [vmem:[#allocation2 + $0xa8] sm:$0xff] }
 0x21a   :  { %v1093_v61 = vld [vmem:[#allocation2 + $0x90] sm:$0xff]  ;;  %v1095_v62 = vld [vmem:[#allocation2 + $0xa0] sm:$0xff]  ;;  %v1100_v2 = vld [vmem:[#allocation2 + $0xc8] sm:$0xff] }
 0x21b   :  { %v1102_v3 = vld [vmem:[#allocation2 + $0xd8] sm:$0xff]  ;;  %v1099_v4 = vld [vmem:[#allocation2 + $0xc0] sm:$0xff]  ;;  %v1101_v6 = vld [vmem:[#allocation2 + $0xd0] sm:$0xff] }
 0x21c   :  { %1276 = vmatpush1.bf16.msra.mxu0 %v1081_v54  ;;  %1358 = vmatpush1.bf16.msra.mxu1 %v1083_v55  ;;  %v1106_v7 = vld [vmem:[#allocation2 + $0xf8] sm:$0xff]  ;;  %v1108_v12 = vld [vmem:[#allocation2 + $0x108] sm:$0xff]  ;;  %v1105_v13 = vld [vmem:[#allocation2 + $0xf0] sm:$0xff] }
 0x21d   :  { %1277 = vmatprep.subr.bf16.mxu0 %v1088_v56  ;;  %1359 = vmatprep.subr.bf16.mxu1 %v1090_v57  ;;  %v1107_v14 = vld [vmem:[#allocation2 + $0x100] sm:$0xff]  ;;  %v1112_v16 = vld [vmem:[#allocation2 + $0x128] sm:$0xff]  ;;  %v1114_v20 = vld [vmem:[#allocation2 + $0x138] sm:$0xff] }
 0x21e   :  { %v1111_v21 = vld [vmem:[#allocation2 + $0x120] sm:$0xff]  ;;  %v1113_v23 = vld [vmem:[#allocation2 + $0x130] sm:$0xff]  ;;  %v1118_v22 = vld [vmem:[#allocation2 + $0x158] sm:$0xff] }
 0x21f   :  { %v1120_v24 = vld [vmem:[#allocation2 + $0x168] sm:$0xff]  ;;  %v1117_v25 = vld [vmem:[#allocation2 + $0x150] sm:$0xff]  ;;  %v1119_v26 = vld [vmem:[#allocation2 + $0x160] sm:$0xff] }
 0x220   :  { %1278 = vmatpush1.bf16.msra.mxu0 %v1087_v58  ;;  %1360 = vmatpush1.bf16.msra.mxu1 %v1089_v43  ;;  %v1124_v27 = vld [vmem:[#allocation2 + $0x188] sm:$0xff]  ;;  %v1126_v28 = vld [vmem:[#allocation2 + $0x198] sm:$0xff]  ;;  %v1123_v29 = vld [vmem:[#allocation2 + $0x180] sm:$0xff] }
 0x221   :  { %1279 = vmatprep.subr.bf16.mxu0 %v1094_v59  ;;  %1361 = vmatprep.subr.bf16.mxu1 %v1096_v60  ;;  %v1125_v30 = vld [vmem:[#allocation2 + $0x190] sm:$0xff]  ;;  %v1130_v31 = vld [vmem:[#allocation2 + $0x1b8] sm:$0xff]  ;;  %v1132_v32 = vld [vmem:[#allocation2 + $0x1c8] sm:$0xff] }
 0x222   :  { %v1129_v33 = vld [vmem:[#allocation2 + $0x1b0] sm:$0xff]  ;;  %v1131_v34 = vld [vmem:[#allocation2 + $0x1c0] sm:$0xff]  ;;  %v1136_v35 = vld [vmem:[#allocation2 + $0x1e8] sm:$0xff] }
 0x223   :  { %v1138_v36 = vld [vmem:[#allocation2 + $0x1f8] sm:$0xff]  ;;  %v1135_v0 = vld [vmem:[#allocation2 + $0x1e0] sm:$0xff]  ;;  %v1137_v37 = vld [vmem:[#allocation2 + $0x1f0] sm:$0xff] }
 0x224   :  { %1280 = vmatpush1.bf16.msra.mxu0 %v1093_v61  ;;  %1362 = vmatpush1.bf16.msra.mxu1 %v1095_v62  ;;  %v1142_v38 = vld [vmem:[#allocation2 + $0x218] sm:$0xff]  ;;  %v1144_v39 = vld [vmem:[#allocation2 + $0x228] sm:$0xff]  ;;  %v1141_v44 = vld [vmem:[#allocation2 + $0x210] sm:$0xff] }
 0x225   :  { %1281 = vmatprep.subr.bf16.mxu0 %v1100_v2  ;;  %1363 = vmatprep.subr.bf16.mxu1 %v1102_v3  ;;  %v1143_v48 = vld [vmem:[#allocation2 + $0x220] sm:$0xff]  ;;  %v1148_v1 = vld [vmem:[#allocation2 + $0x248] sm:$0xff]  ;;  %v1150_v40 = vld [vmem:[#allocation2 + $0x258] sm:$0xff] }
 0x226   :  { %v1147_v41 = vld [vmem:[#allocation2 + $0x240] sm:$0xff]  ;;  %v1149_v51 = vld [vmem:[#allocation2 + $0x250] sm:$0xff]  ;;  %v1154_v52 = vld [vmem:[#allocation2 + $0x278] sm:$0xff] }
 0x227   :  { %v1156_v53 = vld [vmem:[#allocation2 + $0x288] sm:$0xff]  ;;  %v1153_v54 = vld [vmem:[#allocation2 + $0x270] sm:$0xff]  ;;  %v1155_v55 = vld [vmem:[#allocation2 + $0x280] sm:$0xff] }
 0x228   :  { %1282 = vmatpush1.bf16.msra.mxu0 %v1099_v4  ;;  %1364 = vmatpush1.bf16.msra.mxu1 %v1101_v6  ;;  %v1160_v56 = vld [vmem:[#allocation2 + $0x2a8] sm:$0xff]  ;;  %v1162_v57 = vld [vmem:[#allocation2 + $0x2b8] sm:$0xff]  ;;  %v1159_v58 = vld [vmem:[#allocation2 + $0x2a0] sm:$0xff]  ;;  %v3770_v4 = vpack.c.bf16 %v1067_v47, %v1067_v47 }
 0x229   :  { %1283 = vmatprep.subr.bf16.mxu0 %v1106_v7  ;;  %1365 = vmatprep.subr.bf16.mxu1 %v1108_v12  ;;  %v1161_v43 = vld [vmem:[#allocation2 + $0x2b0] sm:$0xff]  ;;  %v1166_v59 = vld [vmem:[#allocation2 + $0x2d8] sm:$0xff]  ;;  %v1168_v60 = vld [vmem:[#allocation2 + $0x2e8] sm:$0xff] }
 0x22a   :  { %v1165_v61 = vld [vmem:[#allocation2 + $0x2d0] sm:$0xff]  ;;  %v1167_v62 = vld [vmem:[#allocation2 + $0x2e0] sm:$0xff]  ;;  %v1172_v2 = vld [vmem:[#allocation2 + $0x308] sm:$0xff] }
 0x22b   :  { %v1174_v3 = vld [vmem:[#allocation2 + $0x318] sm:$0xff]  ;;  %v1171_v6 = vld [vmem:[#allocation2 + $0x300] sm:$0xff]  ;;  %v1173_v7 = vld [vmem:[#allocation2 + $0x310] sm:$0xff] }
 0x22c   :  { %1284 = vmatpush1.bf16.msra.mxu0 %v1105_v13  ;;  %1366 = vmatpush1.bf16.msra.mxu1 %v1107_v14  ;;  %v1178_v12 = vld [vmem:[#allocation2 + $0x338] sm:$0xff]  ;;  %v1180_v13 = vld [vmem:[#allocation2 + $0x348] sm:$0xff]  ;;  %v3775_v14 = vpack.c.bf16 %v1070_v50, %v1070_v50  ;;  %v1177_v42 = vld [vmem:[#allocation2 + $0x330] sm:$0xff] }
 0x22d   :  { %1285 = vmatprep.subr.bf16.mxu0 %v1112_v16  ;;  %1367 = vmatprep.subr.bf16.mxu1 %v1114_v20  ;;  %v1179_v47 = vld [vmem:[#allocation2 + $0x340] sm:$0xff]  ;;  %v1184_v16 = vld [vmem:[#allocation2 + $0x368] sm:$0xff]  ;;  %v1186_v20 = vld [vmem:[#allocation2 + $0x378] sm:$0xff] }
 0x22e   :  { %v1183_v46 = vld [vmem:[#allocation2 + $0x360] sm:$0xff]  ;;  %v1185_v50 = vld [vmem:[#allocation2 + $0x370] sm:$0xff] }
 0x22f   :  { %v1091_v45 = vld [vmem:[#allocation2 + $0x80] sm:$0xff] }
 0x230   :  { %1286 = vmatpush1.bf16.msra.mxu0 %v1111_v21  ;;  %1368 = vmatpush1.bf16.msra.mxu1 %v1113_v23  ;;  %v1190_v21 = vld [vmem:[#allocation2 + $0x398] sm:$0xff]  ;;  %v1192_v23 = vld [vmem:[#allocation2 + $0x3a8] sm:$0xff] }
 0x231   :  { %1287 = vmatprep.subr.bf16.mxu0 %v1118_v22  ;;  %1369 = vmatprep.subr.bf16.mxu1 %v1120_v24  ;;  %v1189_v22 = vld [vmem:[#allocation2 + $0x390] sm:$0xff]  ;;  %v1191_v24 = vld [vmem:[#allocation2 + $0x3a0] sm:$0xff] }
 0x234   :  { %1288 = vmatpush1.bf16.msra.mxu0 %v1117_v25  ;;  %1370 = vmatpush1.bf16.msra.mxu1 %v1119_v26  ;;  %v1196_v25 = vld [vmem:[#allocation2 + $0x3c8] sm:$0xff]  ;;  %v1198_v26 = vld [vmem:[#allocation2 + $0x3d8] sm:$0xff] }
 0x235   :  { %1289 = vmatprep.subr.bf16.mxu0 %v1124_v27  ;;  %1371 = vmatprep.subr.bf16.mxu1 %v1126_v28  ;;  %v1195_v27 = vld [vmem:[#allocation2 + $0x3c0] sm:$0xff]  ;;  %v1197_v28 = vld [vmem:[#allocation2 + $0x3d0] sm:$0xff] }
 0x238   :  { %1290 = vmatpush1.bf16.msra.mxu0 %v1123_v29  ;;  %1372 = vmatpush1.bf16.msra.mxu1 %v1125_v30  ;;  %v1202_v29 = vld [vmem:[#allocation2 + $0x3f8] sm:$0xff]  ;;  %v1204_v30 = vld [vmem:[#allocation2 + $0x408] sm:$0xff] }
 0x239   :  { %1291 = vmatprep.subr.bf16.mxu0 %v1130_v31  ;;  %1373 = vmatprep.subr.bf16.mxu1 %v1132_v32  ;;  %v1201_v31 = vld [vmem:[#allocation2 + $0x3f0] sm:$0xff]  ;;  %v1203_v32 = vld [vmem:[#allocation2 + $0x400] sm:$0xff] }
 0x23c   :  { %1292 = vmatpush1.bf16.msra.mxu0 %v1129_v33  ;;  %1374 = vmatpush1.bf16.msra.mxu1 %v1131_v34  ;;  %v1208_v33 = vld [vmem:[#allocation2 + $0x428] sm:$0xff]  ;;  %v1210_v34 = vld [vmem:[#allocation2 + $0x438] sm:$0xff] }
 0x23d   :  { %1293 = vmatprep.subr.bf16.mxu0 %v1136_v35  ;;  %1375 = vmatprep.subr.bf16.mxu1 %v1138_v36  ;;  %v1207_v35 = vld [vmem:[#allocation2 + $0x420] sm:$0xff]  ;;  %v1209_v36 = vld [vmem:[#allocation2 + $0x430] sm:$0xff] }
 0x240   :  { %1294 = vmatpush1.bf16.msra.mxu0 %v1135_v0  ;;  %1376 = vmatpush1.bf16.msra.mxu1 %v1137_v37  ;;  %v1214_v0 = vld [vmem:[#allocation2 + $0x458] sm:$0xff]  ;;  %v1216_v37 = vld [vmem:[#allocation2 + $0x468] sm:$0xff] }
 0x241   :  { %1295 = vmatprep.subr.bf16.mxu0 %v1142_v38  ;;  %1377 = vmatprep.subr.bf16.mxu1 %v1144_v39  ;;  %v1213_v38 = vld [vmem:[#allocation2 + $0x450] sm:$0xff]  ;;  %v1215_v39 = vld [vmem:[#allocation2 + $0x460] sm:$0xff] }
 0x244   :  { %1296 = vmatpush1.bf16.msra.mxu0 %v1141_v44  ;;  %1378 = vmatpush1.bf16.msra.mxu1 %v1143_v48  ;;  %v1220_v44 = vld [vmem:[#allocation2 + $0x488] sm:$0xff]  ;;  %v1222_v48 = vld [vmem:[#allocation2 + $0x498] sm:$0xff] }
 0x245   :  { %1297 = vmatprep.subr.bf16.mxu0 %v1148_v1  ;;  %1379 = vmatprep.subr.bf16.mxu1 %v1150_v40  ;;  %v1219_v1 = vld [vmem:[#allocation2 + $0x480] sm:$0xff]  ;;  %v1221_v40 = vld [vmem:[#allocation2 + $0x490] sm:$0xff] }
 0x248   :  { %1298 = vmatpush1.bf16.msra.mxu0 %v1147_v41  ;;  %1380 = vmatpush1.bf16.msra.mxu1 %v1149_v51  ;;  %v1226_v41 = vld [vmem:[#allocation2 + $0x4b8] sm:$0xff]  ;;  %v1228_v51 = vld [vmem:[#allocation2 + $0x4c8] sm:$0xff] }
 0x249   :  { %1299 = vmatprep.subr.bf16.mxu0 %v1154_v52  ;;  %1381 = vmatprep.subr.bf16.mxu1 %v1156_v53  ;;  %v1225_v52 = vld [vmem:[#allocation2 + $0x4b0] sm:$0xff]  ;;  %v1227_v53 = vld [vmem:[#allocation2 + $0x4c0] sm:$0xff] }
 0x24c   :  { %1300 = vmatpush1.bf16.msra.mxu0 %v1153_v54  ;;  %1382 = vmatpush1.bf16.msra.mxu1 %v1155_v55  ;;  %v1232_v54 = vld [vmem:[#allocation2 + $0x4e8] sm:$0xff]  ;;  %v1234_v55 = vld [vmem:[#allocation2 + $0x4f8] sm:$0xff] }
 0x24d   :  { %1301 = vmatprep.subr.bf16.mxu0 %v1160_v56  ;;  %1383 = vmatprep.subr.bf16.mxu1 %v1162_v57  ;;  %v1231_v56 = vld [vmem:[#allocation2 + $0x4e0] sm:$0xff]  ;;  %v1233_v57 = vld [vmem:[#allocation2 + $0x4f0] sm:$0xff] }
 0x250   :  { %1302 = vmatpush1.bf16.msra.mxu0 %v1159_v58  ;;  %1384 = vmatpush1.bf16.msra.mxu1 %v1161_v43  ;;  %v1238_v58 = vld [vmem:[#allocation2 + $0x518] sm:$0xff]  ;;  %v1240_v43 = vld [vmem:[#allocation2 + $0x528] sm:$0xff] }
 0x251   :  { %1303 = vmatprep.subr.bf16.mxu0 %v1166_v59  ;;  %1385 = vmatprep.subr.bf16.mxu1 %v1168_v60  ;;  %v1237_v59 = vld [vmem:[#allocation2 + $0x510] sm:$0xff]  ;;  %v1239_v60 = vld [vmem:[#allocation2 + $0x520] sm:$0xff] }
 0x254   :  { %1304 = vmatpush1.bf16.msra.mxu0 %v1165_v61  ;;  %1386 = vmatpush1.bf16.msra.mxu1 %v1167_v62  ;;  %v1244_v61 = vld [vmem:[#allocation2 + $0x548] sm:$0xff]  ;;  %v1246_v62 = vld [vmem:[#allocation2 + $0x558] sm:$0xff] }
 0x255   :  { %1314 = vmatprep.subr.bf16.mxu0 %v1172_v2  ;;  %1396 = vmatprep.subr.bf16.mxu1 %v1174_v3  ;;  %v1243_v2 = vld [vmem:[#allocation2 + $0x540] sm:$0xff]  ;;  %v1245_v3 = vld [vmem:[#allocation2 + $0x550] sm:$0xff] }
 0x257   :  { %1306 = vmatmul.mubr.bf16.vlgmr.msra.gmra.mrb[4].mxu0 %v3770_v4  ;;  %1388 = vmatmul.mubr.bf16.vlgmr.msra.gmra.mrb[8].mxu1 %v3770_v4 }
 0x258   :  { %1315 = vmatpush1.bf16.msra.mxu0 %v1171_v6  ;;  %1397 = vmatpush1.bf16.msra.mxu1 %v1173_v7  ;;  %v1250_v6 = vld [vmem:[#allocation2 + $0x578] sm:$0xff]  ;;  %v1252_v7 = vld [vmem:[#allocation2 + $0x588] sm:$0xff] }
 0x259   :  { %1316 = vmatprep.subr.bf16.mxu0 %v1178_v12  ;;  %1398 = vmatprep.subr.bf16.mxu1 %v1180_v13  ;;  %v1249_v12 = vld [vmem:[#allocation2 + $0x570] sm:$0xff]  ;;  %v1251_v13 = vld [vmem:[#allocation2 + $0x580] sm:$0xff] }
 0x25a   :  { %1346 = vmatprep.mubr.bf16.mxu0 %v3775_v14  ;;  %1428 = vmatprep.mubr.bf16.mxu1 %v3775_v14 }
 0x25c   :  { %1317 = vmatpush1.bf16.msra.mxu0 %v1177_v42  ;;  %1399 = vmatpush1.bf16.msra.mxu1 %v1179_v47  ;;  %v1256_v42 = vld [vmem:[#allocation2 + $0x5a8] sm:$0xff]  ;;  %v1258_v47 = vld [vmem:[#allocation2 + $0x5b8] sm:$0xff] }
 0x25d   :  { %1318 = vmatprep.subr.bf16.mxu0 %v1184_v16  ;;  %1400 = vmatprep.subr.bf16.mxu1 %v1186_v20  ;;  %v1255_v16 = vld [vmem:[#allocation2 + $0x5a0] sm:$0xff]  ;;  %v1257_v20 = vld [vmem:[#allocation2 + $0x5b0] sm:$0xff] }
 0x260   :  { %1319 = vmatpush1.bf16.msra.mxu0 %v1183_v46  ;;  %1401 = vmatpush1.bf16.msra.mxu1 %v1185_v50  ;;  %v1262_v46 = vld [vmem:[#allocation2 + $0x5d8] sm:$0xff]  ;;  %v1264_v50 = vld [vmem:[#allocation2 + $0x5e8] sm:$0xff] }
 0x261   :  { %1320 = vmatprep.subr.bf16.mxu0 %v1190_v21  ;;  %1402 = vmatprep.subr.bf16.mxu1 %v1192_v23  ;;  %v1261_v21 = vld [vmem:[#allocation2 + $0x5d0] sm:$0xff]  ;;  %v1263_v23 = vld [vmem:[#allocation2 + $0x5e0] sm:$0xff] }
 0x264   :  { %1321 = vmatpush1.bf16.msra.mxu0 %v1189_v22  ;;  %1403 = vmatpush1.bf16.msra.mxu1 %v1191_v24  ;;  %v1080_v22 = vld [vmem:[#allocation2 + $0x28] sm:$0xff]  ;;  %v3784_v24 = vpack.c.bf16 %v1069_v49, %v1069_v49  ;;  %v1098_v49 = vld [vmem:[#allocation2 + $0xb8] sm:$0xff] }
 0x265   :  { %1322 = vmatprep.subr.bf16.mxu0 %v1196_v25  ;;  %1404 = vmatprep.subr.bf16.mxu1 %v1198_v26  ;;  %v1079_v25 = vld [vmem:[#allocation2 + $0x20] sm:$0xff]  ;;  %v1086_v26 = vld [vmem:[#allocation2 + $0x58] sm:$0xff] }
 0x268   :  { %1323 = vmatpush1.bf16.msra.mxu0 %v1195_v27  ;;  %1405 = vmatpush1.bf16.msra.mxu1 %v1197_v28  ;;  %v1085_v27 = vld [vmem:[#allocation2 + $0x50] sm:$0xff]  ;;  %v1092_v28 = vld [vmem:[#allocation2 + $0x88] sm:$0xff] }
 0x269   :  { %1324 = vmatprep.subr.bf16.mxu0 %v1202_v29  ;;  %1406 = vmatprep.subr.bf16.mxu1 %v1204_v30  ;;  %v1097_v29 = vld [vmem:[#allocation2 + $0xb0] sm:$0xff]  ;;  %v1104_v30 = vld [vmem:[#allocation2 + $0xe8] sm:$0xff] }
 0x26c   :  { %1325 = vmatpush1.bf16.msra.mxu0 %v1201_v31  ;;  %1407 = vmatpush1.bf16.msra.mxu1 %v1203_v32  ;;  %v1103_v31 = vld [vmem:[#allocation2 + $0xe0] sm:$0xff]  ;;  %v1110_v32 = vld [vmem:[#allocation2 + $0x118] sm:$0xff] }
 0x26d   :  { %1326 = vmatprep.subr.bf16.mxu0 %v1208_v33  ;;  %1408 = vmatprep.subr.bf16.mxu1 %v1210_v34  ;;  %v1109_v33 = vld [vmem:[#allocation2 + $0x110] sm:$0xff]  ;;  %v1116_v34 = vld [vmem:[#allocation2 + $0x148] sm:$0xff] }
 0x270   :  { %1327 = vmatpush1.bf16.msra.mxu0 %v1207_v35  ;;  %1409 = vmatpush1.bf16.msra.mxu1 %v1209_v36  ;;  %v1122_v35 = vld [vmem:[#allocation2 + $0x178] sm:$0xff]  ;;  %v1121_v36 = vld [vmem:[#allocation2 + $0x170] sm:$0xff] }
 0x271   :  { %1328 = vmatprep.subr.bf16.mxu0 %v1214_v0  ;;  %1410 = vmatprep.subr.bf16.mxu1 %v1216_v37  ;;  %v1128_v0 = vld [vmem:[#allocation2 + $0x1a8] sm:$0xff]  ;;  %v1127_v37 = vld [vmem:[#allocation2 + $0x1a0] sm:$0xff] }
 0x274   :  { %1329 = vmatpush1.bf16.msra.mxu0 %v1213_v38  ;;  %1411 = vmatpush1.bf16.msra.mxu1 %v1215_v39  ;;  %v1134_v38 = vld [vmem:[#allocation2 + $0x1d8] sm:$0xff]  ;;  %v1133_v39 = vld [vmem:[#allocation2 + $0x1d0] sm:$0xff] }
 0x275   :  { %1330 = vmatprep.subr.bf16.mxu0 %v1220_v44  ;;  %1412 = vmatprep.subr.bf16.mxu1 %v1222_v48  ;;  %v1140_v44 = vld [vmem:[#allocation2 + $0x208] sm:$0xff]  ;;  %v1139_v48 = vld [vmem:[#allocation2 + $0x200] sm:$0xff] }
 0x278   :  { %1331 = vmatpush1.bf16.msra.mxu0 %v1219_v1  ;;  %1413 = vmatpush1.bf16.msra.mxu1 %v1221_v40  ;;  %v1146_v1 = vld [vmem:[#allocation2 + $0x238] sm:$0xff]  ;;  %v1145_v40 = vld [vmem:[#allocation2 + $0x230] sm:$0xff] }
 0x279   :  { %1332 = vmatprep.subr.bf16.mxu0 %v1226_v41  ;;  %1414 = vmatprep.subr.bf16.mxu1 %v1228_v51  ;;  %v1152_v41 = vld [vmem:[#allocation2 + $0x268] sm:$0xff]  ;;  %v1151_v51 = vld [vmem:[#allocation2 + $0x260] sm:$0xff] }
 0x27c   :  { %1333 = vmatpush1.bf16.msra.mxu0 %v1225_v52  ;;  %1415 = vmatpush1.bf16.msra.mxu1 %v1227_v53  ;;  %v1158_v52 = vld [vmem:[#allocation2 + $0x298] sm:$0xff]  ;;  %v1157_v53 = vld [vmem:[#allocation2 + $0x290] sm:$0xff] }
 0x27d   :  { %1334 = vmatprep.subr.bf16.mxu0 %v1232_v54  ;;  %1416 = vmatprep.subr.bf16.mxu1 %v1234_v55  ;;  %v1164_v54 = vld [vmem:[#allocation2 + $0x2c8] sm:$0xff]  ;;  %v1163_v55 = vld [vmem:[#allocation2 + $0x2c0] sm:$0xff] }
 0x280   :  { %1335 = vmatpush1.bf16.msra.mxu0 %v1231_v56  ;;  %1417 = vmatpush1.bf16.msra.mxu1 %v1233_v57  ;;  %v1170_v56 = vld [vmem:[#allocation2 + $0x2f8] sm:$0xff]  ;;  %v1169_v57 = vld [vmem:[#allocation2 + $0x2f0] sm:$0xff] }
 0x281   :  { %1336 = vmatprep.subr.bf16.mxu0 %v1238_v58  ;;  %1418 = vmatprep.subr.bf16.mxu1 %v1240_v43  ;;  %v1176_v58 = vld [vmem:[#allocation2 + $0x328] sm:$0xff]  ;;  %v1175_v43 = vld [vmem:[#allocation2 + $0x320] sm:$0xff] }
 0x284   :  { %1337 = vmatpush1.bf16.msra.mxu0 %v1237_v59  ;;  %1419 = vmatpush1.bf16.msra.mxu1 %v1239_v60  ;;  %v1182_v59 = vld [vmem:[#allocation2 + $0x358] sm:$0xff]  ;;  %v1181_v60 = vld [vmem:[#allocation2 + $0x350] sm:$0xff] }
 0x285   :  { %1338 = vmatprep.subr.bf16.mxu0 %v1244_v61  ;;  %1420 = vmatprep.subr.bf16.mxu1 %v1246_v62  ;;  %v1188_v61 = vld [vmem:[#allocation2 + $0x388] sm:$0xff]  ;;  %v1187_v62 = vld [vmem:[#allocation2 + $0x380] sm:$0xff] }
 0x288   :  { %1339 = vmatpush1.bf16.msra.mxu0 %v1243_v2  ;;  %1421 = vmatpush1.bf16.msra.mxu1 %v1245_v3  ;;  %v1194_v2 = vld [vmem:[#allocation2 + $0x3b8] sm:$0xff]  ;;  %v1193_v3 = vld [vmem:[#allocation2 + $0x3b0] sm:$0xff] }
 0x289   :  { %1340 = vmatprep.subr.bf16.mxu0 %v1250_v6  ;;  %1422 = vmatprep.subr.bf16.mxu1 %v1252_v7  ;;  %v1200_v6 = vld [vmem:[#allocation2 + $0x3e8] sm:$0xff]  ;;  %v1199_v7 = vld [vmem:[#allocation2 + $0x3e0] sm:$0xff] }
 0x28c   :  { %1341 = vmatpush1.bf16.msra.mxu0 %v1249_v12  ;;  %1423 = vmatpush1.bf16.msra.mxu1 %v1251_v13  ;;  %v1206_v12 = vld [vmem:[#allocation2 + $0x418] sm:$0xff]  ;;  %v1212_v13 = vld [vmem:[#allocation2 + $0x448] sm:$0xff] }
 0x28d   :  { %1342 = vmatprep.subr.bf16.mxu0 %v1256_v42  ;;  %1424 = vmatprep.subr.bf16.mxu1 %v1258_v47  ;;  %v1218_v42 = vld [vmem:[#allocation2 + $0x478] sm:$0xff]  ;;  %v1217_v47 = vld [vmem:[#allocation2 + $0x470] sm:$0xff] }
 0x290   :  { %1343 = vmatpush1.bf16.msra.mxu0 %v1255_v16  ;;  %1425 = vmatpush1.bf16.msra.mxu1 %v1257_v20  ;;  %v1224_v16 = vld [vmem:[#allocation2 + $0x4a8] sm:$0xff]  ;;  %v1223_v20 = vld [vmem:[#allocation2 + $0x4a0] sm:$0xff] }
 0x291   :  { %1344 = vmatprep.subr.bf16.mxu0 %v1262_v46  ;;  %1426 = vmatprep.subr.bf16.mxu1 %v1264_v50  ;;  %v1230_v46 = vld [vmem:[#allocation2 + $0x4d8] sm:$0xff]  ;;  %v1229_v50 = vld [vmem:[#allocation2 + $0x4d0] sm:$0xff] }
 0x294   :  { %1345 = vmatpush1.bf16.msra.mxu0 %v1261_v21  ;;  %1427 = vmatpush1.bf16.msra.mxu1 %v1263_v23  ;;  %v1236_v21 = vld [vmem:[#allocation2 + $0x508] sm:$0xff]  ;;  %v1235_v23 = vld [vmem:[#allocation2 + $0x500] sm:$0xff] }
 0x295   :  { %1437 = vmatprep.subr.bf16.mxu0 %v1080_v22  ;;  %v1242_v22 = vld [vmem:[#allocation2 + $0x538] sm:$0xff] }
 0x297   :  { %1347 = vmatmul.mubr.bf16.vlgmr.msra.gmra.mrb[4].mxu0 %v3784_v24  ;;  %1429 = vmatmul.mubr.bf16.vlgmr.msra.gmra.mrb[8].mxu1 %v3784_v24 }
 0x298   :  { %1438 = vmatpush1.bf16.msra.mxu0 %v1079_v25  ;;  %1469 = vmatprep.mubr.bf16.mxu0 %v3763_v63  ;;  %v1115_v63 = vld [vmem:[#allocation2 + $0x140] sm:$0xff]  ;;  %v1241_v25 = vld [vmem:[#allocation2 + $0x530] sm:$0xff] }
 0x299   :  { %1439 = vmatprep.subr.bf16.mxu0 %v1086_v26  ;;  %v1248_v26 = vld [vmem:[#allocation2 + $0x568] sm:$0xff] }
 0x29c   :  { %1440 = vmatpush1.bf16.msra.mxu0 %v1085_v27  ;;  %v1247_v27 = vld [vmem:[#allocation2 + $0x560] sm:$0xff] }
 0x29d   :  { %1441 = vmatprep.subr.bf16.mxu0 %v1092_v28  ;;  %v1254_v28 = vld [vmem:[#allocation2 + $0x598] sm:$0xff] }
 0x2a0   :  { %1442 = vmatpush1.bf16.msra.mxu0 %v1091_v45  ;;  %v1253_v45 = vld [vmem:[#allocation2 + $0x590] sm:$0xff] }
 0x2a1   :  { %1443 = vmatprep.subr.bf16.mxu0 %v1098_v49  ;;  %v1260_v49 = vld [vmem:[#allocation2 + $0x5c8] sm:$0xff] }
 0x2a4   :  { %1444 = vmatpush1.bf16.msra.mxu0 %v1097_v29  ;;  %v1259_v29 = vld [vmem:[#allocation2 + $0x5c0] sm:$0xff] }
 0x2a5   :  { %1445 = vmatprep.subr.bf16.mxu0 %v1104_v30  ;;  %v1266_v30 = vld [vmem:[#allocation2 + $0x5f8] sm:$0xff] }
 0x2a8   :  { %1446 = vmatpush1.bf16.msra.mxu0 %v1103_v31  ;;  %v1265_v31 = vld [vmem:[#allocation2 + $0x5f0] sm:$0xff] }
 0x2a9   :  { %1447 = vmatprep.subr.bf16.mxu0 %v1110_v32 }
 0x2ac   :  { %1448 = vmatpush1.bf16.msra.mxu0 %v1109_v33 }
 0x2ad   :  { %1449 = vmatprep.subr.bf16.mxu0 %v1116_v34 }
 0x2b0   :  { %1450 = vmatpush1.bf16.msra.mxu0 %v1115_v63 }
 0x2b1   :  { %1451 = vmatprep.subr.bf16.mxu0 %v1122_v35 }
 0x2b4   :  { %1452 = vmatpush1.bf16.msra.mxu0 %v1121_v36 }
 0x2b5   :  { %1453 = vmatprep.subr.bf16.mxu0 %v1128_v0 }
 0x2b8   :  { %1454 = vmatpush1.bf16.msra.mxu0 %v1127_v37 }
 0x2b9   :  { %1455 = vmatprep.subr.bf16.mxu0 %v1134_v38 }
 0x2bc   :  { %1456 = vmatpush1.bf16.msra.mxu0 %v1133_v39 }
 0x2bd   :  { %1457 = vmatprep.subr.bf16.mxu0 %v1140_v44 }
 0x2c0   :  { %1458 = vmatpush1.bf16.msra.mxu0 %v1139_v48 }
 0x2c1   :  { %1459 = vmatprep.subr.bf16.mxu0 %v1146_v1 }
 0x2c4   :  { %1460 = vmatpush1.bf16.msra.mxu0 %v1145_v40 }
 0x2c5   :  { %1461 = vmatprep.subr.bf16.mxu0 %v1152_v41 }
 0x2c8   :  { %1462 = vmatpush1.bf16.msra.mxu0 %v1151_v51 }
 0x2c9   :  { %1463 = vmatprep.subr.bf16.mxu0 %v1158_v52 }
 0x2cc   :  { %1464 = vmatpush1.bf16.msra.mxu0 %v1157_v53 }
 0x2cd   :  { %1465 = vmatprep.subr.bf16.mxu0 %v1164_v54 }
 0x2d0   :  { %1466 = vmatpush1.bf16.msra.mxu0 %v1163_v55 }
 0x2d1   :  { %1467 = vmatprep.subr.bf16.mxu0 %v1170_v56 }
 0x2d4   :  { %1468 = vmatpush1.bf16.msra.mxu0 %v1169_v57 }
 0x2d5   :  { %1478 = vmatprep.subr.bf16.mxu0 %v1176_v58 }
 0x2d7   :  { %1470 = vmatmul.mubr.bf16.vlgmr.msra.gmra.mrb[8].mxu0 %v3770_v4  ;;  %v1205_v4 = vld [vmem:[#allocation2 + $0x410] sm:$0xff] }
 0x2d8   :  { %1479 = vmatpush1.bf16.msra.mxu0 %v1175_v43  ;;  %1510 = vmatprep.mubr.bf16.mxu0 %v3775_v14  ;;  %v1211_v14 = vld [vmem:[#allocation2 + $0x440] sm:$0xff] }
 0x2d9   :  { %1480 = vmatprep.subr.bf16.mxu0 %v1182_v59 }
 0x2dc   :  { %1481 = vmatpush1.bf16.msra.mxu0 %v1181_v60 }
 0x2dd   :  { %1482 = vmatprep.subr.bf16.mxu0 %v1188_v61 }
 0x2e0   :  { %1483 = vmatpush1.bf16.msra.mxu0 %v1187_v62 }
 0x2e1   :  { %1484 = vmatprep.subr.bf16.mxu0 %v1194_v2 }
 0x2e4   :  { %1485 = vmatpush1.bf16.msra.mxu0 %v1193_v3 }
 0x2e5   :  { %1486 = vmatprep.subr.bf16.mxu0 %v1200_v6 }
 0x2e8   :  { %1487 = vmatpush1.bf16.msra.mxu0 %v1199_v7 }
 0x2e9   :  { %1488 = vmatprep.subr.bf16.mxu0 %v1206_v12 }
 0x2ec   :  { %1489 = vmatpush1.bf16.msra.mxu0 %v1205_v4 }
 0x2ed   :  { %1490 = vmatprep.subr.bf16.mxu0 %v1212_v13 }
 0x2f0   :  { %1491 = vmatpush1.bf16.msra.mxu0 %v1211_v14 }
 0x2f1   :  { %1492 = vmatprep.subr.bf16.mxu0 %v1218_v42 }
 0x2f4   :  { %1493 = vmatpush1.bf16.msra.mxu0 %v1217_v47 }
 0x2f5   :  { %1494 = vmatprep.subr.bf16.mxu0 %v1224_v16 }
 0x2f8   :  { %1495 = vmatpush1.bf16.msra.mxu0 %v1223_v20 }
 0x2f9   :  { %1496 = vmatprep.subr.bf16.mxu0 %v1230_v46 }
 0x2fc   :  { %1497 = vmatpush1.bf16.msra.mxu0 %v1229_v50 }
 0x2fd   :  { %1498 = vmatprep.subr.bf16.mxu0 %v1236_v21 }
 0x300   :  { %1499 = vmatpush1.bf16.msra.mxu0 %v1235_v23 }
 0x301   :  { %1500 = vmatprep.subr.bf16.mxu0 %v1242_v22 }
 0x304   :  { %1501 = vmatpush1.bf16.msra.mxu0 %v1241_v25 }
 0x305   :  { %1502 = vmatprep.subr.bf16.mxu0 %v1248_v26 }
 0x308   :  { %1503 = vmatpush1.bf16.msra.mxu0 %v1247_v27 }
 0x309   :  { %1504 = vmatprep.subr.bf16.mxu0 %v1254_v28 }
 0x30c   :  { %1505 = vmatpush1.bf16.msra.mxu0 %v1253_v45 }
 0x30d   :  { %1506 = vmatprep.subr.bf16.mxu0 %v1260_v49 }
 0x310   :  { %1507 = vmatpush1.bf16.msra.mxu0 %v1259_v29 }
 0x311   :  { %1508 = vmatprep.subr.bf16.mxu0 %v1266_v30 }
 0x314   :  { %1509 = vmatpush1.bf16.msra.mxu0 %v1265_v31 }
 0x317   :  { %1511 = vmatmul.mubr.bf16.vlgmr.msra.gmra.mrb[8].mxu0 %v3784_v24 }
 0x36a   :  { %v1348_v32 = vpop.f32.mrb[4].mxu0  ;;  %v1430_v33 = vpop.f32.mrb[8].mxu1 }
 0x36b   :  { %v1519_v34 = vrot.slane %v1348_v32, 4  ;;  %v1531_v63 = vrot.slane %v1430_v33, 4  ;;  %v1350_v35 = vpop.f32.mrb[5].mxu0  ;;  %v1432_v36 = vpop.f32.mrb[9].mxu1 }
 0x36c   :  { %v1525_v0 = vrot.slane %v1350_v35, 4  ;;  %v1537_v37 = vrot.slane %v1432_v36, 4  ;;  %v1352_v38 = vpop.f32.mrb[6].mxu0  ;;  %v1434_v39 = vpop.f32.mrb[10].mxu1 }
 0x36d   :  { %v1520_v44 = vadd.f32 %v1519_v34, %v1348_v32  ;;  %v1532_v48 = vadd.f32 %v1531_v63, %v1430_v33  ;;  %v1353_v1 = vpop.f32.mrb[7].mxu0  ;;  %v1435_v40 = vpop.f32.mrb[11].mxu1 }
 0x36e   :  { %v1526_v41 = vadd.f32 %v1525_v0, %v1350_v35  ;;  %v1538_v51 = vadd.f32 %v1537_v37, %v1432_v36 }
 0x36f   :  { %v1521_v52 = vrot.slane %v1520_v44, 2  ;;  %v1533_v53 = vrot.slane %v1532_v48, 2 }
 0x370   :  { %v1527_v54 = vrot.slane %v1526_v41, 2  ;;  %v1539_v24 = vrot.slane %v1538_v51, 2 }
 0x371   :  { %v1522_v55 = vadd.f32 %v1521_v52, %v1520_v44  ;;  %v1534_v56 = vadd.f32 %v1533_v53, %v1532_v48 }
 0x372   :  { %v1528_v57 = vadd.f32 %v1527_v54, %v1526_v41  ;;  %v1540_v58 = vadd.f32 %v1539_v24, %v1538_v51 }
 0x373   :  { %v1523_v43 = vrot.slane %v1522_v55, 1  ;;  %v1535_v59 = vrot.slane %v1534_v56, 1 }
 0x374   :  { %v1529_v60 = vrot.slane %v1528_v57, 1  ;;  %v1541_v61 = vrot.slane %v1540_v58, 1 }
 0x375   :  { %v1524_v62 = vadd.f32 %v1523_v43, %v1522_v55  ;;  %v1536_v2 = vadd.f32 %v1535_v59, %v1534_v56 }
 0x376   :  { %v1530_v3 = vadd.f32 %v1529_v60, %v1528_v57  ;;  %v1542_v6 = vadd.f32 %v1541_v61, %v1540_v58 }
 0x377   :  { %v1555_v7 = vmul.f32 0.125, %v1524_v62  ;;  %v1557_v12 = vmul.f32 0.125, %v1536_v2  ;;  %v1267_v2 = vld [vmem:[#allocation10] sm:$0xff] }
 0x378   :  { %v1556_v4 = vmul.f32 0.125, %v1530_v3  ;;  %v1558_v13 = vmul.f32 0.125, %v1542_v6  ;;  %v1729_v6 = vrot.slane %v1267_v2, %v3718_v8 }
 0x379   :  { %v3792_v14 = vsub.f32 %v1348_v32, %v1555_v7  ;;  %v3794_v42 = vsub.f32 %v1430_v33, %v1557_v12  ;;  %v1733_v7 = vrot.slane %v1267_v2, %v3720_v9  ;;  %v1737_v12 = vrot.slane %v1267_v2, %v3722_v10 }
 0x37a   :  { %v3796_v47 = vsub.f32 %v1350_v35, %v1556_v4  ;;  %v3798_v16 = vsub.f32 %v1432_v36, %v1558_v13  ;;  %v1741_v4 = vrot.slane %v1267_v2, %v3724_v11 }
 0x37b   :  { %v1567_v20 = vmul.f32 %v3792_v14, %v3792_v14  ;;  %v1569_v46 = vmul.f32 %v3794_v42, %v3794_v42 }
 0x37c   :  { %v1568_v50 = vmul.f32 %v3796_v47, %v3796_v47  ;;  %v1570_v21 = vmul.f32 %v3798_v16, %v3798_v16 }
 0x37d   :  { %v1573_v23 = vrot.slane %v1567_v20, 4  ;;  %v1585_v22 = vrot.slane %v1569_v46, 4 }
 0x37e   :  { %v1579_v25 = vrot.slane %v1568_v50, 4  ;;  %v1591_v26 = vrot.slane %v1570_v21, 4 }
 0x37f   :  { %v1574_v27 = vadd.f32 %v1573_v23, %v1567_v20  ;;  %v1586_v28 = vadd.f32 %v1585_v22, %v1569_v46  ;;  %v1759_v23 = vrot.slane %v1729_v6, %v3718_v8  ;;  %v1763_v22 = vrot.slane %v1733_v7, %v3718_v8 }
 0x380   :  { %v1580_v45 = vadd.f32 %v1579_v25, %v1568_v50  ;;  %v1592_v49 = vadd.f32 %v1591_v26, %v1570_v21  ;;  %v1767_v25 = vrot.slane %v1737_v12, %v3718_v8  ;;  %v1771_v26 = vrot.slane %v1741_v4, %v3718_v8 }
 0x381   :  { %v1575_v29 = vrot.slane %v1574_v27, 2  ;;  %v1587_v30 = vrot.slane %v1586_v28, 2 }
 0x382   :  { %v1581_v31 = vrot.slane %v1580_v45, 2  ;;  %v1593_v32 = vrot.slane %v1592_v49, 2 }
 0x383   :  { %v1576_v33 = vadd.f32 %v1575_v29, %v1574_v27  ;;  %v1588_v34 = vadd.f32 %v1587_v30, %v1586_v28 }
 0x384   :  { %v1582_v63 = vadd.f32 %v1581_v31, %v1580_v45  ;;  %v1594_v35 = vadd.f32 %v1593_v32, %v1592_v49 }
 0x385   :  { %v1577_v36 = vrot.slane %v1576_v33, 1  ;;  %v1589_v0 = vrot.slane %v1588_v34, 1 }
 0x386   :  { %v1583_v37 = vrot.slane %v1582_v63, 1  ;;  %v1595_v38 = vrot.slane %v1594_v35, 1 }
 0x387   :  { %v1578_v39 = vadd.f32 %v1577_v36, %v1576_v33  ;;  %v1590_v44 = vadd.f32 %v1589_v0, %v1588_v34 }
 0x388   :  { %v1584_v48 = vadd.f32 %v1583_v37, %v1582_v63  ;;  %v1596_v1 = vadd.f32 %v1595_v38, %v1594_v35 }
 0x389   :  { %v1609_v40 = vmul.f32 0.125, %v1578_v39  ;;  %v1611_v41 = vmul.f32 0.125, %v1590_v44 }
 0x38a   :  { %v1610_v51 = vmul.f32 0.125, %v1584_v48  ;;  %v1612_v52 = vmul.f32 0.125, %v1596_v1 }
 0x38b   :  { %v1615_v53 = vadd.f32 1e-05, %v1609_v40  ;;  %v1617_v54 = vadd.f32 1e-05, %v1611_v41 }
 0x38c   :  { %v1616_v24 = vadd.f32 1e-05, %v1610_v51  ;;  %v1618_v55 = vadd.f32 1e-05, %v1612_v52 }
 0x38d   :  { %3409 = vrsqrt.f32 %v1615_v53 }
 0x38e   :  { %3411 = vrsqrt.f32 %v1617_v54 }
 0x38f   :  { %3413 = vrsqrt.f32 %v1616_v24 }
 0x390   :  { %3415 = vrsqrt.f32 %v1618_v55 }
 0x397   :  { %v3410_v56 = vpop.eup %3409 }
 0x398   :  { %v3412_v57 = vpop.eup %3411 }
 0x399   :  { %v3414_v58 = vpop.eup %3413 }
 0x39a   :  { %v3416_v43 = vpop.eup %3415  ;;  %v1633_v59 = vcombine.low %v3410_v56, %v3414_v58 }
 0x39b   :  { %v1634_v60 = vcombine.low %v3412_v57, %v3416_v43 }
 0x39c   :  { %v1641_v61 = vrot.slane %v1633_v59, %v3716_v5 }
 0x39d   :  { %v1648_v62 = vrot.slane %v1634_v60, %v3716_v5 }
 0x39f   :  { %v1649_v3 = vcombine.low %v1641_v61, %v1648_v62 }
 0x3a1   :  { %v1660_v13 = vmul.f32 %v1649_v3, %v1267_v2 }
 0x3a3   :  { %v1667_v20 = vrot.slane %v1660_v13, %v3728_v15  ;;  %v1671_v46 = vrot.slane %v1660_v13, %v3730_v17  ;;  %v1675_v50 = vrot.slane %v1660_v13, %v3732_v18  ;;  %v1679_v21 = vrot.slane %v1660_v13, %v3734_v19 }
 0x3a5   :  { %v1697_v27 = vrot.slane %v1667_v20, %v3728_v15  ;;  %v1701_v28 = vrot.slane %v1671_v46, %v3728_v15  ;;  %v1705_v45 = vrot.slane %v1675_v50, %v3728_v15  ;;  %v1709_v49 = vrot.slane %v1679_v21, %v3728_v15 }
 0x3a7   :  { %v1718_v29 = vmul.f32 %v1697_v27, %v3792_v14  ;;  %v1719_v30 = vmul.f32 %v1701_v28, %v3796_v47  ;;  %v1720_v31 = vmul.f32 %v1705_v45, %v3794_v42  ;;  %v1721_v32 = vmul.f32 %v1709_v49, %v3798_v16  ;;  %v1268_v45 = vld [vmem:[#allocation10 + $0x8] sm:$0xf] }
 0x3a9   :  { %v3830_v33 = vadd.f32 %v1759_v23, %v1718_v29  ;;  %v3832_v34 = vadd.f32 %v1763_v22, %v1719_v30  ;;  %v3834_v63 = vadd.f32 %v1767_v25, %v1720_v31  ;;  %v3836_v35 = vadd.f32 %v1771_v26, %v1721_v32 }
 0x3aa   :  { %v1745_v30 = vrot.slane %v1268_v45, %v3718_v8  ;;  %v1749_v31 = vrot.slane %v1268_v45, %v3720_v9 }
 0x3ab   :  { %v1786_v36 = vmax.f32 %v3830_v33, 0.0  ;;  %v1787_v0 = vmax.f32 %v3832_v34, 0.0  ;;  %v1788_v14 = vmax.f32 %v3834_v63, 0.0  ;;  %v1789_v47 = vmax.f32 %v3836_v35, 0.0 }
 0x3ea   :  { %v1512_v37 = vpop.f32.mrb[8].mxu0 }
 0x3eb   :  { %v1543_v42 = vrot.slane %v1512_v37, 4  ;;  %v1514_v38 = vpop.f32.mrb[9].mxu0 }
 0x3ec   :  { %v1549_v16 = vrot.slane %v1514_v38, 4  ;;  %v1516_v39 = vpop.f32.mrb[10].mxu0 }
 0x3ed   :  { %v1544_v44 = vadd.f32 %v1543_v42, %v1512_v37  ;;  %v1517_v48 = vpop.f32.mrb[11].mxu0  ;;  %v1779_v39 = vrot.slane %v1749_v31, %v3718_v8 }
 0x3ee   :  { %v1550_v1 = vadd.f32 %v1549_v16, %v1514_v38  ;;  %v1775_v16 = vrot.slane %v1745_v30, %v3718_v8 }
 0x3ef   :  { %v1545_v40 = vrot.slane %v1544_v44, 2 }
 0x3f0   :  { %v1551_v41 = vrot.slane %v1550_v1, 2 }
 0x3f1   :  { %v1546_v51 = vadd.f32 %v1545_v40, %v1544_v44 }
 0x3f2   :  { %v1552_v52 = vadd.f32 %v1551_v41, %v1550_v1 }
 0x3f3   :  { %v1547_v53 = vrot.slane %v1546_v51, 1 }
 0x3f4   :  { %v1553_v54 = vrot.slane %v1552_v52, 1 }
 0x3f5   :  { %v1548_v24 = vadd.f32 %v1547_v53, %v1546_v51 }
 0x3f6   :  { %v1554_v55 = vadd.f32 %v1553_v54, %v1552_v52 }
 0x3f7   :  { %v1559_v56 = vmul.f32 0.125, %v1548_v24 }
 0x3f8   :  { %v1560_v57 = vmul.f32 0.125, %v1554_v55 }
 0x3f9   :  { %v1565_v58 = vsub.f32 %v1512_v37, %v1559_v56 }
 0x3fa   :  { %v1566_v43 = vsub.f32 %v1514_v38, %v1560_v57 }
 0x3fb   :  { %v1571_v59 = vmul.f32 %v1565_v58, %v1565_v58 }
 0x3fc   :  { %v1572_v60 = vmul.f32 %v1566_v43, %v1566_v43 }
 0x3fd   :  { %v1597_v61 = vrot.slane %v1571_v59, 4 }
 0x3fe   :  { %v1603_v62 = vrot.slane %v1572_v60, 4 }
 0x3ff   :  { %v1598_v2 = vadd.f32 %v1597_v61, %v1571_v59 }
 0x400   :  { %v1604_v3 = vadd.f32 %v1603_v62, %v1572_v60 }
 0x401   :  { %v1599_v6 = vrot.slane %v1598_v2, 2 }
 0x402   :  { %v1605_v7 = vrot.slane %v1604_v3, 2 }
 0x403   :  { %v1600_v12 = vadd.f32 %v1599_v6, %v1598_v2 }
 0x404   :  { %v1606_v4 = vadd.f32 %v1605_v7, %v1604_v3 }
 0x405   :  { %v1601_v13 = vrot.slane %v1600_v12, 1 }
 0x406   :  { %v1607_v20 = vrot.slane %v1606_v4, 1 }
 0x407   :  { %v1602_v46 = vadd.f32 %v1601_v13, %v1600_v12 }
 0x408   :  { %v1608_v50 = vadd.f32 %v1607_v20, %v1606_v4 }
 0x409   :  { %v1613_v21 = vmul.f32 0.125, %v1602_v46 }
 0x40a   :  { %v1614_v23 = vmul.f32 0.125, %v1608_v50 }
 0x40b   :  { %v1619_v22 = vadd.f32 1e-05, %v1613_v21 }
 0x40c   :  { %v1620_v25 = vadd.f32 1e-05, %v1614_v23 }
 0x40d   :  { %3417 = vrsqrt.f32 %v1619_v22 }
 0x40e   :  { %3419 = vrsqrt.f32 %v1620_v25 }
 0x417   :  { %v3418_v26 = vpop.eup %3417 }
 0x418   :  { %v3420_v27 = vpop.eup %3419 }
 0x419   :  { %v1650_v28 = vcombine.low %v3418_v26, %v3420_v27 }
 0x41b   :  { %v1657_v49 = vrot.slane %v1650_v28, %v3716_v5 }
 0x41d   :  { %v1661_v29 = vmul.f32 %v1657_v49, %v1268_v45 }
 0x41f   :  { %v1683_v32 = vrot.slane %v1661_v29, %v3728_v15  ;;  %v1687_v37 = vrot.slane %v1661_v29, %v3730_v17 }
 0x421   :  { %v1713_v42 = vrot.slane %v1683_v32, %v3728_v15  ;;  %v1717_v38 = vrot.slane %v1687_v37, %v3728_v15 }
 0x423   :  { %v1722_v44 = vmul.f32 %v1713_v42, %v1565_v58  ;;  %v1723_v48 = vmul.f32 %v1717_v38, %v1566_v43 }
 0x425   :  { %v3851_v1 = vadd.f32 %v1775_v16, %v1722_v44  ;;  %v3853_v40 = vadd.f32 %v1779_v39, %v1723_v48 }
 0x427   :  { %v1790_v41 = vmax.f32 %v3851_v1, 0.0  ;;  %v1791_v51 = vmax.f32 %v3853_v40, 0.0 }
 0x428   :  { %3555 = dma.done.wait [#allocation4 + $0x1], 49152 }
 0x429   :  { %3556 = vsyncadd [#allocation4 + $0x1], 4294918144  ;;  %v3860_v52 = vpack.c.bf16 %v1787_v0, %v1787_v0  ;;  %v1797_v53 = vld [vmem:[#allocation3 + $0x8] sm:$0xff]  ;;  %v1799_v54 = vld [vmem:[#allocation3 + $0x18] sm:$0xff]  ;;  %s3583_s0 = smov [#allocation13]  }
 0x42a   :  { %v1796_v24 = vld [vmem:[#allocation3] sm:$0xff]  ;;  %2188 = vmatprep.subr.bf16.mxu1 %v1797_v53  ;;  %2311 = vmatprep.subr.bf16.mxu0 %v1799_v54  ;;  %v1798_v55 = vld [vmem:[#allocation3 + $0x10] sm:$0xff]  ;;  %v1805_v56 = vld [vmem:[#allocation3 + $0x48] sm:$0xff]  ;;  %s3056_s26 = sshll.u32 %s3583_s0, 4  ;;  %s3057_s26 = int_to_ptr.vmem [resolvable:$true] %s3056_s26 }
 0x42b   :  { %2220 = vmatprep.mubr.bf16.mxu1 %v3860_v52  ;;  %2343 = vmatprep.mubr.bf16.mxu0 %v3860_v52  ;;  %v1807_v57 = vld [vmem:[#allocation3 + $0x58] sm:$0xff]  ;;  %v1804_v34 = vld [vmem:[#allocation3 + $0x40] sm:$0xff]  ;;  %v1806_v58 = vld [vmem:[#allocation3 + $0x50] sm:$0xff]  ;;  %s3525_s28 = scalar_lea.vmem %s3057_s26, 1024  ;;  %p3530_p5 = scmp.lt.s32.totalorder %s3057_s26, %s3057_s26 }
 0x42c   :  { %2189 = vmatpush1.bf16.msra.mxu1 %v1796_v24  ;;  %2312 = vmatpush1.bf16.msra.mxu0 %v1798_v55  ;;  %v1813_v0 = vld [vmem:[#allocation3 + $0x88] sm:$0xff]  ;;  %v1815_v43 = vld [vmem:[#allocation3 + $0x98] sm:$0xff]  ;;  %v1812_v59 = vld [vmem:[#allocation3 + $0x80] sm:$0xff]  ;;  %p3526_p4 = scmp.ne.s32.totalorder %s3057_s26, %s3525_s28  ;;  %p3531_p6 = scmp.lt.s32.totalorder %s3525_s28, %s3525_s28 }
 0x42d   :  { %2190 = vmatprep.subr.bf16.mxu1 %v1805_v56  ;;  %2313 = vmatprep.subr.bf16.mxu0 %v1807_v57  ;;  %v1814_v60 = vld [vmem:[#allocation3 + $0x90] sm:$0xff]  ;;  %v1821_v61 = vld [vmem:[#allocation3 + $0xc8] sm:$0xff]  ;;  %v1823_v62 = vld [vmem:[#allocation3 + $0xd8] sm:$0xff] }
 0x42e   :  { %v1820_v2 = vld [vmem:[#allocation3 + $0xc0] sm:$0xff]  ;;  %v1822_v3 = vld [vmem:[#allocation3 + $0xd0] sm:$0xff]  ;;  %v1829_v6 = vld [vmem:[#allocation3 + $0x108] sm:$0xff]  ;;  %p3532_p7 = por %p3531_p6, %p3530_p5 }
 0x42f   :  { %v1831_v7 = vld [vmem:[#allocation3 + $0x118] sm:$0xff]  ;;  %v1828_v12 = vld [vmem:[#allocation3 + $0x100] sm:$0xff]  ;;  %v1830_v4 = vld [vmem:[#allocation3 + $0x110] sm:$0xff] }
 0x430   :  { %2191 = vmatpush1.bf16.msra.mxu1 %v1804_v34  ;;  %2314 = vmatpush1.bf16.msra.mxu0 %v1806_v58  ;;  %v1837_v13 = vld [vmem:[#allocation3 + $0x148] sm:$0xff]  ;;  %v1839_v20 = vld [vmem:[#allocation3 + $0x158] sm:$0xff]  ;;  %v1836_v46 = vld [vmem:[#allocation3 + $0x140] sm:$0xff]  ;;  %p3533_p8 = pnand %p3532_p7, %p3526_p4 }
 0x431   :  { %2192 = vmatprep.subr.bf16.mxu1 %v1813_v0  ;;  %2315 = vmatprep.subr.bf16.mxu0 %v1815_v43  ;;  %v1838_v50 = vld [vmem:[#allocation3 + $0x150] sm:$0xff]  ;;  %v1845_v21 = vld [vmem:[#allocation3 + $0x188] sm:$0xff]  ;;  %v1847_v23 = vld [vmem:[#allocation3 + $0x198] sm:$0xff] }
 0x432   :  { %v1844_v22 = vld [vmem:[#allocation3 + $0x180] sm:$0xff]  ;;  %v1846_v25 = vld [vmem:[#allocation3 + $0x190] sm:$0xff]  ;;  %v1853_v26 = vld [vmem:[#allocation3 + $0x1c8] sm:$0xff] }
 0x433   :  { %v1855_v27 = vld [vmem:[#allocation3 + $0x1d8] sm:$0xff]  ;;  %v1852_v28 = vld [vmem:[#allocation3 + $0x1c0] sm:$0xff]  ;;  %v1854_v45 = vld [vmem:[#allocation3 + $0x1d0] sm:$0xff] }
 0x434   :  { %2193 = vmatpush1.bf16.msra.mxu1 %v1812_v59  ;;  %2316 = vmatpush1.bf16.msra.mxu0 %v1814_v60  ;;  %v1861_v49 = vld [vmem:[#allocation3 + $0x208] sm:$0xff]  ;;  %v1863_v29 = vld [vmem:[#allocation3 + $0x218] sm:$0xff]  ;;  %v1860_v30 = vld [vmem:[#allocation3 + $0x200] sm:$0xff] }
 0x435   :  { %2194 = vmatprep.subr.bf16.mxu1 %v1821_v61  ;;  %2317 = vmatprep.subr.bf16.mxu0 %v1823_v62  ;;  %v1862_v31 = vld [vmem:[#allocation3 + $0x210] sm:$0xff]  ;;  %v1869_v32 = vld [vmem:[#allocation3 + $0x248] sm:$0xff]  ;;  %v1871_v37 = vld [vmem:[#allocation3 + $0x258] sm:$0xff] }
 0x436   :  { %v1868_v42 = vld [vmem:[#allocation3 + $0x240] sm:$0xff]  ;;  %v1870_v38 = vld [vmem:[#allocation3 + $0x250] sm:$0xff]  ;;  %v1877_v16 = vld [vmem:[#allocation3 + $0x288] sm:$0xff] }
 0x437   :  { %v1879_v39 = vld [vmem:[#allocation3 + $0x298] sm:$0xff]  ;;  %v1876_v44 = vld [vmem:[#allocation3 + $0x280] sm:$0xff]  ;;  %v1878_v48 = vld [vmem:[#allocation3 + $0x290] sm:$0xff] }
 0x438   :  { %2195 = vmatpush1.bf16.msra.mxu1 %v1820_v2  ;;  %2318 = vmatpush1.bf16.msra.mxu0 %v1822_v3  ;;  %v1885_v53 = vld [vmem:[#allocation3 + $0x2c8] sm:$0xff]  ;;  %v1887_v54 = vld [vmem:[#allocation3 + $0x2d8] sm:$0xff]  ;;  %v1884_v24 = vld [vmem:[#allocation3 + $0x2c0] sm:$0xff] }
 0x439   :  { %2196 = vmatprep.subr.bf16.mxu1 %v1829_v6  ;;  %2319 = vmatprep.subr.bf16.mxu0 %v1831_v7  ;;  %v1886_v55 = vld [vmem:[#allocation3 + $0x2d0] sm:$0xff]  ;;  %v1893_v56 = vld [vmem:[#allocation3 + $0x308] sm:$0xff]  ;;  %v1895_v57 = vld [vmem:[#allocation3 + $0x318] sm:$0xff] }
 0x43a   :  { %v1892_v34 = vld [vmem:[#allocation3 + $0x300] sm:$0xff]  ;;  %v1894_v58 = vld [vmem:[#allocation3 + $0x310] sm:$0xff]  ;;  %v1901_v0 = vld [vmem:[#allocation3 + $0x348] sm:$0xff] }
 0x43b   :  { %v1903_v43 = vld [vmem:[#allocation3 + $0x358] sm:$0xff]  ;;  %v1900_v59 = vld [vmem:[#allocation3 + $0x340] sm:$0xff]  ;;  %v1902_v60 = vld [vmem:[#allocation3 + $0x350] sm:$0xff] }
 0x43c   :  { %2197 = vmatpush1.bf16.msra.mxu1 %v1828_v12  ;;  %2320 = vmatpush1.bf16.msra.mxu0 %v1830_v4  ;;  %v1909_v61 = vld [vmem:[#allocation3 + $0x388] sm:$0xff]  ;;  %v1911_v62 = vld [vmem:[#allocation3 + $0x398] sm:$0xff]  ;;  %v1908_v2 = vld [vmem:[#allocation3 + $0x380] sm:$0xff] }
 0x43d   :  { %2198 = vmatprep.subr.bf16.mxu1 %v1837_v13  ;;  %2321 = vmatprep.subr.bf16.mxu0 %v1839_v20  ;;  %v1910_v3 = vld [vmem:[#allocation3 + $0x390] sm:$0xff]  ;;  %v1917_v6 = vld [vmem:[#allocation3 + $0x3c8] sm:$0xff]  ;;  %v1919_v7 = vld [vmem:[#allocation3 + $0x3d8] sm:$0xff] }
 0x43e   :  { %v1916_v12 = vld [vmem:[#allocation3 + $0x3c0] sm:$0xff]  ;;  %v1918_v4 = vld [vmem:[#allocation3 + $0x3d0] sm:$0xff]  ;;  %v1925_v13 = vld [vmem:[#allocation3 + $0x408] sm:$0xff] }
 0x43f   :  { %v1927_v20 = vld [vmem:[#allocation3 + $0x418] sm:$0xff]  ;;  %v1932_v33 = vld [vmem:[#allocation3 + $0x440] sm:$0xff] }
 0x440   :  { %2199 = vmatpush1.bf16.msra.mxu1 %v1836_v46  ;;  %2322 = vmatpush1.bf16.msra.mxu0 %v1838_v50  ;;  %v3867_v46 = vpack.c.bf16 %v1786_v36, %v1786_v36  ;;  %v1924_v50 = vld [vmem:[#allocation3 + $0x400] sm:$0xff]  ;;  %v1934_v36 = vld [vmem:[#allocation3 + $0x450] sm:$0xff] }
 0x441   :  { %2200 = vmatprep.subr.bf16.mxu1 %v1845_v21  ;;  %2323 = vmatprep.subr.bf16.mxu0 %v1847_v23  ;;  %v1926_v21 = vld [vmem:[#allocation3 + $0x410] sm:$0xff]  ;;  %v1933_v23 = vld [vmem:[#allocation3 + $0x448] sm:$0xff]  ;;  %v1940_v35 = vld [vmem:[#allocation3 + $0x480] sm:$0xff] }
 0x442   :  { %v2060_v63 = vld [vmem:[#allocation3 + $0x840] sm:$0xff] }
 0x443   :  { %v2068_v40 = vld [vmem:[#allocation3 + $0x880] sm:$0xff] }
 0x444   :  { %2201 = vmatpush1.bf16.msra.mxu1 %v1844_v22  ;;  %2324 = vmatpush1.bf16.msra.mxu0 %v1846_v25  ;;  %v1935_v22 = vld [vmem:[#allocation3 + $0x458] sm:$0xff]  ;;  %v3872_v25 = vpack.c.bf16 %v1789_v47, %v1789_v47  ;;  %v1942_v47 = vld [vmem:[#allocation3 + $0x490] sm:$0xff]  ;;  %v1808_v1 = vld [vmem:[#allocation3 + $0x60] sm:$0xff] }
 0x445   :  { %2202 = vmatprep.subr.bf16.mxu1 %v1853_v26  ;;  %2325 = vmatprep.subr.bf16.mxu0 %v1855_v27  ;;  %v1941_v26 = vld [vmem:[#allocation3 + $0x488] sm:$0xff]  ;;  %v1943_v27 = vld [vmem:[#allocation3 + $0x498] sm:$0xff] }
 0x448   :  { %2203 = vmatpush1.bf16.msra.mxu1 %v1852_v28  ;;  %2326 = vmatpush1.bf16.msra.mxu0 %v1854_v45  ;;  %v1949_v28 = vld [vmem:[#allocation3 + $0x4c8] sm:$0xff]  ;;  %v1951_v45 = vld [vmem:[#allocation3 + $0x4d8] sm:$0xff] }
 0x449   :  { %2204 = vmatprep.subr.bf16.mxu1 %v1861_v49  ;;  %2327 = vmatprep.subr.bf16.mxu0 %v1863_v29  ;;  %v1948_v49 = vld [vmem:[#allocation3 + $0x4c0] sm:$0xff]  ;;  %v1950_v29 = vld [vmem:[#allocation3 + $0x4d0] sm:$0xff] }
 0x44c   :  { %2205 = vmatpush1.bf16.msra.mxu1 %v1860_v30  ;;  %2328 = vmatpush1.bf16.msra.mxu0 %v1862_v31  ;;  %v1957_v30 = vld [vmem:[#allocation3 + $0x508] sm:$0xff]  ;;  %v1959_v31 = vld [vmem:[#allocation3 + $0x518] sm:$0xff] }
 0x44d   :  { %2206 = vmatprep.subr.bf16.mxu1 %v1869_v32  ;;  %2329 = vmatprep.subr.bf16.mxu0 %v1871_v37  ;;  %v1956_v32 = vld [vmem:[#allocation3 + $0x500] sm:$0xff]  ;;  %v1958_v37 = vld [vmem:[#allocation3 + $0x510] sm:$0xff] }
 0x450   :  { %2207 = vmatpush1.bf16.msra.mxu1 %v1868_v42  ;;  %2330 = vmatpush1.bf16.msra.mxu0 %v1870_v38  ;;  %v1965_v42 = vld [vmem:[#allocation3 + $0x548] sm:$0xff]  ;;  %v1967_v38 = vld [vmem:[#allocation3 + $0x558] sm:$0xff] }
 0x451   :  { %2208 = vmatprep.subr.bf16.mxu1 %v1877_v16  ;;  %2331 = vmatprep.subr.bf16.mxu0 %v1879_v39  ;;  %v1964_v16 = vld [vmem:[#allocation3 + $0x540] sm:$0xff]  ;;  %v1966_v39 = vld [vmem:[#allocation3 + $0x550] sm:$0xff] }
 0x454   :  { %2209 = vmatpush1.bf16.msra.mxu1 %v1876_v44  ;;  %2332 = vmatpush1.bf16.msra.mxu0 %v1878_v48  ;;  %v1973_v44 = vld [vmem:[#allocation3 + $0x588] sm:$0xff]  ;;  %v1975_v48 = vld [vmem:[#allocation3 + $0x598] sm:$0xff] }
 0x455   :  { %2210 = vmatprep.subr.bf16.mxu1 %v1885_v53  ;;  %2333 = vmatprep.subr.bf16.mxu0 %v1887_v54  ;;  %v1972_v53 = vld [vmem:[#allocation3 + $0x580] sm:$0xff]  ;;  %v1974_v54 = vld [vmem:[#allocation3 + $0x590] sm:$0xff] }
 0x458   :  { %2211 = vmatpush1.bf16.msra.mxu1 %v1884_v24  ;;  %2334 = vmatpush1.bf16.msra.mxu0 %v1886_v55  ;;  %v1981_v24 = vld [vmem:[#allocation3 + $0x5c8] sm:$0xff]  ;;  %v1983_v55 = vld [vmem:[#allocation3 + $0x5d8] sm:$0xff] }
 0x459   :  { %2212 = vmatprep.subr.bf16.mxu1 %v1893_v56  ;;  %2335 = vmatprep.subr.bf16.mxu0 %v1895_v57  ;;  %v1980_v56 = vld [vmem:[#allocation3 + $0x5c0] sm:$0xff]  ;;  %v1982_v57 = vld [vmem:[#allocation3 + $0x5d0] sm:$0xff] }
 0x45c   :  { %2213 = vmatpush1.bf16.msra.mxu1 %v1892_v34  ;;  %2336 = vmatpush1.bf16.msra.mxu0 %v1894_v58  ;;  %v1989_v34 = vld [vmem:[#allocation3 + $0x608] sm:$0xff]  ;;  %v1991_v58 = vld [vmem:[#allocation3 + $0x618] sm:$0xff] }
 0x45d   :  { %2214 = vmatprep.subr.bf16.mxu1 %v1901_v0  ;;  %2337 = vmatprep.subr.bf16.mxu0 %v1903_v43  ;;  %v1988_v0 = vld [vmem:[#allocation3 + $0x600] sm:$0xff]  ;;  %v1990_v43 = vld [vmem:[#allocation3 + $0x610] sm:$0xff] }
 0x460   :  { %2215 = vmatpush1.bf16.msra.mxu1 %v1900_v59  ;;  %2338 = vmatpush1.bf16.msra.mxu0 %v1902_v60  ;;  %v1997_v59 = vld [vmem:[#allocation3 + $0x648] sm:$0xff]  ;;  %v1999_v60 = vld [vmem:[#allocation3 + $0x658] sm:$0xff] }
 0x461   :  { %2216 = vmatprep.subr.bf16.mxu1 %v1909_v61  ;;  %2339 = vmatprep.subr.bf16.mxu0 %v1911_v62  ;;  %v1996_v61 = vld [vmem:[#allocation3 + $0x640] sm:$0xff]  ;;  %v1998_v62 = vld [vmem:[#allocation3 + $0x650] sm:$0xff] }
 0x464   :  { %2217 = vmatpush1.bf16.msra.mxu1 %v1908_v2  ;;  %2340 = vmatpush1.bf16.msra.mxu0 %v1910_v3  ;;  %v2005_v2 = vld [vmem:[#allocation3 + $0x688] sm:$0xff]  ;;  %v2007_v3 = vld [vmem:[#allocation3 + $0x698] sm:$0xff] }
 0x465   :  { %2218 = vmatprep.subr.bf16.mxu1 %v1917_v6  ;;  %2341 = vmatprep.subr.bf16.mxu0 %v1919_v7  ;;  %v2004_v6 = vld [vmem:[#allocation3 + $0x680] sm:$0xff]  ;;  %v2006_v7 = vld [vmem:[#allocation3 + $0x690] sm:$0xff] }
 0x468   :  { %2219 = vmatpush1.bf16.msra.mxu1 %v1916_v12  ;;  %2342 = vmatpush1.bf16.msra.mxu0 %v1918_v4  ;;  %v2013_v12 = vld [vmem:[#allocation3 + $0x6c8] sm:$0xff]  ;;  %v2015_v4 = vld [vmem:[#allocation3 + $0x6d8] sm:$0xff] }
 0x469   :  { %2229 = vmatprep.subr.bf16.mxu1 %v1925_v13  ;;  %2352 = vmatprep.subr.bf16.mxu0 %v1927_v20  ;;  %v2012_v13 = vld [vmem:[#allocation3 + $0x6c0] sm:$0xff]  ;;  %v2014_v20 = vld [vmem:[#allocation3 + $0x6d0] sm:$0xff] }
 0x46b   :  { %2221 = vmatmul.mubr.bf16.vlgmr.msra.gmra.mrb[12].mxu1 %v3867_v46  ;;  %2344 = vmatmul.mubr.bf16.vlgmr.msra.gmra.mrb[12].mxu0 %v3867_v46 }
 0x46c   :  { %2230 = vmatpush1.bf16.msra.mxu1 %v1924_v50  ;;  %2353 = vmatpush1.bf16.msra.mxu0 %v1926_v21  ;;  %v2021_v50 = vld [vmem:[#allocation3 + $0x708] sm:$0xff]  ;;  %v2023_v21 = vld [vmem:[#allocation3 + $0x718] sm:$0xff] }
 0x46d   :  { %2231 = vmatprep.subr.bf16.mxu1 %v1933_v23  ;;  %2354 = vmatprep.subr.bf16.mxu0 %v1935_v22  ;;  %v2020_v23 = vld [vmem:[#allocation3 + $0x700] sm:$0xff]  ;;  %v2022_v22 = vld [vmem:[#allocation3 + $0x710] sm:$0xff] }
 0x46e   :  { %2261 = vmatprep.mubr.bf16.mxu1 %v3872_v25  ;;  %2384 = vmatprep.mubr.bf16.mxu0 %v3872_v25 }
 0x470   :  { %2232 = vmatpush1.bf16.msra.mxu1 %v1932_v33  ;;  %2355 = vmatpush1.bf16.msra.mxu0 %v1934_v36  ;;  %v2029_v33 = vld [vmem:[#allocation3 + $0x748] sm:$0xff]  ;;  %v2031_v36 = vld [vmem:[#allocation3 + $0x758] sm:$0xff] }
 0x471   :  { %2233 = vmatprep.subr.bf16.mxu1 %v1941_v26  ;;  %2356 = vmatprep.subr.bf16.mxu0 %v1943_v27  ;;  %v2028_v26 = vld [vmem:[#allocation3 + $0x740] sm:$0xff]  ;;  %v2030_v27 = vld [vmem:[#allocation3 + $0x750] sm:$0xff] }
 0x474   :  { %2234 = vmatpush1.bf16.msra.mxu1 %v1940_v35  ;;  %2357 = vmatpush1.bf16.msra.mxu0 %v1942_v47  ;;  %v2037_v35 = vld [vmem:[#allocation3 + $0x788] sm:$0xff]  ;;  %v2039_v47 = vld [vmem:[#allocation3 + $0x798] sm:$0xff] }
 0x475   :  { %2235 = vmatprep.subr.bf16.mxu1 %v1949_v28  ;;  %2358 = vmatprep.subr.bf16.mxu0 %v1951_v45  ;;  %v2036_v28 = vld [vmem:[#allocation3 + $0x780] sm:$0xff]  ;;  %v2038_v45 = vld [vmem:[#allocation3 + $0x790] sm:$0xff] }
 0x478   :  { %2236 = vmatpush1.bf16.msra.mxu1 %v1948_v49  ;;  %2359 = vmatpush1.bf16.msra.mxu0 %v1950_v29  ;;  %v2045_v49 = vld [vmem:[#allocation3 + $0x7c8] sm:$0xff]  ;;  %v2047_v29 = vld [vmem:[#allocation3 + $0x7d8] sm:$0xff] }
 0x479   :  { %2237 = vmatprep.subr.bf16.mxu1 %v1957_v30  ;;  %2360 = vmatprep.subr.bf16.mxu0 %v1959_v31  ;;  %v2044_v30 = vld [vmem:[#allocation3 + $0x7c0] sm:$0xff]  ;;  %v2046_v31 = vld [vmem:[#allocation3 + $0x7d0] sm:$0xff] }
 0x47c   :  { %2238 = vmatpush1.bf16.msra.mxu1 %v1956_v32  ;;  %2361 = vmatpush1.bf16.msra.mxu0 %v1958_v37  ;;  %v2053_v32 = vld [vmem:[#allocation3 + $0x808] sm:$0xff]  ;;  %v2055_v37 = vld [vmem:[#allocation3 + $0x818] sm:$0xff] }
 0x47d   :  { %2239 = vmatprep.subr.bf16.mxu1 %v1965_v42  ;;  %2362 = vmatprep.subr.bf16.mxu0 %v1967_v38  ;;  %v3881_v42 = vpack.c.bf16 %v1788_v14, %v1788_v14  ;;  %v2052_v38 = vld [vmem:[#allocation3 + $0x800] sm:$0xff]  ;;  %v2062_v14 = vld [vmem:[#allocation3 + $0x850] sm:$0xff] }
 0x480   :  { %2240 = vmatpush1.bf16.msra.mxu1 %v1964_v16  ;;  %2363 = vmatpush1.bf16.msra.mxu0 %v1966_v39  ;;  %v2054_v16 = vld [vmem:[#allocation3 + $0x810] sm:$0xff]  ;;  %v2061_v39 = vld [vmem:[#allocation3 + $0x848] sm:$0xff] }
 0x481   :  { %2241 = vmatprep.subr.bf16.mxu1 %v1973_v44  ;;  %2364 = vmatprep.subr.bf16.mxu0 %v1975_v48  ;;  %v2063_v44 = vld [vmem:[#allocation3 + $0x858] sm:$0xff]  ;;  %v3886_v48 = vpack.c.bf16 %v1791_v51, %v1791_v51  ;;  %v2070_v51 = vld [vmem:[#allocation3 + $0x890] sm:$0xff] }
 0x484   :  { %2242 = vmatpush1.bf16.msra.mxu1 %v1972_v53  ;;  %2365 = vmatpush1.bf16.msra.mxu0 %v1974_v54  ;;  %v2069_v53 = vld [vmem:[#allocation3 + $0x888] sm:$0xff]  ;;  %v2071_v54 = vld [vmem:[#allocation3 + $0x898] sm:$0xff] }
 0x485   :  { %2243 = vmatprep.subr.bf16.mxu1 %v1981_v24  ;;  %2366 = vmatprep.subr.bf16.mxu0 %v1983_v55  ;;  %v2077_v24 = vld [vmem:[#allocation3 + $0x8c8] sm:$0xff]  ;;  %v2079_v55 = vld [vmem:[#allocation3 + $0x8d8] sm:$0xff] }
 0x488   :  { %2244 = vmatpush1.bf16.msra.mxu1 %v1980_v56  ;;  %2367 = vmatpush1.bf16.msra.mxu0 %v1982_v57  ;;  %v2076_v56 = vld [vmem:[#allocation3 + $0x8c0] sm:$0xff]  ;;  %v2078_v57 = vld [vmem:[#allocation3 + $0x8d0] sm:$0xff] }
 0x489   :  { %2245 = vmatprep.subr.bf16.mxu1 %v1989_v34  ;;  %2368 = vmatprep.subr.bf16.mxu0 %v1991_v58  ;;  %v2085_v34 = vld [vmem:[#allocation3 + $0x908] sm:$0xff]  ;;  %v2087_v58 = vld [vmem:[#allocation3 + $0x918] sm:$0xff] }
 0x48c   :  { %2246 = vmatpush1.bf16.msra.mxu1 %v1988_v0  ;;  %2369 = vmatpush1.bf16.msra.mxu0 %v1990_v43  ;;  %v2084_v0 = vld [vmem:[#allocation3 + $0x900] sm:$0xff]  ;;  %v2086_v43 = vld [vmem:[#allocation3 + $0x910] sm:$0xff] }
 0x48d   :  { %2247 = vmatprep.subr.bf16.mxu1 %v1997_v59  ;;  %2370 = vmatprep.subr.bf16.mxu0 %v1999_v60  ;;  %v2093_v59 = vld [vmem:[#allocation3 + $0x948] sm:$0xff]  ;;  %v2095_v60 = vld [vmem:[#allocation3 + $0x958] sm:$0xff] }
 0x490   :  { %2248 = vmatpush1.bf16.msra.mxu1 %v1996_v61  ;;  %2371 = vmatpush1.bf16.msra.mxu0 %v1998_v62  ;;  %v2092_v61 = vld [vmem:[#allocation3 + $0x940] sm:$0xff]  ;;  %v2094_v62 = vld [vmem:[#allocation3 + $0x950] sm:$0xff] }
 0x491   :  { %2249 = vmatprep.subr.bf16.mxu1 %v2005_v2  ;;  %2372 = vmatprep.subr.bf16.mxu0 %v2007_v3  ;;  %v2101_v2 = vld [vmem:[#allocation3 + $0x988] sm:$0xff]  ;;  %v2103_v3 = vld [vmem:[#allocation3 + $0x998] sm:$0xff] }
 0x494   :  { %2250 = vmatpush1.bf16.msra.mxu1 %v2004_v6  ;;  %2373 = vmatpush1.bf16.msra.mxu0 %v2006_v7  ;;  %v2100_v6 = vld [vmem:[#allocation3 + $0x980] sm:$0xff]  ;;  %v2102_v7 = vld [vmem:[#allocation3 + $0x990] sm:$0xff] }
 0x495   :  { %2251 = vmatprep.subr.bf16.mxu1 %v2013_v12  ;;  %2374 = vmatprep.subr.bf16.mxu0 %v2015_v4  ;;  %v2109_v12 = vld [vmem:[#allocation3 + $0x9c8] sm:$0xff]  ;;  %v2111_v4 = vld [vmem:[#allocation3 + $0x9d8] sm:$0xff] }
 0x498   :  { %2252 = vmatpush1.bf16.msra.mxu1 %v2012_v13  ;;  %2375 = vmatpush1.bf16.msra.mxu0 %v2014_v20  ;;  %v2108_v13 = vld [vmem:[#allocation3 + $0x9c0] sm:$0xff]  ;;  %v2110_v20 = vld [vmem:[#allocation3 + $0x9d0] sm:$0xff] }
 0x499   :  { %2253 = vmatprep.subr.bf16.mxu1 %v2021_v50  ;;  %2376 = vmatprep.subr.bf16.mxu0 %v2023_v21  ;;  %v2117_v50 = vld [vmem:[#allocation3 + $0xa08] sm:$0xff]  ;;  %v2119_v21 = vld [vmem:[#allocation3 + $0xa18] sm:$0xff] }
 0x49c   :  { %2254 = vmatpush1.bf16.msra.mxu1 %v2020_v23  ;;  %2377 = vmatpush1.bf16.msra.mxu0 %v2022_v22  ;;  %v2116_v23 = vld [vmem:[#allocation3 + $0xa00] sm:$0xff]  ;;  %v2118_v22 = vld [vmem:[#allocation3 + $0xa10] sm:$0xff] }
 0x49d   :  { %2255 = vmatprep.subr.bf16.mxu1 %v2029_v33  ;;  %2378 = vmatprep.subr.bf16.mxu0 %v2031_v36  ;;  %v2125_v33 = vld [vmem:[#allocation3 + $0xa48] sm:$0xff]  ;;  %v2127_v36 = vld [vmem:[#allocation3 + $0xa58] sm:$0xff] }
 0x4a0   :  { %2256 = vmatpush1.bf16.msra.mxu1 %v2028_v26  ;;  %2379 = vmatpush1.bf16.msra.mxu0 %v2030_v27  ;;  %v2124_v26 = vld [vmem:[#allocation3 + $0xa40] sm:$0xff]  ;;  %v2126_v27 = vld [vmem:[#allocation3 + $0xa50] sm:$0xff] }
 0x4a1   :  { %2257 = vmatprep.subr.bf16.mxu1 %v2037_v35  ;;  %2380 = vmatprep.subr.bf16.mxu0 %v2039_v47  ;;  %v2133_v35 = vld [vmem:[#allocation3 + $0xa88] sm:$0xff]  ;;  %v2135_v47 = vld [vmem:[#allocation3 + $0xa98] sm:$0xff] }
 0x4a4   :  { %2258 = vmatpush1.bf16.msra.mxu1 %v2036_v28  ;;  %2381 = vmatpush1.bf16.msra.mxu0 %v2038_v45  ;;  %v2132_v28 = vld [vmem:[#allocation3 + $0xa80] sm:$0xff]  ;;  %v2134_v45 = vld [vmem:[#allocation3 + $0xa90] sm:$0xff] }
 0x4a5   :  { %2259 = vmatprep.subr.bf16.mxu1 %v2045_v49  ;;  %2382 = vmatprep.subr.bf16.mxu0 %v2047_v29  ;;  %v2141_v49 = vld [vmem:[#allocation3 + $0xac8] sm:$0xff]  ;;  %v2143_v29 = vld [vmem:[#allocation3 + $0xad8] sm:$0xff] }
 0x4a8   :  { %2260 = vmatpush1.bf16.msra.mxu1 %v2044_v30  ;;  %2383 = vmatpush1.bf16.msra.mxu0 %v2046_v31  ;;  %v2140_v30 = vld [vmem:[#allocation3 + $0xac0] sm:$0xff]  ;;  %v2142_v31 = vld [vmem:[#allocation3 + $0xad0] sm:$0xff] }
 0x4a9   :  { %2270 = vmatprep.subr.bf16.mxu1 %v2053_v32  ;;  %2393 = vmatprep.subr.bf16.mxu0 %v2055_v37  ;;  %v2149_v32 = vld [vmem:[#allocation3 + $0xb08] sm:$0xff]  ;;  %v2151_v37 = vld [vmem:[#allocation3 + $0xb18] sm:$0xff] }
 0x4ab   :  { %2262 = vmatmul.mubr.bf16.vlgmr.msra.gmra.mrb[12].mxu1 %v3881_v42  ;;  %2385 = vmatmul.mubr.bf16.vlgmr.msra.gmra.mrb[12].mxu0 %v3881_v42 }
 0x4ac   :  { %2271 = vmatpush1.bf16.msra.mxu1 %v2052_v38  ;;  %2394 = vmatpush1.bf16.msra.mxu0 %v2054_v16  ;;  %v2148_v38 = vld [vmem:[#allocation3 + $0xb00] sm:$0xff]  ;;  %v2150_v16 = vld [vmem:[#allocation3 + $0xb10] sm:$0xff] }
 0x4ad   :  { %2272 = vmatprep.subr.bf16.mxu1 %v2061_v39  ;;  %2395 = vmatprep.subr.bf16.mxu0 %v2063_v44  ;;  %v2157_v39 = vld [vmem:[#allocation3 + $0xb48] sm:$0xff]  ;;  %v2159_v44 = vld [vmem:[#allocation3 + $0xb58] sm:$0xff] }
 0x4ae   :  { %2302 = vmatprep.mubr.bf16.mxu1 %v3886_v48  ;;  %2425 = vmatprep.mubr.bf16.mxu0 %v3886_v48 }
 0x4b0   :  { %2273 = vmatpush1.bf16.msra.mxu1 %v2060_v63  ;;  %2396 = vmatpush1.bf16.msra.mxu0 %v2062_v14  ;;  %v2156_v63 = vld [vmem:[#allocation3 + $0xb40] sm:$0xff]  ;;  %v2158_v14 = vld [vmem:[#allocation3 + $0xb50] sm:$0xff] }
 0x4b1   :  { %2274 = vmatprep.subr.bf16.mxu1 %v2069_v53  ;;  %2397 = vmatprep.subr.bf16.mxu0 %v2071_v54  ;;  %v2165_v53 = vld [vmem:[#allocation3 + $0xb88] sm:$0xff]  ;;  %v2167_v54 = vld [vmem:[#allocation3 + $0xb98] sm:$0xff] }
 0x4b4   :  { %2275 = vmatpush1.bf16.msra.mxu1 %v2068_v40  ;;  %2398 = vmatpush1.bf16.msra.mxu0 %v2070_v51  ;;  %v2164_v40 = vld [vmem:[#allocation3 + $0xb80] sm:$0xff]  ;;  %v2166_v51 = vld [vmem:[#allocation3 + $0xb90] sm:$0xff] }
 0x4b5   :  { %2276 = vmatprep.subr.bf16.mxu1 %v2077_v24  ;;  %2399 = vmatprep.subr.bf16.mxu0 %v2079_v55  ;;  %v2173_v24 = vld [vmem:[#allocation3 + $0xbc8] sm:$0xff]  ;;  %v2175_v55 = vld [vmem:[#allocation3 + $0xbd8] sm:$0xff] }
 0x4b8   :  { %2277 = vmatpush1.bf16.msra.mxu1 %v2076_v56  ;;  %2400 = vmatpush1.bf16.msra.mxu0 %v2078_v57  ;;  %v2172_v56 = vld [vmem:[#allocation3 + $0xbc0] sm:$0xff]  ;;  %v2174_v57 = vld [vmem:[#allocation3 + $0xbd0] sm:$0xff] }
 0x4b9   :  { %2278 = vmatprep.subr.bf16.mxu1 %v2085_v34  ;;  %2401 = vmatprep.subr.bf16.mxu0 %v2087_v58  ;;  %v1801_v34 = vld [vmem:[#allocation3 + $0x28] sm:$0xff]  ;;  %v1803_v58 = vld [vmem:[#allocation3 + $0x38] sm:$0xff] }
 0x4bc   :  { %2279 = vmatpush1.bf16.msra.mxu1 %v2084_v0  ;;  %2402 = vmatpush1.bf16.msra.mxu0 %v2086_v43  ;;  %v3895_v0 = vpack.c.bf16 %v1790_v41, %v1790_v41  ;;  %v1800_v43 = vld [vmem:[#allocation3 + $0x20] sm:$0xff]  ;;  %v1817_v41 = vld [vmem:[#allocation3 + $0xa8] sm:$0xff] }
 0x4bd   :  { %2280 = vmatprep.subr.bf16.mxu1 %v2093_v59  ;;  %2403 = vmatprep.subr.bf16.mxu0 %v2095_v60  ;;  %v1802_v59 = vld [vmem:[#allocation3 + $0x30] sm:$0xff]  ;;  %v1809_v60 = vld [vmem:[#allocation3 + $0x68] sm:$0xff] }
 0x4c0   :  { %2281 = vmatpush1.bf16.msra.mxu1 %v2092_v61  ;;  %2404 = vmatpush1.bf16.msra.mxu0 %v2094_v62  ;;  %v1811_v61 = vld [vmem:[#allocation3 + $0x78] sm:$0xff]  ;;  %v1810_v62 = vld [vmem:[#allocation3 + $0x70] sm:$0xff] }
 0x4c1   :  { %2282 = vmatprep.subr.bf16.mxu1 %v2101_v2  ;;  %2405 = vmatprep.subr.bf16.mxu0 %v2103_v3  ;;  %v1819_v2 = vld [vmem:[#allocation3 + $0xb8] sm:$0xff]  ;;  %v1816_v3 = vld [vmem:[#allocation3 + $0xa0] sm:$0xff] }
 0x4c4   :  { %2283 = vmatpush1.bf16.msra.mxu1 %v2100_v6  ;;  %2406 = vmatpush1.bf16.msra.mxu0 %v2102_v7  ;;  %v1818_v6 = vld [vmem:[#allocation3 + $0xb0] sm:$0xff]  ;;  %v1825_v7 = vld [vmem:[#allocation3 + $0xe8] sm:$0xff] }
 0x4c5   :  { %2284 = vmatprep.subr.bf16.mxu1 %v2109_v12  ;;  %2407 = vmatprep.subr.bf16.mxu0 %v2111_v4  ;;  %v1827_v12 = vld [vmem:[#allocation3 + $0xf8] sm:$0xff]  ;;  %v1824_v4 = vld [vmem:[#allocation3 + $0xe0] sm:$0xff] }
 0x4c8   :  { %2285 = vmatpush1.bf16.msra.mxu1 %v2108_v13  ;;  %2408 = vmatpush1.bf16.msra.mxu0 %v2110_v20  ;;  %v1826_v13 = vld [vmem:[#allocation3 + $0xf0] sm:$0xff]  ;;  %v1833_v20 = vld [vmem:[#allocation3 + $0x128] sm:$0xff] }
 0x4c9   :  { %2286 = vmatprep.subr.bf16.mxu1 %v2117_v50  ;;  %2409 = vmatprep.subr.bf16.mxu0 %v2119_v21  ;;  %v1835_v50 = vld [vmem:[#allocation3 + $0x138] sm:$0xff]  ;;  %v1834_v21 = vld [vmem:[#allocation3 + $0x130] sm:$0xff] }
 0x4cc   :  { %2287 = vmatpush1.bf16.msra.mxu1 %v2116_v23  ;;  %2410 = vmatpush1.bf16.msra.mxu0 %v2118_v22  ;;  %v1841_v23 = vld [vmem:[#allocation3 + $0x168] sm:$0xff]  ;;  %v1843_v22 = vld [vmem:[#allocation3 + $0x178] sm:$0xff] }
 0x4cd   :  { %2288 = vmatprep.subr.bf16.mxu1 %v2125_v33  ;;  %2411 = vmatprep.subr.bf16.mxu0 %v2127_v36  ;;  %v1840_v33 = vld [vmem:[#allocation3 + $0x160] sm:$0xff]  ;;  %v1842_v36 = vld [vmem:[#allocation3 + $0x170] sm:$0xff] }
 0x4d0   :  { %2289 = vmatpush1.bf16.msra.mxu1 %v2124_v26  ;;  %2412 = vmatpush1.bf16.msra.mxu0 %v2126_v27  ;;  %v1849_v26 = vld [vmem:[#allocation3 + $0x1a8] sm:$0xff]  ;;  %v1851_v27 = vld [vmem:[#allocation3 + $0x1b8] sm:$0xff] }
 0x4d1   :  { %2290 = vmatprep.subr.bf16.mxu1 %v2133_v35  ;;  %2413 = vmatprep.subr.bf16.mxu0 %v2135_v47  ;;  %v1848_v35 = vld [vmem:[#allocation3 + $0x1a0] sm:$0xff]  ;;  %v1850_v47 = vld [vmem:[#allocation3 + $0x1b0] sm:$0xff] }
 0x4d4   :  { %2291 = vmatpush1.bf16.msra.mxu1 %v2132_v28  ;;  %2414 = vmatpush1.bf16.msra.mxu0 %v2134_v45  ;;  %v1857_v28 = vld [vmem:[#allocation3 + $0x1e8] sm:$0xff]  ;;  %v1859_v45 = vld [vmem:[#allocation3 + $0x1f8] sm:$0xff] }
 0x4d5   :  { %2292 = vmatprep.subr.bf16.mxu1 %v2141_v49  ;;  %2415 = vmatprep.subr.bf16.mxu0 %v2143_v29  ;;  %v1856_v49 = vld [vmem:[#allocation3 + $0x1e0] sm:$0xff]  ;;  %v1858_v29 = vld [vmem:[#allocation3 + $0x1f0] sm:$0xff] }
 0x4d8   :  { %2293 = vmatpush1.bf16.msra.mxu1 %v2140_v30  ;;  %2416 = vmatpush1.bf16.msra.mxu0 %v2142_v31  ;;  %v1865_v30 = vld [vmem:[#allocation3 + $0x228] sm:$0xff]  ;;  %v1867_v31 = vld [vmem:[#allocation3 + $0x238] sm:$0xff] }
 0x4d9   :  { %2294 = vmatprep.subr.bf16.mxu1 %v2149_v32  ;;  %2417 = vmatprep.subr.bf16.mxu0 %v2151_v37  ;;  %v1864_v32 = vld [vmem:[#allocation3 + $0x220] sm:$0xff]  ;;  %v1866_v37 = vld [vmem:[#allocation3 + $0x230] sm:$0xff] }
 0x4dc   :  { %2295 = vmatpush1.bf16.msra.mxu1 %v2148_v38  ;;  %2418 = vmatpush1.bf16.msra.mxu0 %v2150_v16  ;;  %v1873_v38 = vld [vmem:[#allocation3 + $0x268] sm:$0xff]  ;;  %v1875_v16 = vld [vmem:[#allocation3 + $0x278] sm:$0xff] }
 0x4dd   :  { %2296 = vmatprep.subr.bf16.mxu1 %v2157_v39  ;;  %2419 = vmatprep.subr.bf16.mxu0 %v2159_v44  ;;  %v1872_v39 = vld [vmem:[#allocation3 + $0x260] sm:$0xff]  ;;  %v1874_v44 = vld [vmem:[#allocation3 + $0x270] sm:$0xff] }
 0x4e0   :  { %2297 = vmatpush1.bf16.msra.mxu1 %v2156_v63  ;;  %2420 = vmatpush1.bf16.msra.mxu0 %v2158_v14  ;;  %v1881_v63 = vld [vmem:[#allocation3 + $0x2a8] sm:$0xff]  ;;  %v1883_v14 = vld [vmem:[#allocation3 + $0x2b8] sm:$0xff] }
 0x4e1   :  { %2298 = vmatprep.subr.bf16.mxu1 %v2165_v53  ;;  %2421 = vmatprep.subr.bf16.mxu0 %v2167_v54  ;;  %v1880_v53 = vld [vmem:[#allocation3 + $0x2a0] sm:$0xff]  ;;  %v1882_v54 = vld [vmem:[#allocation3 + $0x2b0] sm:$0xff] }
 0x4e4   :  { %2299 = vmatpush1.bf16.msra.mxu1 %v2164_v40  ;;  %2422 = vmatpush1.bf16.msra.mxu0 %v2166_v51  ;;  %v1889_v40 = vld [vmem:[#allocation3 + $0x2e8] sm:$0xff]  ;;  %v1891_v51 = vld [vmem:[#allocation3 + $0x2f8] sm:$0xff] }
 0x4e5   :  { %2300 = vmatprep.subr.bf16.mxu1 %v2173_v24  ;;  %2423 = vmatprep.subr.bf16.mxu0 %v2175_v55  ;;  %v1888_v24 = vld [vmem:[#allocation3 + $0x2e0] sm:$0xff]  ;;  %v1890_v55 = vld [vmem:[#allocation3 + $0x2f0] sm:$0xff] }
 0x4e8   :  { %2301 = vmatpush1.bf16.msra.mxu1 %v2172_v56  ;;  %2424 = vmatpush1.bf16.msra.mxu0 %v2174_v57  ;;  %v1897_v56 = vld [vmem:[#allocation3 + $0x328] sm:$0xff]  ;;  %v1899_v57 = vld [vmem:[#allocation3 + $0x338] sm:$0xff] }
 0x4e9   :  { %2434 = vmatprep.subr.bf16.mxu1 %v1801_v34  ;;  %2557 = vmatprep.subr.bf16.mxu0 %v1803_v58  ;;  %v1896_v34 = vld [vmem:[#allocation3 + $0x320] sm:$0xff]  ;;  %v1898_v58 = vld [vmem:[#allocation3 + $0x330] sm:$0xff] }
 0x4eb   :  { %2303 = vmatmul.mubr.bf16.vlgmr.msra.gmra.mrb[12].mxu1 %v3895_v0  ;;  %2426 = vmatmul.mubr.bf16.vlgmr.msra.gmra.mrb[12].mxu0 %v3895_v0 }
 0x4ec   :  { %2435 = vmatpush1.bf16.msra.mxu1 %v1800_v43  ;;  %2558 = vmatpush1.bf16.msra.mxu0 %v1802_v59  ;;  %v1905_v43 = vld [vmem:[#allocation3 + $0x368] sm:$0xff]  ;;  %v1907_v59 = vld [vmem:[#allocation3 + $0x378] sm:$0xff] }
 0x4ed   :  { %2436 = vmatprep.subr.bf16.mxu1 %v1809_v60  ;;  %2559 = vmatprep.subr.bf16.mxu0 %v1811_v61  ;;  %v1904_v60 = vld [vmem:[#allocation3 + $0x360] sm:$0xff]  ;;  %v1906_v61 = vld [vmem:[#allocation3 + $0x370] sm:$0xff] }
 0x4ee   :  { %2466 = vmatprep.mubr.bf16.mxu1 %v3860_v52  ;;  %2589 = vmatprep.mubr.bf16.mxu0 %v3860_v52  ;;  %v1832_v52 = vld [vmem:[#allocation3 + $0x120] sm:$0xff] }
 0x4f0   :  { %2437 = vmatpush1.bf16.msra.mxu1 %v1808_v1  ;;  %2560 = vmatpush1.bf16.msra.mxu0 %v1810_v62  ;;  %v1913_v1 = vld [vmem:[#allocation3 + $0x3a8] sm:$0xff]  ;;  %v1915_v62 = vld [vmem:[#allocation3 + $0x3b8] sm:$0xff] }
 0x4f1   :  { %2438 = vmatprep.subr.bf16.mxu1 %v1817_v41  ;;  %2561 = vmatprep.subr.bf16.mxu0 %v1819_v2  ;;  %v1912_v41 = vld [vmem:[#allocation3 + $0x3a0] sm:$0xff]  ;;  %v1914_v2 = vld [vmem:[#allocation3 + $0x3b0] sm:$0xff] }
 0x4f4   :  { %2439 = vmatpush1.bf16.msra.mxu1 %v1816_v3  ;;  %2562 = vmatpush1.bf16.msra.mxu0 %v1818_v6  ;;  %v1921_v3 = vld [vmem:[#allocation3 + $0x3e8] sm:$0xff]  ;;  %v1923_v6 = vld [vmem:[#allocation3 + $0x3f8] sm:$0xff] }
 0x4f5   :  { %2440 = vmatprep.subr.bf16.mxu1 %v1825_v7  ;;  %2563 = vmatprep.subr.bf16.mxu0 %v1827_v12  ;;  %v1920_v7 = vld [vmem:[#allocation3 + $0x3e0] sm:$0xff]  ;;  %v1922_v12 = vld [vmem:[#allocation3 + $0x3f0] sm:$0xff] }
 0x4f8   :  { %2441 = vmatpush1.bf16.msra.mxu1 %v1824_v4  ;;  %2564 = vmatpush1.bf16.msra.mxu0 %v1826_v13  ;;  %v1929_v4 = vld [vmem:[#allocation3 + $0x428] sm:$0xff]  ;;  %v1931_v13 = vld [vmem:[#allocation3 + $0x438] sm:$0xff] }
 0x4f9   :  { %2442 = vmatprep.subr.bf16.mxu1 %v1833_v20  ;;  %2565 = vmatprep.subr.bf16.mxu0 %v1835_v50  ;;  %v1928_v20 = vld [vmem:[#allocation3 + $0x420] sm:$0xff]  ;;  %v1930_v50 = vld [vmem:[#allocation3 + $0x430] sm:$0xff] }
 0x4fc   :  { %2443 = vmatpush1.bf16.msra.mxu1 %v1832_v52  ;;  %2566 = vmatpush1.bf16.msra.mxu0 %v1834_v21  ;;  %v1937_v52 = vld [vmem:[#allocation3 + $0x468] sm:$0xff]  ;;  %v1939_v21 = vld [vmem:[#allocation3 + $0x478] sm:$0xff] }
 0x4fd   :  { %2444 = vmatprep.subr.bf16.mxu1 %v1841_v23  ;;  %2567 = vmatprep.subr.bf16.mxu0 %v1843_v22  ;;  %v1936_v23 = vld [vmem:[#allocation3 + $0x460] sm:$0xff]  ;;  %v1938_v22 = vld [vmem:[#allocation3 + $0x470] sm:$0xff] }
 0x500   :  { %2445 = vmatpush1.bf16.msra.mxu1 %v1840_v33  ;;  %2568 = vmatpush1.bf16.msra.mxu0 %v1842_v36  ;;  %v1945_v33 = vld [vmem:[#allocation3 + $0x4a8] sm:$0xff]  ;;  %v1947_v36 = vld [vmem:[#allocation3 + $0x4b8] sm:$0xff] }
 0x501   :  { %2446 = vmatprep.subr.bf16.mxu1 %v1849_v26  ;;  %2569 = vmatprep.subr.bf16.mxu0 %v1851_v27  ;;  %v1944_v26 = vld [vmem:[#allocation3 + $0x4a0] sm:$0xff]  ;;  %v1946_v27 = vld [vmem:[#allocation3 + $0x4b0] sm:$0xff] }
 0x504   :  { %2447 = vmatpush1.bf16.msra.mxu1 %v1848_v35  ;;  %2570 = vmatpush1.bf16.msra.mxu0 %v1850_v47  ;;  %v1953_v35 = vld [vmem:[#allocation3 + $0x4e8] sm:$0xff]  ;;  %v1952_v47 = vld [vmem:[#allocation3 + $0x4e0] sm:$0xff] }
 0x505   :  { %2448 = vmatprep.subr.bf16.mxu1 %v1857_v28  ;;  %2571 = vmatprep.subr.bf16.mxu0 %v1859_v45  ;;  %v1954_v28 = vld [vmem:[#allocation3 + $0x4f0] sm:$0xff]  ;;  %v1961_v45 = vld [vmem:[#allocation3 + $0x528] sm:$0xff] }
 0x508   :  { %2449 = vmatpush1.bf16.msra.mxu1 %v1856_v49  ;;  %2572 = vmatpush1.bf16.msra.mxu0 %v1858_v29  ;;  %v1963_v49 = vld [vmem:[#allocation3 + $0x538] sm:$0xff]  ;;  %v1962_v29 = vld [vmem:[#allocation3 + $0x530] sm:$0xff] }
 0x509   :  { %2450 = vmatprep.subr.bf16.mxu1 %v1865_v30  ;;  %2573 = vmatprep.subr.bf16.mxu0 %v1867_v31  ;;  %v1969_v30 = vld [vmem:[#allocation3 + $0x568] sm:$0xff]  ;;  %v1971_v31 = vld [vmem:[#allocation3 + $0x578] sm:$0xff] }
 0x50c   :  { %2451 = vmatpush1.bf16.msra.mxu1 %v1864_v32  ;;  %2574 = vmatpush1.bf16.msra.mxu0 %v1866_v37  ;;  %v1968_v32 = vld [vmem:[#allocation3 + $0x560] sm:$0xff]  ;;  %v1970_v37 = vld [vmem:[#allocation3 + $0x570] sm:$0xff] }
 0x50d   :  { %2452 = vmatprep.subr.bf16.mxu1 %v1873_v38  ;;  %2575 = vmatprep.subr.bf16.mxu0 %v1875_v16  ;;  %v1977_v38 = vld [vmem:[#allocation3 + $0x5a8] sm:$0xff]  ;;  %v1979_v16 = vld [vmem:[#allocation3 + $0x5b8] sm:$0xff] }
 0x510   :  { %2453 = vmatpush1.bf16.msra.mxu1 %v1872_v39  ;;  %2576 = vmatpush1.bf16.msra.mxu0 %v1874_v44  ;;  %v1976_v39 = vld [vmem:[#allocation3 + $0x5a0] sm:$0xff]  ;;  %v1978_v44 = vld [vmem:[#allocation3 + $0x5b0] sm:$0xff] }
 0x511   :  { %2454 = vmatprep.subr.bf16.mxu1 %v1881_v63  ;;  %2577 = vmatprep.subr.bf16.mxu0 %v1883_v14  ;;  %v1985_v63 = vld [vmem:[#allocation3 + $0x5e8] sm:$0xff]  ;;  %v1987_v14 = vld [vmem:[#allocation3 + $0x5f8] sm:$0xff] }
 0x514   :  { %2455 = vmatpush1.bf16.msra.mxu1 %v1880_v53  ;;  %2578 = vmatpush1.bf16.msra.mxu0 %v1882_v54  ;;  %v1984_v53 = vld [vmem:[#allocation3 + $0x5e0] sm:$0xff]  ;;  %v1986_v54 = vld [vmem:[#allocation3 + $0x5f0] sm:$0xff] }
 0x515   :  { %2456 = vmatprep.subr.bf16.mxu1 %v1889_v40  ;;  %2579 = vmatprep.subr.bf16.mxu0 %v1891_v51  ;;  %v1993_v40 = vld [vmem:[#allocation3 + $0x628] sm:$0xff]  ;;  %v1995_v51 = vld [vmem:[#allocation3 + $0x638] sm:$0xff] }
 0x518   :  { %2457 = vmatpush1.bf16.msra.mxu1 %v1888_v24  ;;  %2580 = vmatpush1.bf16.msra.mxu0 %v1890_v55  ;;  %v1992_v24 = vld [vmem:[#allocation3 + $0x620] sm:$0xff]  ;;  %v1994_v55 = vld [vmem:[#allocation3 + $0x630] sm:$0xff] }
 0x519   :  { %2458 = vmatprep.subr.bf16.mxu1 %v1897_v56  ;;  %2581 = vmatprep.subr.bf16.mxu0 %v1899_v57  ;;  %v2001_v56 = vld [vmem:[#allocation3 + $0x668] sm:$0xff]  ;;  %v2003_v57 = vld [vmem:[#allocation3 + $0x678] sm:$0xff] }
 0x51c   :  { %2459 = vmatpush1.bf16.msra.mxu1 %v1896_v34  ;;  %2582 = vmatpush1.bf16.msra.mxu0 %v1898_v58  ;;  %v2000_v34 = vld [vmem:[#allocation3 + $0x660] sm:$0xff]  ;;  %v2002_v58 = vld [vmem:[#allocation3 + $0x670] sm:$0xff] }
 0x51d   :  { %2460 = vmatprep.subr.bf16.mxu1 %v1905_v43  ;;  %2583 = vmatprep.subr.bf16.mxu0 %v1907_v59  ;;  %v2009_v43 = vld [vmem:[#allocation3 + $0x6a8] sm:$0xff]  ;;  %v2011_v59 = vld [vmem:[#allocation3 + $0x6b8] sm:$0xff] }
 0x520   :  { %2461 = vmatpush1.bf16.msra.mxu1 %v1904_v60  ;;  %2584 = vmatpush1.bf16.msra.mxu0 %v1906_v61  ;;  %v2008_v60 = vld [vmem:[#allocation3 + $0x6a0] sm:$0xff]  ;;  %v2010_v61 = vld [vmem:[#allocation3 + $0x6b0] sm:$0xff] }
 0x521   :  { %2462 = vmatprep.subr.bf16.mxu1 %v1913_v1  ;;  %2585 = vmatprep.subr.bf16.mxu0 %v1915_v62  ;;  %v2017_v1 = vld [vmem:[#allocation3 + $0x6e8] sm:$0xff]  ;;  %v2019_v62 = vld [vmem:[#allocation3 + $0x6f8] sm:$0xff] }
 0x524   :  { %2463 = vmatpush1.bf16.msra.mxu1 %v1912_v41  ;;  %2586 = vmatpush1.bf16.msra.mxu0 %v1914_v2  ;;  %v2016_v41 = vld [vmem:[#allocation3 + $0x6e0] sm:$0xff]  ;;  %v2018_v2 = vld [vmem:[#allocation3 + $0x6f0] sm:$0xff] }
 0x525   :  { %2464 = vmatprep.subr.bf16.mxu1 %v1921_v3  ;;  %2587 = vmatprep.subr.bf16.mxu0 %v1923_v6  ;;  %v2025_v3 = vld [vmem:[#allocation3 + $0x728] sm:$0xff]  ;;  %v2027_v6 = vld [vmem:[#allocation3 + $0x738] sm:$0xff] }
 0x528   :  { %2465 = vmatpush1.bf16.msra.mxu1 %v1920_v7  ;;  %2588 = vmatpush1.bf16.msra.mxu0 %v1922_v12  ;;  %v2024_v7 = vld [vmem:[#allocation3 + $0x720] sm:$0xff]  ;;  %v2026_v12 = vld [vmem:[#allocation3 + $0x730] sm:$0xff] }
 0x529   :  { %2475 = vmatprep.subr.bf16.mxu1 %v1929_v4  ;;  %2598 = vmatprep.subr.bf16.mxu0 %v1931_v13  ;;  %v2033_v4 = vld [vmem:[#allocation3 + $0x768] sm:$0xff]  ;;  %v2035_v13 = vld [vmem:[#allocation3 + $0x778] sm:$0xff] }
 0x52b   :  { %2467 = vmatmul.mubr.bf16.vlgmr.msra.gmra.mrb[16].mxu1 %v3867_v46  ;;  %2590 = vmatmul.mubr.bf16.vlgmr.msra.gmra.mrb[16].mxu0 %v3867_v46  ;;  %v1955_v46 = vld [vmem:[#allocation3 + $0x4f8] sm:$0xff] }
 0x52c   :  { %2476 = vmatpush1.bf16.msra.mxu1 %v1928_v20  ;;  %2599 = vmatpush1.bf16.msra.mxu0 %v1930_v50  ;;  %v2032_v20 = vld [vmem:[#allocation3 + $0x760] sm:$0xff]  ;;  %v2034_v50 = vld [vmem:[#allocation3 + $0x770] sm:$0xff] }
 0x52d   :  { %2477 = vmatprep.subr.bf16.mxu1 %v1937_v52  ;;  %2600 = vmatprep.subr.bf16.mxu0 %v1939_v21  ;;  %v2041_v52 = vld [vmem:[#allocation3 + $0x7a8] sm:$0xff]  ;;  %v2043_v21 = vld [vmem:[#allocation3 + $0x7b8] sm:$0xff] }
 0x52e   :  { %2507 = vmatprep.mubr.bf16.mxu1 %v3872_v25  ;;  %2630 = vmatprep.mubr.bf16.mxu0 %v3872_v25  ;;  %v1960_v25 = vld [vmem:[#allocation3 + $0x520] sm:$0xff] }
 0x530   :  { %2478 = vmatpush1.bf16.msra.mxu1 %v1936_v23  ;;  %2601 = vmatpush1.bf16.msra.mxu0 %v1938_v22  ;;  %v2040_v23 = vld [vmem:[#allocation3 + $0x7a0] sm:$0xff]  ;;  %v2042_v22 = vld [vmem:[#allocation3 + $0x7b0] sm:$0xff] }
 0x531   :  { %2479 = vmatprep.subr.bf16.mxu1 %v1945_v33  ;;  %2602 = vmatprep.subr.bf16.mxu0 %v1947_v36  ;;  %v2049_v33 = vld [vmem:[#allocation3 + $0x7e8] sm:$0xff]  ;;  %v2051_v36 = vld [vmem:[#allocation3 + $0x7f8] sm:$0xff] }
 0x534   :  { %2480 = vmatpush1.bf16.msra.mxu1 %v1944_v26  ;;  %2603 = vmatpush1.bf16.msra.mxu0 %v1946_v27  ;;  %v2048_v26 = vld [vmem:[#allocation3 + $0x7e0] sm:$0xff]  ;;  %v2050_v27 = vld [vmem:[#allocation3 + $0x7f0] sm:$0xff] }
 0x535   :  { %2481 = vmatprep.subr.bf16.mxu1 %v1953_v35  ;;  %2604 = vmatprep.subr.bf16.mxu0 %v1955_v46  ;;  %v2057_v35 = vld [vmem:[#allocation3 + $0x828] sm:$0xff]  ;;  %v2059_v46 = vld [vmem:[#allocation3 + $0x838] sm:$0xff] }
 0x538   :  { %2482 = vmatpush1.bf16.msra.mxu1 %v1952_v47  ;;  %2605 = vmatpush1.bf16.msra.mxu0 %v1954_v28  ;;  %v2056_v47 = vld [vmem:[#allocation3 + $0x820] sm:$0xff]  ;;  %v2058_v28 = vld [vmem:[#allocation3 + $0x830] sm:$0xff] }
 0x539   :  { %2483 = vmatprep.subr.bf16.mxu1 %v1961_v45  ;;  %2606 = vmatprep.subr.bf16.mxu0 %v1963_v49  ;;  %v2065_v45 = vld [vmem:[#allocation3 + $0x868] sm:$0xff]  ;;  %v2067_v49 = vld [vmem:[#allocation3 + $0x878] sm:$0xff] }
 0x53c   :  { %2484 = vmatpush1.bf16.msra.mxu1 %v1960_v25  ;;  %2607 = vmatpush1.bf16.msra.mxu0 %v1962_v29  ;;  %v2064_v25 = vld [vmem:[#allocation3 + $0x860] sm:$0xff]  ;;  %v2066_v29 = vld [vmem:[#allocation3 + $0x870] sm:$0xff] }
 0x53d   :  { %2485 = vmatprep.subr.bf16.mxu1 %v1969_v30  ;;  %2608 = vmatprep.subr.bf16.mxu0 %v1971_v31  ;;  %v2073_v30 = vld [vmem:[#allocation3 + $0x8a8] sm:$0xff]  ;;  %v2075_v31 = vld [vmem:[#allocation3 + $0x8b8] sm:$0xff] }
 0x540   :  { %2486 = vmatpush1.bf16.msra.mxu1 %v1968_v32  ;;  %2609 = vmatpush1.bf16.msra.mxu0 %v1970_v37  ;;  %v2072_v32 = vld [vmem:[#allocation3 + $0x8a0] sm:$0xff]  ;;  %v2074_v37 = vld [vmem:[#allocation3 + $0x8b0] sm:$0xff] }
 0x541   :  { %2487 = vmatprep.subr.bf16.mxu1 %v1977_v38  ;;  %2610 = vmatprep.subr.bf16.mxu0 %v1979_v16  ;;  %v2081_v38 = vld [vmem:[#allocation3 + $0x8e8] sm:$0xff]  ;;  %v2080_v16 = vld [vmem:[#allocation3 + $0x8e0] sm:$0xff] }
 0x544   :  { %2488 = vmatpush1.bf16.msra.mxu1 %v1976_v39  ;;  %2611 = vmatpush1.bf16.msra.mxu0 %v1978_v44  ;;  %v2082_v39 = vld [vmem:[#allocation3 + $0x8f0] sm:$0xff]  ;;  %v2089_v44 = vld [vmem:[#allocation3 + $0x928] sm:$0xff] }
 0x545   :  { %2489 = vmatprep.subr.bf16.mxu1 %v1985_v63  ;;  %2612 = vmatprep.subr.bf16.mxu0 %v1987_v14  ;;  %v2091_v63 = vld [vmem:[#allocation3 + $0x938] sm:$0xff]  ;;  %v2090_v14 = vld [vmem:[#allocation3 + $0x930] sm:$0xff] }
 0x548   :  { %2490 = vmatpush1.bf16.msra.mxu1 %v1984_v53  ;;  %2613 = vmatpush1.bf16.msra.mxu0 %v1986_v54  ;;  %v2097_v53 = vld [vmem:[#allocation3 + $0x968] sm:$0xff]  ;;  %v2099_v54 = vld [vmem:[#allocation3 + $0x978] sm:$0xff] }
 0x549   :  { %2491 = vmatprep.subr.bf16.mxu1 %v1993_v40  ;;  %2614 = vmatprep.subr.bf16.mxu0 %v1995_v51  ;;  %v2096_v40 = vld [vmem:[#allocation3 + $0x960] sm:$0xff]  ;;  %v2098_v51 = vld [vmem:[#allocation3 + $0x970] sm:$0xff] }
 0x54c   :  { %2492 = vmatpush1.bf16.msra.mxu1 %v1992_v24  ;;  %2615 = vmatpush1.bf16.msra.mxu0 %v1994_v55  ;;  %v2105_v24 = vld [vmem:[#allocation3 + $0x9a8] sm:$0xff]  ;;  %v2107_v55 = vld [vmem:[#allocation3 + $0x9b8] sm:$0xff] }
 0x54d   :  { %2493 = vmatprep.subr.bf16.mxu1 %v2001_v56  ;;  %2616 = vmatprep.subr.bf16.mxu0 %v2003_v57  ;;  %v2104_v56 = vld [vmem:[#allocation3 + $0x9a0] sm:$0xff]  ;;  %v2106_v57 = vld [vmem:[#allocation3 + $0x9b0] sm:$0xff] }
 0x550   :  { %2494 = vmatpush1.bf16.msra.mxu1 %v2000_v34  ;;  %2617 = vmatpush1.bf16.msra.mxu0 %v2002_v58  ;;  %v2113_v34 = vld [vmem:[#allocation3 + $0x9e8] sm:$0xff]  ;;  %v2115_v58 = vld [vmem:[#allocation3 + $0x9f8] sm:$0xff] }
 0x551   :  { %2495 = vmatprep.subr.bf16.mxu1 %v2009_v43  ;;  %2618 = vmatprep.subr.bf16.mxu0 %v2011_v59  ;;  %v2112_v43 = vld [vmem:[#allocation3 + $0x9e0] sm:$0xff]  ;;  %v2114_v59 = vld [vmem:[#allocation3 + $0x9f0] sm:$0xff] }
 0x554   :  { %2496 = vmatpush1.bf16.msra.mxu1 %v2008_v60  ;;  %2619 = vmatpush1.bf16.msra.mxu0 %v2010_v61  ;;  %v2121_v60 = vld [vmem:[#allocation3 + $0xa28] sm:$0xff]  ;;  %v2123_v61 = vld [vmem:[#allocation3 + $0xa38] sm:$0xff] }
 0x555   :  { %2497 = vmatprep.subr.bf16.mxu1 %v2017_v1  ;;  %2620 = vmatprep.subr.bf16.mxu0 %v2019_v62  ;;  %v2120_v1 = vld [vmem:[#allocation3 + $0xa20] sm:$0xff]  ;;  %v2122_v62 = vld [vmem:[#allocation3 + $0xa30] sm:$0xff] }
 0x558   :  { %2498 = vmatpush1.bf16.msra.mxu1 %v2016_v41  ;;  %2621 = vmatpush1.bf16.msra.mxu0 %v2018_v2  ;;  %v2129_v41 = vld [vmem:[#allocation3 + $0xa68] sm:$0xff]  ;;  %v2131_v2 = vld [vmem:[#allocation3 + $0xa78] sm:$0xff] }
 0x559   :  { %2499 = vmatprep.subr.bf16.mxu1 %v2025_v3  ;;  %2622 = vmatprep.subr.bf16.mxu0 %v2027_v6  ;;  %v2128_v3 = vld [vmem:[#allocation3 + $0xa60] sm:$0xff]  ;;  %v2130_v6 = vld [vmem:[#allocation3 + $0xa70] sm:$0xff] }
 0x55c   :  { %2500 = vmatpush1.bf16.msra.mxu1 %v2024_v7  ;;  %2623 = vmatpush1.bf16.msra.mxu0 %v2026_v12  ;;  %v2137_v7 = vld [vmem:[#allocation3 + $0xaa8] sm:$0xff]  ;;  %v2139_v12 = vld [vmem:[#allocation3 + $0xab8] sm:$0xff] }
 0x55d   :  { %2501 = vmatprep.subr.bf16.mxu1 %v2033_v4  ;;  %2624 = vmatprep.subr.bf16.mxu0 %v2035_v13  ;;  %v2136_v4 = vld [vmem:[#allocation3 + $0xaa0] sm:$0xff]  ;;  %v2138_v13 = vld [vmem:[#allocation3 + $0xab0] sm:$0xff] }
 0x560   :  { %2502 = vmatpush1.bf16.msra.mxu1 %v2032_v20  ;;  %2625 = vmatpush1.bf16.msra.mxu0 %v2034_v50  ;;  %v2145_v20 = vld [vmem:[#allocation3 + $0xae8] sm:$0xff]  ;;  %v2147_v50 = vld [vmem:[#allocation3 + $0xaf8] sm:$0xff] }
 0x561   :  { %2503 = vmatprep.subr.bf16.mxu1 %v2041_v52  ;;  %2626 = vmatprep.subr.bf16.mxu0 %v2043_v21  ;;  %v2144_v52 = vld [vmem:[#allocation3 + $0xae0] sm:$0xff]  ;;  %v2146_v21 = vld [vmem:[#allocation3 + $0xaf0] sm:$0xff] }
 0x564   :  { %2504 = vmatpush1.bf16.msra.mxu1 %v2040_v23  ;;  %2627 = vmatpush1.bf16.msra.mxu0 %v2042_v22  ;;  %v2153_v23 = vld [vmem:[#allocation3 + $0xb28] sm:$0xff]  ;;  %v2155_v22 = vld [vmem:[#allocation3 + $0xb38] sm:$0xff] }
 0x565   :  { %2505 = vmatprep.subr.bf16.mxu1 %v2049_v33  ;;  %2628 = vmatprep.subr.bf16.mxu0 %v2051_v36  ;;  %v2152_v33 = vld [vmem:[#allocation3 + $0xb20] sm:$0xff]  ;;  %v2154_v36 = vld [vmem:[#allocation3 + $0xb30] sm:$0xff] }
 0x568   :  { %2506 = vmatpush1.bf16.msra.mxu1 %v2048_v26  ;;  %2629 = vmatpush1.bf16.msra.mxu0 %v2050_v27  ;;  %v2161_v26 = vld [vmem:[#allocation3 + $0xb68] sm:$0xff]  ;;  %v2163_v27 = vld [vmem:[#allocation3 + $0xb78] sm:$0xff] }
 0x569   :  { %2516 = vmatprep.subr.bf16.mxu1 %v2057_v35  ;;  %2639 = vmatprep.subr.bf16.mxu0 %v2059_v46  ;;  %v2160_v35 = vld [vmem:[#allocation3 + $0xb60] sm:$0xff]  ;;  %v2162_v46 = vld [vmem:[#allocation3 + $0xb70] sm:$0xff] }
 0x56b   :  { %2508 = vmatmul.mubr.bf16.vlgmr.msra.gmra.mrb[16].mxu1 %v3881_v42  ;;  %2631 = vmatmul.mubr.bf16.vlgmr.msra.gmra.mrb[16].mxu0 %v3881_v42  ;;  %v2083_v42 = vld [vmem:[#allocation3 + $0x8f8] sm:$0xff] }
 0x56c   :  { %2517 = vmatpush1.bf16.msra.mxu1 %v2056_v47  ;;  %2640 = vmatpush1.bf16.msra.mxu0 %v2058_v28  ;;  %v2169_v47 = vld [vmem:[#allocation3 + $0xba8] sm:$0xff]  ;;  %v2171_v28 = vld [vmem:[#allocation3 + $0xbb8] sm:$0xff] }
 0x56d   :  { %2518 = vmatprep.subr.bf16.mxu1 %v2065_v45  ;;  %2641 = vmatprep.subr.bf16.mxu0 %v2067_v49  ;;  %v2168_v45 = vld [vmem:[#allocation3 + $0xba0] sm:$0xff]  ;;  %v2170_v49 = vld [vmem:[#allocation3 + $0xbb0] sm:$0xff] }
 0x56e   :  { %2548 = vmatprep.mubr.bf16.mxu1 %v3886_v48  ;;  %2671 = vmatprep.mubr.bf16.mxu0 %v3886_v48  ;;  %v2088_v48 = vld [vmem:[#allocation3 + $0x920] sm:$0xff] }
 0x570   :  { %2519 = vmatpush1.bf16.msra.mxu1 %v2064_v25  ;;  %2642 = vmatpush1.bf16.msra.mxu0 %v2066_v29  ;;  %v2177_v25 = vld [vmem:[#allocation3 + $0xbe8] sm:$0xff]  ;;  %v2179_v29 = vld [vmem:[#allocation3 + $0xbf8] sm:$0xff] }
 0x571   :  { %2520 = vmatprep.subr.bf16.mxu1 %v2073_v30  ;;  %2643 = vmatprep.subr.bf16.mxu0 %v2075_v31  ;;  %v2176_v30 = vld [vmem:[#allocation3 + $0xbe0] sm:$0xff]  ;;  %v2178_v31 = vld [vmem:[#allocation3 + $0xbf0] sm:$0xff] }
 0x574   :  { %2521 = vmatpush1.bf16.msra.mxu1 %v2072_v32  ;;  %2644 = vmatpush1.bf16.msra.mxu0 %v2074_v37 }
 0x575   :  { %2522 = vmatprep.subr.bf16.mxu1 %v2081_v38  ;;  %2645 = vmatprep.subr.bf16.mxu0 %v2083_v42 }
 0x578   :  { %2523 = vmatpush1.bf16.msra.mxu1 %v2080_v16  ;;  %2646 = vmatpush1.bf16.msra.mxu0 %v2082_v39 }
 0x579   :  { %2524 = vmatprep.subr.bf16.mxu1 %v2089_v44  ;;  %2647 = vmatprep.subr.bf16.mxu0 %v2091_v63 }
 0x57c   :  { %2525 = vmatpush1.bf16.msra.mxu1 %v2088_v48  ;;  %2648 = vmatpush1.bf16.msra.mxu0 %v2090_v14 }
 0x57d   :  { %2526 = vmatprep.subr.bf16.mxu1 %v2097_v53  ;;  %2649 = vmatprep.subr.bf16.mxu0 %v2099_v54 }
 0x580   :  { %2527 = vmatpush1.bf16.msra.mxu1 %v2096_v40  ;;  %2650 = vmatpush1.bf16.msra.mxu0 %v2098_v51 }
 0x581   :  { %2528 = vmatprep.subr.bf16.mxu1 %v2105_v24  ;;  %2651 = vmatprep.subr.bf16.mxu0 %v2107_v55 }
 0x584   :  { %2529 = vmatpush1.bf16.msra.mxu1 %v2104_v56  ;;  %2652 = vmatpush1.bf16.msra.mxu0 %v2106_v57 }
 0x585   :  { %2530 = vmatprep.subr.bf16.mxu1 %v2113_v34  ;;  %2653 = vmatprep.subr.bf16.mxu0 %v2115_v58 }
 0x588   :  { %2531 = vmatpush1.bf16.msra.mxu1 %v2112_v43  ;;  %2654 = vmatpush1.bf16.msra.mxu0 %v2114_v59 }
 0x589   :  { %2532 = vmatprep.subr.bf16.mxu1 %v2121_v60  ;;  %2655 = vmatprep.subr.bf16.mxu0 %v2123_v61 }
 0x58c   :  { %2533 = vmatpush1.bf16.msra.mxu1 %v2120_v1  ;;  %2656 = vmatpush1.bf16.msra.mxu0 %v2122_v62 }
 0x58d   :  { %2534 = vmatprep.subr.bf16.mxu1 %v2129_v41  ;;  %2657 = vmatprep.subr.bf16.mxu0 %v2131_v2 }
 0x590   :  { %2535 = vmatpush1.bf16.msra.mxu1 %v2128_v3  ;;  %2658 = vmatpush1.bf16.msra.mxu0 %v2130_v6 }
 0x591   :  { %2536 = vmatprep.subr.bf16.mxu1 %v2137_v7  ;;  %2659 = vmatprep.subr.bf16.mxu0 %v2139_v12 }
 0x594   :  { %2537 = vmatpush1.bf16.msra.mxu1 %v2136_v4  ;;  %2660 = vmatpush1.bf16.msra.mxu0 %v2138_v13 }
 0x595   :  { %2538 = vmatprep.subr.bf16.mxu1 %v2145_v20  ;;  %2661 = vmatprep.subr.bf16.mxu0 %v2147_v50 }
 0x598   :  { %2539 = vmatpush1.bf16.msra.mxu1 %v2144_v52  ;;  %2662 = vmatpush1.bf16.msra.mxu0 %v2146_v21 }
 0x599   :  { %2540 = vmatprep.subr.bf16.mxu1 %v2153_v23  ;;  %2663 = vmatprep.subr.bf16.mxu0 %v2155_v22 }
 0x59c   :  { %2541 = vmatpush1.bf16.msra.mxu1 %v2152_v33  ;;  %2664 = vmatpush1.bf16.msra.mxu0 %v2154_v36 }
 0x59d   :  { %2542 = vmatprep.subr.bf16.mxu1 %v2161_v26  ;;  %2665 = vmatprep.subr.bf16.mxu0 %v2163_v27 }
 0x5a0   :  { %2543 = vmatpush1.bf16.msra.mxu1 %v2160_v35  ;;  %2666 = vmatpush1.bf16.msra.mxu0 %v2162_v46 }
 0x5a1   :  { %2544 = vmatprep.subr.bf16.mxu1 %v2169_v47  ;;  %2667 = vmatprep.subr.bf16.mxu0 %v2171_v28 }
 0x5a4   :  { %2545 = vmatpush1.bf16.msra.mxu1 %v2168_v45  ;;  %2668 = vmatpush1.bf16.msra.mxu0 %v2170_v49 }
 0x5a5   :  { %2546 = vmatprep.subr.bf16.mxu1 %v2177_v25  ;;  %2669 = vmatprep.subr.bf16.mxu0 %v2179_v29 }
 0x5a8   :  { %2547 = vmatpush1.bf16.msra.mxu1 %v2176_v30  ;;  %2670 = vmatpush1.bf16.msra.mxu0 %v2178_v31 }
 0x5ab   :  { %2549 = vmatmul.mubr.bf16.vlgmr.msra.gmra.mrb[16].mxu1 %v3895_v0  ;;  %2672 = vmatmul.mubr.bf16.vlgmr.msra.gmra.mrb[16].mxu0 %v3895_v0 }
 0x5be   :  { %v2304_v32 = vpop.f32.mrb[12].mxu1  ;;  %v2427_v37 = vpop.f32.mrb[12].mxu0 }
 0x5bf   :  { %v2680_v38 = vrot.slane %v2304_v32, 4  ;;  %v2692_v42 = vrot.slane %v2427_v37, 4  ;;  %v2306_v16 = vpop.f32.mrb[13].mxu1  ;;  %v2429_v39 = vpop.f32.mrb[13].mxu0 }
 0x5c0   :  { %v2686_v44 = vrot.slane %v2306_v16, 4  ;;  %v2698_v63 = vrot.slane %v2429_v39, 4  ;;  %v2308_v48 = vpop.f32.mrb[14].mxu1  ;;  %v2431_v14 = vpop.f32.mrb[14].mxu0 }
 0x5c1   :  { %v2681_v53 = vadd.f32 %v2680_v38, %v2304_v32  ;;  %v2693_v54 = vadd.f32 %v2692_v42, %v2427_v37  ;;  %v2309_v40 = vpop.f32.mrb[15].mxu1  ;;  %v2432_v51 = vpop.f32.mrb[15].mxu0 }
 0x5c2   :  { %v2687_v24 = vadd.f32 %v2686_v44, %v2306_v16  ;;  %v2699_v55 = vadd.f32 %v2698_v63, %v2429_v39 }
 0x5c3   :  { %v2682_v56 = vrot.slane %v2681_v53, 2  ;;  %v2694_v57 = vrot.slane %v2693_v54, 2 }
 0x5c4   :  { %v2688_v34 = vrot.slane %v2687_v24, 2  ;;  %v2700_v0 = vrot.slane %v2699_v55, 2 }
 0x5c5   :  { %v2683_v58 = vadd.f32 %v2682_v56, %v2681_v53  ;;  %v2695_v43 = vadd.f32 %v2694_v57, %v2693_v54 }
 0x5c6   :  { %v2689_v59 = vadd.f32 %v2688_v34, %v2687_v24  ;;  %v2701_v60 = vadd.f32 %v2700_v0, %v2699_v55 }
 0x5c7   :  { %v2684_v61 = vrot.slane %v2683_v58, 1  ;;  %v2696_v1 = vrot.slane %v2695_v43, 1 }
 0x5c8   :  { %v2690_v62 = vrot.slane %v2689_v59, 1  ;;  %v2702_v41 = vrot.slane %v2701_v60, 1 }
 0x5c9   :  { %v2685_v2 = vadd.f32 %v2684_v61, %v2683_v58  ;;  %v2697_v3 = vadd.f32 %v2696_v1, %v2695_v43 }
 0x5ca   :  { %v2691_v6 = vadd.f32 %v2690_v62, %v2689_v59  ;;  %v2703_v7 = vadd.f32 %v2702_v41, %v2701_v60 }
 0x5cb   :  { %v2728_v12 = vmul.f32 0.125, %v2685_v2  ;;  %v2730_v4 = vmul.f32 0.125, %v2697_v3  ;;  %v2180_v3 = vld [vmem:[#allocation11] sm:$0xff] }
 0x5cc   :  { %v2729_v13 = vmul.f32 0.125, %v2691_v6  ;;  %v2731_v20 = vmul.f32 0.125, %v2703_v7  ;;  %v2957_v7 = vrot.slane %v2180_v3, %v3718_v8 }
 0x5cd   :  { %v3911_v50 = vsub.f32 %v2304_v32, %v2728_v12  ;;  %v3913_v52 = vsub.f32 %v2427_v37, %v2730_v4  ;;  %v2961_v12 = vrot.slane %v2180_v3, %v3720_v9  ;;  %v2965_v4 = vrot.slane %v2180_v3, %v3722_v10 }
 0x5ce   :  { %v3915_v21 = vsub.f32 %v2306_v16, %v2729_v13  ;;  %v3917_v23 = vsub.f32 %v2429_v39, %v2731_v20  ;;  %v2969_v13 = vrot.slane %v2180_v3, %v3724_v11 }
 0x5cf   :  { %v2744_v22 = vmul.f32 %v3911_v50, %v3911_v50  ;;  %v2746_v33 = vmul.f32 %v3913_v52, %v3913_v52 }
 0x5d0   :  { %v2745_v36 = vmul.f32 %v3915_v21, %v3915_v21  ;;  %v2747_v26 = vmul.f32 %v3917_v23, %v3917_v23 }
 0x5d1   :  { %v2752_v27 = vrot.slane %v2744_v22, 4  ;;  %v2764_v35 = vrot.slane %v2746_v33, 4 }
 0x5d2   :  { %v2758_v46 = vrot.slane %v2745_v36, 4  ;;  %v2770_v47 = vrot.slane %v2747_v26, 4 }
 0x5d3   :  { %v2753_v28 = vadd.f32 %v2752_v27, %v2744_v22  ;;  %v2765_v45 = vadd.f32 %v2764_v35, %v2746_v33  ;;  %v2997_v27 = vrot.slane %v2957_v7, %v3718_v8  ;;  %v3001_v35 = vrot.slane %v2961_v12, %v3718_v8 }
 0x5d4   :  { %v2759_v49 = vadd.f32 %v2758_v46, %v2745_v36  ;;  %v2771_v25 = vadd.f32 %v2770_v47, %v2747_v26  ;;  %v3005_v46 = vrot.slane %v2965_v4, %v3718_v8  ;;  %v3009_v47 = vrot.slane %v2969_v13, %v3718_v8 }
 0x5d5   :  { %v2754_v29 = vrot.slane %v2753_v28, 2  ;;  %v2766_v30 = vrot.slane %v2765_v45, 2 }
 0x5d6   :  { %v2760_v31 = vrot.slane %v2759_v49, 2  ;;  %v2772_v32 = vrot.slane %v2771_v25, 2 }
 0x5d7   :  { %v2755_v37 = vadd.f32 %v2754_v29, %v2753_v28  ;;  %v2767_v38 = vadd.f32 %v2766_v30, %v2765_v45 }
 0x5d8   :  { %v2761_v42 = vadd.f32 %v2760_v31, %v2759_v49  ;;  %v2773_v16 = vadd.f32 %v2772_v32, %v2771_v25 }
 0x5d9   :  { %v2756_v39 = vrot.slane %v2755_v37, 1  ;;  %v2768_v44 = vrot.slane %v2767_v38, 1 }
 0x5da   :  { %v2762_v63 = vrot.slane %v2761_v42, 1  ;;  %v2774_v48 = vrot.slane %v2773_v16, 1 }
 0x5db   :  { %v2757_v14 = vadd.f32 %v2756_v39, %v2755_v37  ;;  %v2769_v53 = vadd.f32 %v2768_v44, %v2767_v38 }
 0x5dc   :  { %v2763_v54 = vadd.f32 %v2762_v63, %v2761_v42  ;;  %v2775_v40 = vadd.f32 %v2774_v48, %v2773_v16 }
 0x5dd   :  { %v2800_v51 = vmul.f32 0.125, %v2757_v14  ;;  %v2802_v24 = vmul.f32 0.125, %v2769_v53 }
 0x5de   :  { %v2801_v55 = vmul.f32 0.125, %v2763_v54  ;;  %v2803_v56 = vmul.f32 0.125, %v2775_v40 }
 0x5df   :  { %v2808_v57 = vadd.f32 1e-05, %v2800_v51  ;;  %v2810_v34 = vadd.f32 1e-05, %v2802_v24 }
 0x5e0   :  { %v2809_v0 = vadd.f32 1e-05, %v2801_v55  ;;  %v2811_v58 = vadd.f32 1e-05, %v2803_v56 }
 0x5e1   :  { %3421 = vrsqrt.f32 %v2808_v57 }
 0x5e2   :  { %3423 = vrsqrt.f32 %v2810_v34 }
 0x5e3   :  { %3425 = vrsqrt.f32 %v2809_v0 }
 0x5e4   :  { %3427 = vrsqrt.f32 %v2811_v58 }
 0x5eb   :  { %v3422_v43 = vpop.eup %3421 }
 0x5ec   :  { %v3424_v59 = vpop.eup %3423 }
 0x5ed   :  { %v3426_v60 = vpop.eup %3425 }
 0x5ee   :  { %v3428_v61 = vpop.eup %3427  ;;  %v2832_v1 = vcombine.low %v3422_v43, %v3426_v60 }
 0x5ef   :  { %v2833_v62 = vcombine.low %v3424_v59, %v3428_v61 }
 0x5f0   :  { %v2840_v41 = vrot.slane %v2832_v1, %v3716_v5 }
 0x5f1   :  { %v2847_v2 = vrot.slane %v2833_v62, %v3716_v5 }
 0x5f3   :  { %v2848_v6 = vcombine.low %v2840_v41, %v2847_v2 }
 0x5f5   :  { %v2868_v20 = vmul.f32 %v2848_v6, %v2180_v3 }
 0x5f7   :  { %v2875_v22 = vrot.slane %v2868_v20, %v3728_v15  ;;  %v2879_v33 = vrot.slane %v2868_v20, %v3730_v17  ;;  %v2883_v36 = vrot.slane %v2868_v20, %v3732_v18  ;;  %v2887_v26 = vrot.slane %v2868_v20, %v3734_v19 }
 0x5f9   :  { %v2915_v28 = vrot.slane %v2875_v22, %v3728_v15  ;;  %v2919_v45 = vrot.slane %v2879_v33, %v3728_v15  ;;  %v2923_v49 = vrot.slane %v2883_v36, %v3728_v15  ;;  %v2927_v25 = vrot.slane %v2887_v26, %v3728_v15 }
 0x5fb   :  { %v2944_v29 = vmul.f32 %v2915_v28, %v3911_v50  ;;  %v2945_v30 = vmul.f32 %v2919_v45, %v3915_v21  ;;  %v2946_v31 = vmul.f32 %v2923_v49, %v3913_v52  ;;  %v2947_v32 = vmul.f32 %v2927_v25, %v3917_v23 }
 0x5fd   :  { %v3026_v37 = vadd.f32 %v2997_v27, %v2944_v29  ;;  %v3027_v38 = vadd.f32 %v3001_v35, %v2945_v30  ;;  %v3028_v42 = vadd.f32 %v3005_v46, %v2946_v31  ;;  %v3029_v16 = vadd.f32 %v3009_v47, %v2947_v32 }
 0x5ff   :  { %v3034_v39 = vmax.f32 %v3026_v37, 0.0  ;;  %v3035_v44 = vmax.f32 %v3027_v38, 0.0  ;;  %v3036_v63 = vmax.f32 %v3028_v42, 0.0  ;;  %v3037_v48 = vmax.f32 %v3029_v16, 0.0 }
 0x601   :  { %3045 = vst [vmem:[#allocation13 + $0x18] sm:$0xff] %v3037_v48  ;;  %3042 = vst [vmem:[#allocation13] sm:$0xff] %v3034_v39 }
 0x602   :  { %3043 = vst [vmem:[#allocation13 + $0x8] sm:$0xff] %v3035_v44  ;;  %3044 = vst [vmem:[#allocation13 + $0x10] sm:$0xff] %v3036_v63 }
 0x67e   :  { %v2550_v14 = vpop.f32.mrb[16].mxu1  ;;  %v2673_v50 = vpop.f32.mrb[16].mxu0 }
 0x67f   :  { %v2704_v53 = vrot.slane %v2550_v14, 4  ;;  %v2716_v21 = vrot.slane %v2673_v50, 4  ;;  %v2552_v54 = vpop.f32.mrb[17].mxu1  ;;  %v2675_v52 = vpop.f32.mrb[17].mxu0 }
 0x680   :  { %v2710_v40 = vrot.slane %v2552_v54, 4  ;;  %v2722_v23 = vrot.slane %v2675_v52, 4  ;;  %v2554_v51 = vpop.f32.mrb[18].mxu1  ;;  %v2677_v24 = vpop.f32.mrb[18].mxu0 }
 0x681   :  { %v2705_v55 = vadd.f32 %v2704_v53, %v2550_v14  ;;  %v2717_v56 = vadd.f32 %v2716_v21, %v2673_v50  ;;  %v2555_v57 = vpop.f32.mrb[19].mxu1  ;;  %v2678_v34 = vpop.f32.mrb[19].mxu0 }
 0x682   :  { %v2711_v0 = vadd.f32 %v2710_v40, %v2552_v54  ;;  %v2723_v58 = vadd.f32 %v2722_v23, %v2675_v52 }
 0x683   :  { %v2706_v43 = vrot.slane %v2705_v55, 2  ;;  %v2718_v59 = vrot.slane %v2717_v56, 2 }
 0x684   :  { %v2712_v60 = vrot.slane %v2711_v0, 2  ;;  %v2724_v61 = vrot.slane %v2723_v58, 2 }
 0x685   :  { %v2707_v1 = vadd.f32 %v2706_v43, %v2705_v55  ;;  %v2719_v62 = vadd.f32 %v2718_v59, %v2717_v56 }
 0x686   :  { %v2713_v41 = vadd.f32 %v2712_v60, %v2711_v0  ;;  %v2725_v2 = vadd.f32 %v2724_v61, %v2723_v58 }
 0x687   :  { %v2708_v3 = vrot.slane %v2707_v1, 1  ;;  %v2720_v6 = vrot.slane %v2719_v62, 1 }
 0x688   :  { %v2714_v7 = vrot.slane %v2713_v41, 1  ;;  %v2726_v12 = vrot.slane %v2725_v2, 1 }
 0x689   :  { %v2709_v4 = vadd.f32 %v2708_v3, %v2707_v1  ;;  %v2721_v13 = vadd.f32 %v2720_v6, %v2719_v62 }
 0x68a   :  { %v2715_v20 = vadd.f32 %v2714_v7, %v2713_v41  ;;  %v2727_v22 = vadd.f32 %v2726_v12, %v2725_v2 }
 0x68b   :  { %v2732_v33 = vmul.f32 0.125, %v2709_v4  ;;  %v2734_v36 = vmul.f32 0.125, %v2721_v13  ;;  %v2181_v13 = vld [vmem:[#allocation11 + $0x8] sm:$0xff] }
 0x68c   :  { %v2733_v26 = vmul.f32 0.125, %v2715_v20  ;;  %v2735_v27 = vmul.f32 0.125, %v2727_v22  ;;  %v2973_v22 = vrot.slane %v2181_v13, %v3718_v8 }
 0x68d   :  { %v3949_v35 = vsub.f32 %v2550_v14, %v2732_v33  ;;  %v3951_v46 = vsub.f32 %v2673_v50, %v2734_v36  ;;  %v2977_v33 = vrot.slane %v2181_v13, %v3720_v9  ;;  %v2981_v36 = vrot.slane %v2181_v13, %v3722_v10 }
 0x68e   :  { %v3953_v47 = vsub.f32 %v2552_v54, %v2733_v26  ;;  %v3955_v28 = vsub.f32 %v2675_v52, %v2735_v27  ;;  %v2985_v26 = vrot.slane %v2181_v13, %v3724_v11 }
 0x68f   :  { %v2748_v45 = vmul.f32 %v3949_v35, %v3949_v35  ;;  %v2750_v49 = vmul.f32 %v3951_v46, %v3951_v46 }
 0x690   :  { %v2749_v25 = vmul.f32 %v3953_v47, %v3953_v47  ;;  %v2751_v29 = vmul.f32 %v3955_v28, %v3955_v28  ;;  %v3025_v9 = vrot.slane %v2985_v26, %v3718_v8 }
 0x691   :  { %v2776_v30 = vrot.slane %v2748_v45, 4  ;;  %v2788_v31 = vrot.slane %v2750_v49, 4 }
 0x692   :  { %v2782_v32 = vrot.slane %v2749_v25, 4  ;;  %v2794_v37 = vrot.slane %v2751_v29, 4 }
 0x693   :  { %v2777_v38 = vadd.f32 %v2776_v30, %v2748_v45  ;;  %v2789_v42 = vadd.f32 %v2788_v31, %v2750_v49  ;;  %v3017_v30 = vrot.slane %v2977_v33, %v3718_v8  ;;  %v3021_v31 = vrot.slane %v2981_v36, %v3718_v8 }
 0x694   :  { %v2783_v16 = vadd.f32 %v2782_v32, %v2749_v25  ;;  %v2795_v39 = vadd.f32 %v2794_v37, %v2751_v29 }
 0x695   :  { %v2778_v44 = vrot.slane %v2777_v38, 2  ;;  %v2790_v63 = vrot.slane %v2789_v42, 2 }
 0x696   :  { %v2784_v48 = vrot.slane %v2783_v16, 2  ;;  %v2796_v14 = vrot.slane %v2795_v39, 2 }
 0x697   :  { %v2779_v50 = vadd.f32 %v2778_v44, %v2777_v38  ;;  %v2791_v53 = vadd.f32 %v2790_v63, %v2789_v42 }
 0x698   :  { %v2785_v21 = vadd.f32 %v2784_v48, %v2783_v16  ;;  %v2797_v54 = vadd.f32 %v2796_v14, %v2795_v39 }
 0x699   :  { %v2780_v52 = vrot.slane %v2779_v50, 1  ;;  %v2792_v40 = vrot.slane %v2791_v53, 1 }
 0x69a   :  { %v2786_v23 = vrot.slane %v2785_v21, 1  ;;  %v2798_v51 = vrot.slane %v2797_v54, 1 }
 0x69b   :  { %v2781_v24 = vadd.f32 %v2780_v52, %v2779_v50  ;;  %v2793_v55 = vadd.f32 %v2792_v40, %v2791_v53 }
 0x69c   :  { %v2787_v56 = vadd.f32 %v2786_v23, %v2785_v21  ;;  %v2799_v57 = vadd.f32 %v2798_v51, %v2797_v54 }
 0x69d   :  { %v2804_v34 = vmul.f32 0.125, %v2781_v24  ;;  %v2806_v0 = vmul.f32 0.125, %v2793_v55 }
 0x69e   :  { %v2805_v58 = vmul.f32 0.125, %v2787_v56  ;;  %v2807_v43 = vmul.f32 0.125, %v2799_v57 }
 0x69f   :  { %v2812_v59 = vadd.f32 1e-05, %v2804_v34  ;;  %v2814_v60 = vadd.f32 1e-05, %v2806_v0 }
 0x6a0   :  { %v2813_v61 = vadd.f32 1e-05, %v2805_v58  ;;  %v2815_v1 = vadd.f32 1e-05, %v2807_v43 }
 0x6a1   :  { %3429 = vrsqrt.f32 %v2812_v59 }
 0x6a2   :  { %3431 = vrsqrt.f32 %v2814_v60 }
 0x6a3   :  { %3433 = vrsqrt.f32 %v2813_v61 }
 0x6a4   :  { %3435 = vrsqrt.f32 %v2815_v1 }
 0x6ab   :  { %v3430_v62 = vpop.eup %3429 }
 0x6ac   :  { %v3432_v41 = vpop.eup %3431 }
 0x6ad   :  { %v3434_v2 = vpop.eup %3433 }
 0x6ae   :  { %v3436_v3 = vpop.eup %3435  ;;  %v2849_v6 = vcombine.low %v3430_v62, %v3434_v2 }
 0x6af   :  { %v2850_v7 = vcombine.low %v3432_v41, %v3436_v3 }
 0x6b0   :  { %v2857_v12 = vrot.slane %v2849_v6, %v3716_v5 }
 0x6b1   :  { %v2864_v4 = vrot.slane %v2850_v7, %v3716_v5  ;;  %v3013_v5 = vrot.slane %v2973_v22, %v3718_v8 }
 0x6b3   :  { %v2865_v20 = vcombine.low %v2857_v12, %v2864_v4 }
 0x6b5   :  { %v2869_v27 = vmul.f32 %v2865_v20, %v2181_v13 }
 0x6b7   :  { %v2891_v45 = vrot.slane %v2869_v27, %v3728_v15  ;;  %v2895_v49 = vrot.slane %v2869_v27, %v3730_v17  ;;  %v2899_v25 = vrot.slane %v2869_v27, %v3732_v18  ;;  %v2903_v29 = vrot.slane %v2869_v27, %v3734_v19 }
 0x6b9   :  { %v2931_v10 = vrot.slane %v2891_v45, %v3728_v15  ;;  %v2935_v11 = vrot.slane %v2895_v49, %v3728_v15  ;;  %v2939_v32 = vrot.slane %v2899_v25, %v3728_v15  ;;  %v2943_v17 = vrot.slane %v2903_v29, %v3728_v15 }
 0x6bb   :  { %v2948_v18 = vmul.f32 %v2931_v10, %v3949_v35  ;;  %v2949_v19 = vmul.f32 %v2935_v11, %v3953_v47  ;;  %v2950_v37 = vmul.f32 %v2939_v32, %v3951_v46  ;;  %v2951_v38 = vmul.f32 %v2943_v17, %v3955_v28 }
 0x6bd   :  { %v3030_v42 = vadd.f32 %v3013_v5, %v2948_v18  ;;  %v3031_v8 = vadd.f32 %v3017_v30, %v2949_v19  ;;  %v3032_v16 = vadd.f32 %v3021_v31, %v2950_v37  ;;  %v3033_v39 = vadd.f32 %v3025_v9, %v2951_v38 }
 0x6bf   :  { %v3038_v44 = vmax.f32 %v3030_v42, 0.0  ;;  %v3039_v63 = vmax.f32 %v3031_v8, 0.0  ;;  %v3040_v48 = vmax.f32 %v3032_v16, 0.0  ;;  %v3041_v14 = vmax.f32 %v3033_v39, 0.0 }
 0x6c1   :  { %3049 = vst [vmem:[#allocation13 + $0x38] sm:$0xff] %v3041_v14  ;;  %3046 = vst [vmem:[#allocation13 + $0x20] sm:$0xff] %v3038_v44 }
 0x6c2   :  { %3047 = vst [vmem:[#allocation13 + $0x28] sm:$0xff] %v3039_v63  ;;  %3048 = vst [vmem:[#allocation13 + $0x30] sm:$0xff] %v3040_v48 }
 0x6c3   :  { %3536 = shalt.err (!%p3533_p8)
}
 0x6c4   :  { %s3537_s4 = scalar_lea.hbm %s4006_s7, 1024 }
 0x6c5   :  { %p3538_p9 = scmp.ne.s32.totalorder %s4006_s7, %s3537_s4  ;;  %p3541_p10 = scmp.lt.u32.totalorder %s3537_s4, %s4006_s7 }
 0x6c7   :  { %p3543_p11 = pnand %p3541_p10, %p3538_p9 }
 0x6c9   :  { %3546 = shalt.err (!%p3543_p11)
}
 0x6ca   :  { %3059 = dma.vmem_to_hbm [thread:$0]  %s3057_s26, 1024, %s4006_s7, [#allocation7]  }
 0x6cb   :  { %3557 = dma.done.wait [#allocation7], 1024  }
 0x6cc   :  { %3558 = vsyncadd [#allocation7], 4294966272 }
 0x6cd   :  { %3063 = vsyncpa [#allocation6], 1 }
 0x6ce   :  { %3064 = vsyncpa [#allocation9], 1 }
 0x6cf   :  { %3065 = vsyncpa [#allocation12], 1 }
 0x6d0   :  { %3066 = vsyncpa [#allocation7], 1 }
 0x6d1   :  { %3067 = vsyncmov [#allocation4] }
 0x6d4   :  { %s3068_s14 = vpop.sfrf %3067 }
 0x6d5   :  { %p3180_p12 = scmp.ne.s32.totalorder %s3068_s14, 0 }
 0x6d7   :  { %3072 = shalt.err (%p3180_p12)  }
 0x6d8   :  { %3074 = vsyncmov [#allocation4 + $0x1] }
 0x6db   :  { %s3075_s1 = vpop.sfrf %3074 }
 0x6dc   :  { %p3181_p13 = scmp.ne.s32.totalorder %s3075_s1, 0 }
 0x6de   :  { %3079 = shalt.err (%p3181_p13)  }

</bundles_post_ra>
